<compile_context>
chip_gen: v5e
topology: v5e:2x2
jax: 0.10.0
libtpu: 0.0.40
codegen_flags: <defaults>
</compile_context>

<pallas_src>
import functools

import jax
import jax.numpy as jnp
from jax.experimental import pallas as pl
from jax.experimental.pallas import tpu as pltpu


def _vmem():
    return pl.BlockSpec(memory_space=pltpu.MemorySpace.VMEM)


# ----------------------------------------------------------------------------
# Kernel 1: patch embedding (conv-as-matmul) + cls token + position embedding,
# producing the padded (B * S_pad, D) token slab.
# ----------------------------------------------------------------------------
def _embed_kernel(patches_ref, pw_ref, pb_ref, clspos_ref, o_ref, *,
                  batch, n_patches, s_pad):
    # bf16 operands, f32 accumulation.
    emb = jnp.dot(patches_ref[...].astype(jnp.bfloat16), pw_ref[...],
                  preferred_element_type=jnp.float32) + pb_ref[...]   # (B*nP, D)
    for l in range(batch):
        emb_l = emb[l * n_patches:(l + 1) * n_patches, :]             # (nP, D)
        pieces = [clspos_ref[0:1, :],                                 # cls + pos[0]
                  clspos_ref[1:1 + n_patches, :] + emb_l]             # emb + pos[1:]
        if s_pad > 1 + n_patches:
            pieces.append(clspos_ref[1 + n_patches:s_pad, :])         # zero pad rows
        tok_l = jnp.concatenate(pieces, axis=0)                       # (S_pad, D)
        o_ref[l * s_pad:(l + 1) * s_pad, :] = tok_l                   # aligned store


def pallas_embed(patches, patch_w, patch_b, clspos, *, batch, n_patches,
                 s_pad, depth):
    kernel = functools.partial(_embed_kernel, batch=batch,
                               n_patches=n_patches, s_pad=s_pad)
    return pl.pallas_call(
        kernel,
        out_shape=jax.ShapeDtypeStruct((batch * s_pad, depth), jnp.float32),
        in_specs=[_vmem()] * 4,
        out_specs=_vmem(),
    )(patches, patch_w, patch_b, clspos)


# ----------------------------------------------------------------------------
# Kernel 2: full transformer encoder (all layers, stacked weights) + classifier.
# Row layout: r = l * S_pad + n,  l in [0, B) = attention sequence axis,
# n in [0, S_pad) = token axis (padded rows are inert: attention never mixes n).
# ----------------------------------------------------------------------------
def _layer_norm(x, g, b, eps=1e-5):
    mu = jnp.mean(x, axis=-1, keepdims=True)
    xc = x - mu
    var = jnp.mean(xc * xc, axis=-1, keepdims=True)
    return xc * jax.lax.rsqrt(var + eps) * g + b


def _encoder_head_kernel(x_ref, bd_ref, bdt_ref,
                         wqkv_ref, bqkv_ref, wo_ref, bo_ref,
                         ln1g_ref, ln1b_ref, w1_ref, b1_ref, w2_ref, b2_ref,
                         ln2g_ref, ln2b_ref, fcw_ref, fcb_ref, logits_ref,
                         *, num_layers, attn_len, s_pad, num_heads):
    x = x_ref[...]                                   # (L*S_pad, D) f32
    d = x.shape[-1]
    L, H = attn_len, num_heads
    hd = d // H
    scale = 1.0 / (hd ** 0.5)
    bd = bd_ref[...]                                 # (D, H) block-diag ones
    bd_t = bdt_ref[...]                              # (H, D)

    for lp in range(num_layers):
        # ---- multi-head self-attention over the L (batch) axis, per token --
        qkv = jnp.dot(x.astype(jnp.bfloat16), wqkv_ref[lp],
                      preferred_element_type=jnp.float32) + bqkv_ref[lp]
        q = qkv[:, 0:d] * scale
        k = qkv[:, d:2 * d]
        v = qkv[:, 2 * d:3 * d]

        outs = []
        for l in range(L):                                           # L == B (small)
            q_l = q[l * s_pad:(l + 1) * s_pad, :]                    # (S_pad, D)
            # all-head scores for key position m: one MXU reduce per m
            scores = [jnp.dot(q_l * k[m * s_pad:(m + 1) * s_pad, :], bd,
                              preferred_element_type=jnp.float32)    # (S_pad, H)
                      for m in range(L)]
            row_max = scores[0]
            for m in range(1, L):
                row_max = jnp.maximum(row_max, scores[m])
            exps = [jnp.exp(s - row_max) for s in scores]
            denom = exps[0]
            for m in range(1, L):
                denom = denom + exps[m]
            inv = pl.reciprocal(denom, approx=True)                  # EUP slot
            o_l = None
            for m in range(L):
                w_m = jnp.dot(exps[m] * inv, bd_t,
                              preferred_element_type=jnp.float32)    # (S_pad, D)
                term = w_m * v[m * s_pad:(m + 1) * s_pad, :]
                o_l = term if o_l is None else o_l + term
            outs.append(o_l)
        attn = jnp.concatenate(outs, axis=0)                         # (L*S_pad, D)
        attn = jnp.dot(attn.astype(jnp.bfloat16), wo_ref[lp],
                       preferred_element_type=jnp.float32) + bo_ref[lp]

        # ---- residual + norm1 (eval-mode dropout == identity) --------------
        h1 = _layer_norm(x + attn, ln1g_ref[lp], ln1b_ref[lp])

        # ---- ReLU feed-forward + residual + norm2 ---------------------------
        f = jnp.dot(h1.astype(jnp.bfloat16), w1_ref[lp],
                    preferred_element_type=jnp.float32) + b1_ref[lp]
        f = jnp.maximum(f, 0.0)
        f = jnp.dot(f.astype(jnp.bfloat16), w2_ref[lp],
                    preferred_element_type=jnp.float32) + b2_ref[lp]
        x = _layer_norm(h1 + f, ln2g_ref[lp], ln2b_ref[lp])

    # ---- classifier head on the CLS rows (lane-dense padded output) --------
    cls_rows = jnp.concatenate(
        [x[l * s_pad:l * s_pad + 1, :] for l in range(L)], axis=0)   # (L, D)
    logits_ref[...] = (jnp.dot(cls_rows.astype(jnp.bfloat16), fcw_ref[...],
                               preferred_element_type=jnp.float32)
                       + fcb_ref[...])


def pallas_encoder_head(tokens, bd, bd_t, layers, fc_w, fc_b, *, num_layers,
                        attn_len, s_pad, num_heads, nc_pad):
    kernel = functools.partial(_encoder_head_kernel, num_layers=num_layers,
                               attn_len=attn_len, s_pad=s_pad,
                               num_heads=num_heads)
    args = (tokens, bd, bd_t,
            layers["wqkv"], layers["bqkv"], layers["wo"], layers["bo"],
            layers["ln1_g"], layers["ln1_b"], layers["w1"], layers["b1"],
            layers["w2"], layers["b2"], layers["ln2_g"], layers["ln2_b"],
            fc_w, fc_b)
    return pl.pallas_call(
        kernel,
        out_shape=jax.ShapeDtypeStruct((attn_len, nc_pad), jnp.float32),
        in_specs=[_vmem()] * len(args),
        out_specs=_vmem(),
    )(*args)


# ----------------------------------------------------------------------------
# Full forward pass.
# ----------------------------------------------------------------------------
def mobilevit_forward(x, params, *, cfg):
    B, C, H, W = x.shape
    P, D = cfg["patch_size"], cfg["depth"]
    nH, nW = H // P, W // P
    nP = nH * nW
    S = nP + 1
    S_pad = ((S + 7) // 8) * 8

    # Conv2d(3, D, P, stride=P) == patch extraction (glue reshape) + matmul.
    patches = x.reshape(B, C, nH, P, nW, P).transpose(0, 2, 4, 1, 3, 5)
    patches = patches.reshape(B * nP, C * P * P)

    # cls+pos rows, zero-padded to S_pad. Param-only glue; avoids materializing
    # a broadcast (B, S, D) array in HBM.
    clspos = jnp.concatenate(
        [params["cls_token"] + params["pos_emb"][0:1, :],
         params["pos_emb"][1:, :],
         jnp.zeros((S_pad - S, D), jnp.float32)], axis=0)

    tokens = pallas_embed(patches, params["patch_w"], params["patch_b"], clspos,
                          batch=B, n_patches=nP, s_pad=S_pad, depth=D)
    # dropout(0.1): identity under eval semantics.

    # Block-diagonal head reduce/broadcast matrices (static, constant-folded).
    hd = D // cfg["num_heads"]
    bd = (jnp.arange(D)[:, None] // hd
          == jnp.arange(cfg["num_heads"])[None, :]).astype(jnp.float32)
    bd_t = bd.T

    logits_pad = pallas_encoder_head(
        tokens, bd, bd_t, params["layers"], params["fc_w"], params["fc_b"],
        num_layers=cfg["num_layers"], attn_len=B, s_pad=S_pad,
        num_heads=cfg["num_heads"], nc_pad=params["fc_w"].shape[1])
    return logits_pad[:, :cfg["num_classes"]]


# ----------------------------------------------------------------------------
# Deterministic parameter initialization. Matmul weights pre-transposed to
# (in, out) layout and stored bf16; biases / LN params / embeddings f32.
# Layer weights stacked on a leading num_layers axis for the fused kernel.
# ----------------------------------------------------------------------------
def init_params(key, cfg):
    C, P, D, F = 3, cfg["patch_size"], cfg["depth"], cfg["d_ff"]
    L = cfg["num_layers"]
    S = (cfg["image_size"] // P) ** 2 + 1
    NC = cfg["num_classes"]
    NC_pad = 128                                        # lane-dense classifier
    keys = iter(jax.random.split(key, 16))

    def w(shape, scale=0.02):
        return (scale * jax.random.normal(next(keys), shape)).astype(jnp.float32)

    fc_w = jnp.zeros((D, NC_pad), jnp.float32).at[:, :NC].set(w((D, NC)))
    fc_b = jnp.zeros((1, NC_pad), jnp.float32).at[:, :NC].set(w((NC,)))

    params = {
        "patch_w": w((C * P * P, D)).astype(jnp.bfloat16),  # Conv2d weight, (in, out)
        "patch_b": w((D,)).reshape(1, D),
        "cls_token": w((1, D)),
        "pos_emb": w((S, D)),
        "fc_w": fc_w.astype(jnp.bfloat16),
        "fc_b": fc_b,
        "layers": {
            "wqkv": w((L, D, 3 * D)).astype(jnp.bfloat16),  # in_proj_weight.T
            "bqkv": w((L, 1, 3 * D)),
            "wo": w((L, D, D)).astype(jnp.bfloat16),        # out_proj.weight.T
            "bo": w((L, 1, D)),
            "ln1_g": jnp.ones((L, 1, D), jnp.float32),
            "ln1_b": jnp.zeros((L, 1, D), jnp.float32),
            "w1": w((L, D, F)).astype(jnp.bfloat16),        # linear1.weight.T
            "b1": w((L, 1, F)),
            "w2": w((L, F, D)).astype(jnp.bfloat16),        # linear2.weight.T
            "b2": w((L, 1, D)),
            "ln2_g": jnp.ones((L, 1, D), jnp.float32),
            "ln2_b": jnp.zeros((L, 1, D), jnp.float32),
        },
    }
    return params


if __name__ == "__main__":
    cfg = dict(num_layers=2, patch_size=16, image_size=64, depth=128,
               num_heads=8, d_ff=256, num_classes=4)
    key = jax.random.PRNGKey(0)
    kp, kx = jax.random.split(key)
    params = init_params(kp, cfg)
    batch = 2
    x = jax.random.normal(
        kx, (batch, 3, cfg["image_size"], cfg["image_size"]), jnp.float32)

    fwd = jax.jit(functools.partial(mobilevit_forward, cfg=cfg))
    out = jax.block_until_ready(fwd(x, params))
    assert out.shape == (batch, cfg["num_classes"])
    assert bool(jnp.all(jnp.isfinite(out)))
    print("KERNEL_OK")
</pallas_src>

<mosaic_0001>
module attributes {stable_mosaic.version = 11 : i64} {
  func.func @_embed_kernel(%arg0: memref<32x768xf32, #tpu.memory_space<vmem>>, %arg1: memref<768x128xbf16, #tpu.memory_space<vmem>>, %arg2: memref<1x128xf32, #tpu.memory_space<vmem>>, %arg3: memref<24x128xf32, #tpu.memory_space<vmem>>, %arg4: memref<48x128xf32, #tpu.memory_space<vmem>>) attributes {dimension_semantics = [], scalar_prefetch = 0 : i64, scratch_operands = 0 : i64, tpu.core_type = #tpu.core_type<tc>} {
    %c0 = arith.constant 0 : index
    %c0_0 = arith.constant 0 : index
    %0 = vector.load %arg0[%c0, %c0_0] : memref<32x768xf32, #tpu.memory_space<vmem>>, vector<32x768xf32>
    %1 = arith.truncf %0 : vector<32x768xf32> to vector<32x768xbf16>
    %c0_1 = arith.constant 0 : index
    %c0_2 = arith.constant 0 : index
    %2 = vector.load %arg1[%c0_1, %c0_2] : memref<768x128xbf16, #tpu.memory_space<vmem>>, vector<768x128xbf16>
    %cst = arith.constant dense<0.000000e+00> : vector<32x128xf32>
    %3 = tpu.matmul %1, %2, %cst {dimension_numbers = #tpu.dot_dimension_numbers<[1], [0], [0], [1], [0, 0, 1, 1], [], []>} : vector<32x768xbf16>, vector<768x128xbf16>, vector<32x128xf32> -> vector<32x128xf32>
    %c0_3 = arith.constant 0 : index
    %c0_4 = arith.constant 0 : index
    %4 = vector.load %arg2[%c0_3, %c0_4] : memref<1x128xf32, #tpu.memory_space<vmem>>, vector<1x128xf32>
    %5 = vector.broadcast %4 : vector<1x128xf32> to vector<32x128xf32>
    %6 = arith.addf %3, %5 : vector<32x128xf32>
    %7 = vector.extract_strided_slice %6 {offsets = [0, 0], sizes = [16, 128], strides = [1, 1]} : vector<32x128xf32> to vector<16x128xf32>
    %c0_5 = arith.constant 0 : index
    %c0_6 = arith.constant 0 : index
    %8 = vector.load %arg3[%c0_5, %c0_6] : memref<24x128xf32, #tpu.memory_space<vmem>>, vector<1x128xf32>
    %c1 = arith.constant 1 : index
    %c0_7 = arith.constant 0 : index
    %9 = vector.load %arg3[%c1, %c0_7] : memref<24x128xf32, #tpu.memory_space<vmem>>, vector<16x128xf32>
    %10 = arith.addf %9, %7 : vector<16x128xf32>
    %c17 = arith.constant 17 : index
    %c0_8 = arith.constant 0 : index
    %11 = vector.load %arg3[%c17, %c0_8] : memref<24x128xf32, #tpu.memory_space<vmem>>, vector<7x128xf32>
    %12 = tpu.concatenate %8, %10, %11 in 0 : vector<1x128xf32>, vector<16x128xf32>, vector<7x128xf32> -> vector<24x128xf32>
    %c0_9 = arith.constant 0 : index
    %c0_10 = arith.constant 0 : index
    %13 = vector.load %arg4[%c0_9, %c0_10] : memref<48x128xf32, #tpu.memory_space<vmem>>, vector<24x128xf32>
    tpu.vector_store %arg4[%c0_9, %c0_10], %12 {strides = array<i32>} : memref<48x128xf32, #tpu.memory_space<vmem>>, vector<24x128xf32>,
    %14 = vector.extract_strided_slice %6 {offsets = [16, 0], sizes = [16, 128], strides = [1, 1]} : vector<32x128xf32> to vector<16x128xf32>
    %c0_11 = arith.constant 0 : index
    %c0_12 = arith.constant 0 : index
    %15 = vector.load %arg3[%c0_11, %c0_12] : memref<24x128xf32, #tpu.memory_space<vmem>>, vector<1x128xf32>
    %c1_13 = arith.constant 1 : index
    %c0_14 = arith.constant 0 : index
    %16 = vector.load %arg3[%c1_13, %c0_14] : memref<24x128xf32, #tpu.memory_space<vmem>>, vector<16x128xf32>
    %17 = arith.addf %16, %14 : vector<16x128xf32>
    %c17_15 = arith.constant 17 : index
    %c0_16 = arith.constant 0 : index
    %18 = vector.load %arg3[%c17_15, %c0_16] : memref<24x128xf32, #tpu.memory_space<vmem>>, vector<7x128xf32>
    %19 = tpu.concatenate %15, %17, %18 in 0 : vector<1x128xf32>, vector<16x128xf32>, vector<7x128xf32> -> vector<24x128xf32>
    %c24 = arith.constant 24 : index
    %c0_17 = arith.constant 0 : index
    %20 = vector.load %arg4[%c24, %c0_17] : memref<48x128xf32, #tpu.memory_space<vmem>>, vector<24x128xf32>
    tpu.vector_store %arg4[%c24, %c0_17], %19 {strides = array<i32>} : memref<48x128xf32, #tpu.memory_space<vmem>>, vector<24x128xf32>,
    return
  }
}

module attributes {stable_mosaic.version = 11 : i64} {
  func.func @_encoder_head_kernel(%arg0: memref<48x128xf32, #tpu.memory_space<vmem>>, %arg1: memref<128x8xf32, #tpu.memory_space<vmem>>, %arg2: memref<8x128xf32, #tpu.memory_space<vmem>>, %arg3: memref<2x128x384xbf16, #tpu.memory_space<vmem>>, %arg4: memref<2x1x384xf32, #tpu.memory_space<vmem>>, %arg5: memref<2x128x128xbf16, #tpu.memory_space<vmem>>, %arg6: memref<2x1x128xf32, #tpu.memory_space<vmem>>, %arg7: memref<2x1x128xf32, #tpu.memory_space<vmem>>, %arg8: memref<2x1x128xf32, #tpu.memory_space<vmem>>, %arg9: memref<2x128x256xbf16, #tpu.memory_space<vmem>>, %arg10: memref<2x1x256xf32, #tpu.memory_space<vmem>>, %arg11: memref<2x256x128xbf16, #tpu.memory_space<vmem>>, %arg12: memref<2x1x128xf32, #tpu.memory_space<vmem>>, %arg13: memref<2x1x128xf32, #tpu.memory_space<vmem>>, %arg14: memref<2x1x128xf32, #tpu.memory_space<vmem>>, %arg15: memref<128x128xbf16, #tpu.memory_space<vmem>>, %arg16: memref<1x128xf32, #tpu.memory_space<vmem>>, %arg17: memref<2x128xf32, #tpu.memory_space<vmem>>) attributes {dimension_semantics = [], scalar_prefetch = 0 : i64, scratch_operands = 0 : i64, tpu.core_type = #tpu.core_type<tc>} {
    %c0 = arith.constant 0 : index
    %c0_0 = arith.constant 0 : index
    %0 = vector.load %arg0[%c0, %c0_0] : memref<48x128xf32, #tpu.memory_space<vmem>>, vector<48x128xf32>
    %c0_1 = arith.constant 0 : index
    %c0_2 = arith.constant 0 : index
    %1 = vector.load %arg1[%c0_1, %c0_2] : memref<128x8xf32, #tpu.memory_space<vmem>>, vector<128x8xf32>
    %c0_3 = arith.constant 0 : index
    %c0_4 = arith.constant 0 : index
    %2 = vector.load %arg2[%c0_3, %c0_4] : memref<8x128xf32, #tpu.memory_space<vmem>>, vector<8x128xf32>
    %3 = arith.truncf %0 : vector<48x128xf32> to vector<48x128xbf16>
    %c0_5 = arith.constant 0 : index
    %c0_6 = arith.constant 0 : index
    %c0_7 = arith.constant 0 : index
    %4 = vector.load %arg3[%c0_5, %c0_6, %c0_7] : memref<2x128x384xbf16, #tpu.memory_space<vmem>>, vector<1x128x384xbf16>
    %5 = vector.shape_cast %4 : vector<1x128x384xbf16> to vector<128x384xbf16>
    %cst = arith.constant dense<0.000000e+00> : vector<48x384xf32>
    %6 = tpu.matmul %3, %5, %cst {dimension_numbers = #tpu.dot_dimension_numbers<[1], [0], [0], [1], [0, 0, 1, 1], [], []>} : vector<48x128xbf16>, vector<128x384xbf16>, vector<48x384xf32> -> vector<48x384xf32>
    %c0_8 = arith.constant 0 : index
    %c0_9 = arith.constant 0 : index
    %c0_10 = arith.constant 0 : index
    %7 = vector.load %arg4[%c0_8, %c0_9, %c0_10] : memref<2x1x384xf32, #tpu.memory_space<vmem>>, vector<1x1x384xf32>
    %8 = vector.shape_cast %7 : vector<1x1x384xf32> to vector<1x384xf32>
    %9 = vector.broadcast %8 : vector<1x384xf32> to vector<48x384xf32>
    %10 = arith.addf %6, %9 : vector<48x384xf32>
    %11 = vector.extract_strided_slice %10 {offsets = [0, 0], sizes = [48, 128], strides = [1, 1]} : vector<48x384xf32> to vector<48x128xf32>
    %cst_11 = arith.constant 2.500000e-01 : f32
    %12 = vector.broadcast %cst_11 : f32 to vector<48x128xf32>
    %13 = arith.mulf %11, %12 : vector<48x128xf32>
    %14 = vector.extract_strided_slice %10 {offsets = [0, 128], sizes = [48, 128], strides = [1, 1]} : vector<48x384xf32> to vector<48x128xf32>
    %15 = vector.extract_strided_slice %10 {offsets = [0, 256], sizes = [48, 128], strides = [1, 1]} : vector<48x384xf32> to vector<48x128xf32>
    %16 = vector.extract_strided_slice %13 {offsets = [0, 0], sizes = [24, 128], strides = [1, 1]} : vector<48x128xf32> to vector<24x128xf32>
    %17 = vector.extract_strided_slice %14 {offsets = [0, 0], sizes = [24, 128], strides = [1, 1]} : vector<48x128xf32> to vector<24x128xf32>
    %18 = arith.mulf %16, %17 : vector<24x128xf32>
    %cst_12 = arith.constant dense<0.000000e+00> : vector<24x8xf32>
    %19 = tpu.matmul %18, %1, %cst_12 {dimension_numbers = #tpu.dot_dimension_numbers<[1], [0], [0], [1], [0, 0, 1, 1], [], []>} : vector<24x128xf32>, vector<128x8xf32>, vector<24x8xf32> -> vector<24x8xf32>
    %20 = vector.extract_strided_slice %14 {offsets = [24, 0], sizes = [24, 128], strides = [1, 1]} : vector<48x128xf32> to vector<24x128xf32>
    %21 = arith.mulf %16, %20 : vector<24x128xf32>
    %cst_13 = arith.constant dense<0.000000e+00> : vector<24x8xf32>
    %22 = tpu.matmul %21, %1, %cst_13 {dimension_numbers = #tpu.dot_dimension_numbers<[1], [0], [0], [1], [0, 0, 1, 1], [], []>} : vector<24x128xf32>, vector<128x8xf32>, vector<24x8xf32> -> vector<24x8xf32>
    %23 = arith.maximumf %19, %22 : vector<24x8xf32>
    %24 = arith.subf %19, %23 : vector<24x8xf32>
    %25 = math.exp %24 : vector<24x8xf32>
    %26 = arith.subf %22, %23 : vector<24x8xf32>
    %27 = math.exp %26 : vector<24x8xf32>
    %28 = arith.addf %25, %27 : vector<24x8xf32>
    %29 = tpu.reciprocal %28 {approx = true} : vector<24x8xf32> -> vector<24x8xf32>
    %30 = arith.mulf %25, %29 : vector<24x8xf32>
    %cst_14 = arith.constant dense<0.000000e+00> : vector<24x128xf32>
    %31 = tpu.matmul %30, %2, %cst_14 {dimension_numbers = #tpu.dot_dimension_numbers<[1], [0], [0], [1], [0, 0, 1, 1], [], []>} : vector<24x8xf32>, vector<8x128xf32>, vector<24x128xf32> -> vector<24x128xf32>
    %32 = vector.extract_strided_slice %15 {offsets = [0, 0], sizes = [24, 128], strides = [1, 1]} : vector<48x128xf32> to vector<24x128xf32>
    %33 = arith.mulf %31, %32 : vector<24x128xf32>
    %34 = arith.mulf %27, %29 : vector<24x8xf32>
    %cst_15 = arith.constant dense<0.000000e+00> : vector<24x128xf32>
    %35 = tpu.matmul %34, %2, %cst_15 {dimension_numbers = #tpu.dot_dimension_numbers<[1], [0], [0], [1], [0, 0, 1, 1], [], []>} : vector<24x8xf32>, vector<8x128xf32>, vector<24x128xf32> -> vector<24x128xf32>
    %36 = vector.extract_strided_slice %15 {offsets = [24, 0], sizes = [24, 128], strides = [1, 1]} : vector<48x128xf32> to vector<24x128xf32>
    %37 = arith.mulf %35, %36 : vector<24x128xf32>
    %38 = arith.addf %33, %37 : vector<24x128xf32>
    %39 = vector.extract_strided_slice %13 {offsets = [24, 0], sizes = [24, 128], strides = [1, 1]} : vector<48x128xf32> to vector<24x128xf32>
    %40 = vector.extract_strided_slice %14 {offsets = [0, 0], sizes = [24, 128], strides = [1, 1]} : vector<48x128xf32> to vector<24x128xf32>
    %41 = arith.mulf %39, %40 : vector<24x128xf32>
    %cst_16 = arith.constant dense<0.000000e+00> : vector<24x8xf32>
    %42 = tpu.matmul %41, %1, %cst_16 {dimension_numbers = #tpu.dot_dimension_numbers<[1], [0], [0], [1], [0, 0, 1, 1], [], []>} : vector<24x128xf32>, vector<128x8xf32>, vector<24x8xf32> -> vector<24x8xf32>
    %43 = vector.extract_strided_slice %14 {offsets = [24, 0], sizes = [24, 128], strides = [1, 1]} : vector<48x128xf32> to vector<24x128xf32>
    %44 = arith.mulf %39, %43 : vector<24x128xf32>
    %cst_17 = arith.constant dense<0.000000e+00> : vector<24x8xf32>
    %45 = tpu.matmul %44, %1, %cst_17 {dimension_numbers = #tpu.dot_dimension_numbers<[1], [0], [0], [1], [0, 0, 1, 1], [], []>} : vector<24x128xf32>, vector<128x8xf32>, vector<24x8xf32> -> vector<24x8xf32>
    %46 = arith.maximumf %42, %45 : vector<24x8xf32>
    %47 = arith.subf %42, %46 : vector<24x8xf32>
    %48 = math.exp %47 : vector<24x8xf32>
    %49 = arith.subf %45, %46 : vector<24x8xf32>
    %50 = math.exp %49 : vector<24x8xf32>
    %51 = arith.addf %48, %50 : vector<24x8xf32>
    %52 = tpu.reciprocal %51 {approx = true} : vector<24x8xf32> -> vector<24x8xf32>
    %53 = arith.mulf %48, %52 : vector<24x8xf32>
    %cst_18 = arith.constant dense<0.000000e+00> : vector<24x128xf32>
    %54 = tpu.matmul %53, %2, %cst_18 {dimension_numbers = #tpu.dot_dimension_numbers<[1], [0], [0], [1], [0, 0, 1, 1], [], []>} : vector<24x8xf32>, vector<8x128xf32>, vector<24x128xf32> -> vector<24x128xf32>
    %55 = vector.extract_strided_slice %15 {offsets = [0, 0], sizes = [24, 128], strides = [1, 1]} : vector<48x128xf32> to vector<24x128xf32>
    %56 = arith.mulf %54, %55 : vector<24x128xf32>
    %57 = arith.mulf %50, %52 : vector<24x8xf32>
    %cst_19 = arith.constant dense<0.000000e+00> : vector<24x128xf32>
    %58 = tpu.matmul %57, %2, %cst_19 {dimension_numbers = #tpu.dot_dimension_numbers<[1], [0], [0], [1], [0, 0, 1, 1], [], []>} : vector<24x8xf32>, vector<8x128xf32>, vector<24x128xf32> -> vector<24x128xf32>
    %59 = vector.extract_strided_slice %15 {offsets = [24, 0], sizes = [24, 128], strides = [1, 1]} : vector<48x128xf32> to vector<24x128xf32>
    %60 = arith.mulf %58, %59 : vector<24x128xf32>
    %61 = arith.addf %56, %60 : vector<24x128xf32>
    %62 = tpu.concatenate %38, %61 in 0 : vector<24x128xf32>, vector<24x128xf32> -> vector<48x128xf32>
    %63 = arith.truncf %62 : vector<48x128xf32> to vector<48x128xbf16>
    %c0_20 = arith.constant 0 : index
    %c0_21 = arith.constant 0 : index
    %c0_22 = arith.constant 0 : index
    %64 = vector.load %arg5[%c0_20, %c0_21, %c0_22] : memref<2x128x128xbf16, #tpu.memory_space<vmem>>, vector<1x128x128xbf16>
    %65 = vector.shape_cast %64 : vector<1x128x128xbf16> to vector<128x128xbf16>
    %cst_23 = arith.constant dense<0.000000e+00> : vector<48x128xf32>
    %66 = tpu.matmul %63, %65, %cst_23 {dimension_numbers = #tpu.dot_dimension_numbers<[1], [0], [0], [1], [0, 0, 1, 1], [], []>} : vector<48x128xbf16>, vector<128x128xbf16>, vector<48x128xf32> -> vector<48x128xf32>
    %c0_24 = arith.constant 0 : index
    %c0_25 = arith.constant 0 : index
    %c0_26 = arith.constant 0 : index
    %67 = vector.load %arg6[%c0_24, %c0_25, %c0_26] : memref<2x1x128xf32, #tpu.memory_space<vmem>>, vector<1x1x128xf32>
    %68 = vector.shape_cast %67 : vector<1x1x128xf32> to vector<1x128xf32>
    %69 = vector.broadcast %68 : vector<1x128xf32> to vector<48x128xf32>
    %70 = arith.addf %66, %69 : vector<48x128xf32>
    %71 = arith.addf %0, %70 : vector<48x128xf32>
    %c0_27 = arith.constant 0 : index
    %c0_28 = arith.constant 0 : index
    %c0_29 = arith.constant 0 : index
    %72 = vector.load %arg7[%c0_27, %c0_28, %c0_29] : memref<2x1x128xf32, #tpu.memory_space<vmem>>, vector<1x1x128xf32>
    %73 = vector.shape_cast %72 : vector<1x1x128xf32> to vector<1x128xf32>
    %c0_30 = arith.constant 0 : index
    %c0_31 = arith.constant 0 : index
    %c0_32 = arith.constant 0 : index
    %74 = vector.load %arg8[%c0_30, %c0_31, %c0_32] : memref<2x1x128xf32, #tpu.memory_space<vmem>>, vector<1x1x128xf32>
    %75 = vector.shape_cast %74 : vector<1x1x128xf32> to vector<1x128xf32>
    %cst_33 = arith.constant dense<0.000000e+00> : vector<48xf32>
    %76 = vector.multi_reduction <add>, %71, %cst_33 [1] : vector<48x128xf32> to vector<48xf32>
    %77 = vector.shape_cast %76 : vector<48xf32> to vector<48x1xf32>
    %cst_34 = arith.constant 1.280000e+02 : f32
    %78 = vector.broadcast %cst_34 : f32 to vector<48x1xf32>
    %79 = arith.divf %77, %78 : vector<48x1xf32>
    %80 = vector.broadcast %79 : vector<48x1xf32> to vector<48x128xf32>
    %81 = arith.subf %71, %80 : vector<48x128xf32>
    %82 = arith.mulf %81, %81 : vector<48x128xf32>
    %cst_35 = arith.constant dense<0.000000e+00> : vector<48xf32>
    %83 = vector.multi_reduction <add>, %82, %cst_35 [1] : vector<48x128xf32> to vector<48xf32>
    %84 = vector.shape_cast %83 : vector<48xf32> to vector<48x1xf32>
    %cst_36 = arith.constant 1.280000e+02 : f32
    %85 = vector.broadcast %cst_36 : f32 to vector<48x1xf32>
    %86 = arith.divf %84, %85 : vector<48x1xf32>
    %cst_37 = arith.constant 9.99999974E-6 : f32
    %87 = vector.broadcast %cst_37 : f32 to vector<48x1xf32>
    %88 = arith.addf %86, %87 : vector<48x1xf32>
    %89 = math.rsqrt %88 : vector<48x1xf32>
    %90 = vector.broadcast %89 : vector<48x1xf32> to vector<48x128xf32>
    %91 = arith.mulf %81, %90 : vector<48x128xf32>
    %92 = vector.broadcast %73 : vector<1x128xf32> to vector<48x128xf32>
    %93 = arith.mulf %91, %92 : vector<48x128xf32>
    %94 = vector.broadcast %75 : vector<1x128xf32> to vector<48x128xf32>
    %95 = arith.addf %93, %94 : vector<48x128xf32>
    %96 = arith.truncf %95 : vector<48x128xf32> to vector<48x128xbf16>
    %c0_38 = arith.constant 0 : index
    %c0_39 = arith.constant 0 : index
    %c0_40 = arith.constant 0 : index
    %97 = vector.load %arg9[%c0_38, %c0_39, %c0_40] : memref<2x128x256xbf16, #tpu.memory_space<vmem>>, vector<1x128x256xbf16>
    %98 = vector.shape_cast %97 : vector<1x128x256xbf16> to vector<128x256xbf16>
    %cst_41 = arith.constant dense<0.000000e+00> : vector<48x256xf32>
    %99 = tpu.matmul %96, %98, %cst_41 {dimension_numbers = #tpu.dot_dimension_numbers<[1], [0], [0], [1], [0, 0, 1, 1], [], []>} : vector<48x128xbf16>, vector<128x256xbf16>, vector<48x256xf32> -> vector<48x256xf32>
    %c0_42 = arith.constant 0 : index
    %c0_43 = arith.constant 0 : index
    %c0_44 = arith.constant 0 : index
    %100 = vector.load %arg10[%c0_42, %c0_43, %c0_44] : memref<2x1x256xf32, #tpu.memory_space<vmem>>, vector<1x1x256xf32>
    %101 = vector.shape_cast %100 : vector<1x1x256xf32> to vector<1x256xf32>
    %102 = vector.broadcast %101 : vector<1x256xf32> to vector<48x256xf32>
    %103 = arith.addf %99, %102 : vector<48x256xf32>
    %cst_45 = arith.constant 0.000000e+00 : f32
    %104 = vector.broadcast %cst_45 : f32 to vector<48x256xf32>
    %105 = arith.maximumf %103, %104 : vector<48x256xf32>
    %106 = arith.truncf %105 : vector<48x256xf32> to vector<48x256xbf16>
    %c0_46 = arith.constant 0 : index
    %c0_47 = arith.constant 0 : index
    %c0_48 = arith.constant 0 : index
    %107 = vector.load %arg11[%c0_46, %c0_47, %c0_48] : memref<2x256x128xbf16, #tpu.memory_space<vmem>>, vector<1x256x128xbf16>
    %108 = vector.shape_cast %107 : vector<1x256x128xbf16> to vector<256x128xbf16>
    %cst_49 = arith.constant dense<0.000000e+00> : vector<48x128xf32>
    %109 = tpu.matmul %106, %108, %cst_49 {dimension_numbers = #tpu.dot_dimension_numbers<[1], [0], [0], [1], [0, 0, 1, 1], [], []>} : vector<48x256xbf16>, vector<256x128xbf16>, vector<48x128xf32> -> vector<48x128xf32>
    %c0_50 = arith.constant 0 : index
    %c0_51 = arith.constant 0 : index
    %c0_52 = arith.constant 0 : index
    %110 = vector.load %arg12[%c0_50, %c0_51, %c0_52] : memref<2x1x128xf32, #tpu.memory_space<vmem>>, vector<1x1x128xf32>
    %111 = vector.shape_cast %110 : vector<1x1x128xf32> to vector<1x128xf32>
    %112 = vector.broadcast %111 : vector<1x128xf32> to vector<48x128xf32>
    %113 = arith.addf %109, %112 : vector<48x128xf32>
    %114 = arith.addf %95, %113 : vector<48x128xf32>
    %c0_53 = arith.constant 0 : index
    %c0_54 = arith.constant 0 : index
    %c0_55 = arith.constant 0 : index
    %115 = vector.load %arg13[%c0_53, %c0_54, %c0_55] : memref<2x1x128xf32, #tpu.memory_space<vmem>>, vector<1x1x128xf32>
    %116 = vector.shape_cast %115 : vector<1x1x128xf32> to vector<1x128xf32>
    %c0_56 = arith.constant 0 : index
    %c0_57 = arith.constant 0 : index
    %c0_58 = arith.constant 0 : index
    %117 = vector.load %arg14[%c0_56, %c0_57, %c0_58] : memref<2x1x128xf32, #tpu.memory_space<vmem>>, vector<1x1x128xf32>
    %118 = vector.shape_cast %117 : vector<1x1x128xf32> to vector<1x128xf32>
    %cst_59 = arith.constant dense<0.000000e+00> : vector<48xf32>
    %119 = vector.multi_reduction <add>, %114, %cst_59 [1] : vector<48x128xf32> to vector<48xf32>
    %120 = vector.shape_cast %119 : vector<48xf32> to vector<48x1xf32>
    %cst_60 = arith.constant 1.280000e+02 : f32
    %121 = vector.broadcast %cst_60 : f32 to vector<48x1xf32>
    %122 = arith.divf %120, %121 : vector<48x1xf32>
    %123 = vector.broadcast %122 : vector<48x1xf32> to vector<48x128xf32>
    %124 = arith.subf %114, %123 : vector<48x128xf32>
    %125 = arith.mulf %124, %124 : vector<48x128xf32>
    %cst_61 = arith.constant dense<0.000000e+00> : vector<48xf32>
    %126 = vector.multi_reduction <add>, %125, %cst_61 [1] : vector<48x128xf32> to vector<48xf32>
    %127 = vector.shape_cast %126 : vector<48xf32> to vector<48x1xf32>
    %cst_62 = arith.constant 1.280000e+02 : f32
    %128 = vector.broadcast %cst_62 : f32 to vector<48x1xf32>
    %129 = arith.divf %127, %128 : vector<48x1xf32>
    %cst_63 = arith.constant 9.99999974E-6 : f32
    %130 = vector.broadcast %cst_63 : f32 to vector<48x1xf32>
    %131 = arith.addf %129, %130 : vector<48x1xf32>
    %132 = math.rsqrt %131 : vector<48x1xf32>
    %133 = vector.broadcast %132 : vector<48x1xf32> to vector<48x128xf32>
    %134 = arith.mulf %124, %133 : vector<48x128xf32>
    %135 = vector.broadcast %116 : vector<1x128xf32> to vector<48x128xf32>
    %136 = arith.mulf %134, %135 : vector<48x128xf32>
    %137 = vector.broadcast %118 : vector<1x128xf32> to vector<48x128xf32>
    %138 = arith.addf %136, %137 : vector<48x128xf32>
    %139 = arith.truncf %138 : vector<48x128xf32> to vector<48x128xbf16>
    %c1 = arith.constant 1 : index
    %c0_64 = arith.constant 0 : index
    %c0_65 = arith.constant 0 : index
    %140 = vector.load %arg3[%c1, %c0_64, %c0_65] : memref<2x128x384xbf16, #tpu.memory_space<vmem>>, vector<1x128x384xbf16>
    %141 = vector.shape_cast %140 : vector<1x128x384xbf16> to vector<128x384xbf16>
    %cst_66 = arith.constant dense<0.000000e+00> : vector<48x384xf32>
    %142 = tpu.matmul %139, %141, %cst_66 {dimension_numbers = #tpu.dot_dimension_numbers<[1], [0], [0], [1], [0, 0, 1, 1], [], []>} : vector<48x128xbf16>, vector<128x384xbf16>, vector<48x384xf32> -> vector<48x384xf32>
    %c1_67 = arith.constant 1 : index
    %c0_68 = arith.constant 0 : index
    %c0_69 = arith.constant 0 : index
    %143 = vector.load %arg4[%c1_67, %c0_68, %c0_69] : memref<2x1x384xf32, #tpu.memory_space<vmem>>, vector<1x1x384xf32>
    %144 = vector.shape_cast %143 : vector<1x1x384xf32> to vector<1x384xf32>
    %145 = vector.broadcast %144 : vector<1x384xf32> to vector<48x384xf32>
    %146 = arith.addf %142, %145 : vector<48x384xf32>
    %147 = vector.extract_strided_slice %146 {offsets = [0, 0], sizes = [48, 128], strides = [1, 1]} : vector<48x384xf32> to vector<48x128xf32>
    %cst_70 = arith.constant 2.500000e-01 : f32
    %148 = vector.broadcast %cst_70 : f32 to vector<48x128xf32>
    %149 = arith.mulf %147, %148 : vector<48x128xf32>
    %150 = vector.extract_strided_slice %146 {offsets = [0, 128], sizes = [48, 128], strides = [1, 1]} : vector<48x384xf32> to vector<48x128xf32>
    %151 = vector.extract_strided_slice %146 {offsets = [0, 256], sizes = [48, 128], strides = [1, 1]} : vector<48x384xf32> to vector<48x128xf32>
    %152 = vector.extract_strided_slice %149 {offsets = [0, 0], sizes = [24, 128], strides = [1, 1]} : vector<48x128xf32> to vector<24x128xf32>
    %153 = vector.extract_strided_slice %150 {offsets = [0, 0], sizes = [24, 128], strides = [1, 1]} : vector<48x128xf32> to vector<24x128xf32>
    %154 = arith.mulf %152, %153 : vector<24x128xf32>
    %cst_71 = arith.constant dense<0.000000e+00> : vector<24x8xf32>
    %155 = tpu.matmul %154, %1, %cst_71 {dimension_numbers = #tpu.dot_dimension_numbers<[1], [0], [0], [1], [0, 0, 1, 1], [], []>} : vector<24x128xf32>, vector<128x8xf32>, vector<24x8xf32> -> vector<24x8xf32>
    %156 = vector.extract_strided_slice %150 {offsets = [24, 0], sizes = [24, 128], strides = [1, 1]} : vector<48x128xf32> to vector<24x128xf32>
    %157 = arith.mulf %152, %156 : vector<24x128xf32>
    %cst_72 = arith.constant dense<0.000000e+00> : vector<24x8xf32>
    %158 = tpu.matmul %157, %1, %cst_72 {dimension_numbers = #tpu.dot_dimension_numbers<[1], [0], [0], [1], [0, 0, 1, 1], [], []>} : vector<24x128xf32>, vector<128x8xf32>, vector<24x8xf32> -> vector<24x8xf32>
    %159 = arith.maximumf %155, %158 : vector<24x8xf32>
    %160 = arith.subf %155, %159 : vector<24x8xf32>
    %161 = math.exp %160 : vector<24x8xf32>
    %162 = arith.subf %158, %159 : vector<24x8xf32>
    %163 = math.exp %162 : vector<24x8xf32>
    %164 = arith.addf %161, %163 : vector<24x8xf32>
    %165 = tpu.reciprocal %164 {approx = true} : vector<24x8xf32> -> vector<24x8xf32>
    %166 = arith.mulf %161, %165 : vector<24x8xf32>
    %cst_73 = arith.constant dense<0.000000e+00> : vector<24x128xf32>
    %167 = tpu.matmul %166, %2, %cst_73 {dimension_numbers = #tpu.dot_dimension_numbers<[1], [0], [0], [1], [0, 0, 1, 1], [], []>} : vector<24x8xf32>, vector<8x128xf32>, vector<24x128xf32> -> vector<24x128xf32>
    %168 = vector.extract_strided_slice %151 {offsets = [0, 0], sizes = [24, 128], strides = [1, 1]} : vector<48x128xf32> to vector<24x128xf32>
    %169 = arith.mulf %167, %168 : vector<24x128xf32>
    %170 = arith.mulf %163, %165 : vector<24x8xf32>
    %cst_74 = arith.constant dense<0.000000e+00> : vector<24x128xf32>
    %171 = tpu.matmul %170, %2, %cst_74 {dimension_numbers = #tpu.dot_dimension_numbers<[1], [0], [0], [1], [0, 0, 1, 1], [], []>} : vector<24x8xf32>, vector<8x128xf32>, vector<24x128xf32> -> vector<24x128xf32>
    %172 = vector.extract_strided_slice %151 {offsets = [24, 0], sizes = [24, 128], strides = [1, 1]} : vector<48x128xf32> to vector<24x128xf32>
    %173 = arith.mulf %171, %172 : vector<24x128xf32>
    %174 = arith.addf %169, %173 : vector<24x128xf32>
    %175 = vector.extract_strided_slice %149 {offsets = [24, 0], sizes = [24, 128], strides = [1, 1]} : vector<48x128xf32> to vector<24x128xf32>
    %176 = vector.extract_strided_slice %150 {offsets = [0, 0], sizes = [24, 128], strides = [1, 1]} : vector<48x128xf32> to vector<24x128xf32>
    %177 = arith.mulf %175, %176 : vector<24x128xf32>
    %cst_75 = arith.constant dense<0.000000e+00> : vector<24x8xf32>
    %178 = tpu.matmul %177, %1, %cst_75 {dimension_numbers = #tpu.dot_dimension_numbers<[1], [0], [0], [1], [0, 0, 1, 1], [], []>} : vector<24x128xf32>, vector<128x8xf32>, vector<24x8xf32> -> vector<24x8xf32>
    %179 = vector.extract_strided_slice %150 {offsets = [24, 0], sizes = [24, 128], strides = [1, 1]} : vector<48x128xf32> to vector<24x128xf32>
    %180 = arith.mulf %175, %179 : vector<24x128xf32>
    %cst_76 = arith.constant dense<0.000000e+00> : vector<24x8xf32>
    %181 = tpu.matmul %180, %1, %cst_76 {dimension_numbers = #tpu.dot_dimension_numbers<[1], [0], [0], [1], [0, 0, 1, 1], [], []>} : vector<24x128xf32>, vector<128x8xf32>, vector<24x8xf32> -> vector<24x8xf32>
    %182 = arith.maximumf %178, %181 : vector<24x8xf32>
    %183 = arith.subf %178, %182 : vector<24x8xf32>
    %184 = math.exp %183 : vector<24x8xf32>
    %185 = arith.subf %181, %182 : vector<24x8xf32>
    %186 = math.exp %185 : vector<24x8xf32>
    %187 = arith.addf %184, %186 : vector<24x8xf32>
    %188 = tpu.reciprocal %187 {approx = true} : vector<24x8xf32> -> vector<24x8xf32>
    %189 = arith.mulf %184, %188 : vector<24x8xf32>
    %cst_77 = arith.constant dense<0.000000e+00> : vector<24x128xf32>
    %190 = tpu.matmul %189, %2, %cst_77 {dimension_numbers = #tpu.dot_dimension_numbers<[1], [0], [0], [1], [0, 0, 1, 1], [], []>} : vector<24x8xf32>, vector<8x128xf32>, vector<24x128xf32> -> vector<24x128xf32>
    %191 = vector.extract_strided_slice %151 {offsets = [0, 0], sizes = [24, 128], strides = [1, 1]} : vector<48x128xf32> to vector<24x128xf32>
    %192 = arith.mulf %190, %191 : vector<24x128xf32>
    %193 = arith.mulf %186, %188 : vector<24x8xf32>
    %cst_78 = arith.constant dense<0.000000e+00> : vector<24x128xf32>
    %194 = tpu.matmul %193, %2, %cst_78 {dimension_numbers = #tpu.dot_dimension_numbers<[1], [0], [0], [1], [0, 0, 1, 1], [], []>} : vector<24x8xf32>, vector<8x128xf32>, vector<24x128xf32> -> vector<24x128xf32>
    %195 = vector.extract_strided_slice %151 {offsets = [24, 0], sizes = [24, 128], strides = [1, 1]} : vector<48x128xf32> to vector<24x128xf32>
    %196 = arith.mulf %194, %195 : vector<24x128xf32>
    %197 = arith.addf %192, %196 : vector<24x128xf32>
    %198 = tpu.concatenate %174, %197 in 0 : vector<24x128xf32>, vector<24x128xf32> -> vector<48x128xf32>
    %199 = arith.truncf %198 : vector<48x128xf32> to vector<48x128xbf16>
    %c1_79 = arith.constant 1 : index
    %c0_80 = arith.constant 0 : index
    %c0_81 = arith.constant 0 : index
    %200 = vector.load %arg5[%c1_79, %c0_80, %c0_81] : memref<2x128x128xbf16, #tpu.memory_space<vmem>>, vector<1x128x128xbf16>
    %201 = vector.shape_cast %200 : vector<1x128x128xbf16> to vector<128x128xbf16>
    %cst_82 = arith.constant dense<0.000000e+00> : vector<48x128xf32>
    %202 = tpu.matmul %199, %201, %cst_82 {dimension_numbers = #tpu.dot_dimension_numbers<[1], [0], [0], [1], [0, 0, 1, 1], [], []>} : vector<48x128xbf16>, vector<128x128xbf16>, vector<48x128xf32> -> vector<48x128xf32>
    %c1_83 = arith.constant 1 : index
    %c0_84 = arith.constant 0 : index
    %c0_85 = arith.constant 0 : index
    %203 = vector.load %arg6[%c1_83, %c0_84, %c0_85] : memref<2x1x128xf32, #tpu.memory_space<vmem>>, vector<1x1x128xf32>
    %204 = vector.shape_cast %203 : vector<1x1x128xf32> to vector<1x128xf32>
    %205 = vector.broadcast %204 : vector<1x128xf32> to vector<48x128xf32>
    %206 = arith.addf %202, %205 : vector<48x128xf32>
    %207 = arith.addf %138, %206 : vector<48x128xf32>
    %c1_86 = arith.constant 1 : index
    %c0_87 = arith.constant 0 : index
    %c0_88 = arith.constant 0 : index
    %208 = vector.load %arg7[%c1_86, %c0_87, %c0_88] : memref<2x1x128xf32, #tpu.memory_space<vmem>>, vector<1x1x128xf32>
    %209 = vector.shape_cast %208 : vector<1x1x128xf32> to vector<1x128xf32>
    %c1_89 = arith.constant 1 : index
    %c0_90 = arith.constant 0 : index
    %c0_91 = arith.constant 0 : index
    %210 = vector.load %arg8[%c1_89, %c0_90, %c0_91] : memref<2x1x128xf32, #tpu.memory_space<vmem>>, vector<1x1x128xf32>
    %211 = vector.shape_cast %210 : vector<1x1x128xf32> to vector<1x128xf32>
    %cst_92 = arith.constant dense<0.000000e+00> : vector<48xf32>
    %212 = vector.multi_reduction <add>, %207, %cst_92 [1] : vector<48x128xf32> to vector<48xf32>
    %213 = vector.shape_cast %212 : vector<48xf32> to vector<48x1xf32>
    %cst_93 = arith.constant 1.280000e+02 : f32
    %214 = vector.broadcast %cst_93 : f32 to vector<48x1xf32>
    %215 = arith.divf %213, %214 : vector<48x1xf32>
    %216 = vector.broadcast %215 : vector<48x1xf32> to vector<48x128xf32>
    %217 = arith.subf %207, %216 : vector<48x128xf32>
    %218 = arith.mulf %217, %217 : vector<48x128xf32>
    %cst_94 = arith.constant dense<0.000000e+00> : vector<48xf32>
    %219 = vector.multi_reduction <add>, %218, %cst_94 [1] : vector<48x128xf32> to vector<48xf32>
    %220 = vector.shape_cast %219 : vector<48xf32> to vector<48x1xf32>
    %cst_95 = arith.constant 1.280000e+02 : f32
    %221 = vector.broadcast %cst_95 : f32 to vector<48x1xf32>
    %222 = arith.divf %220, %221 : vector<48x1xf32>
    %cst_96 = arith.constant 9.99999974E-6 : f32
    %223 = vector.broadcast %cst_96 : f32 to vector<48x1xf32>
    %224 = arith.addf %222, %223 : vector<48x1xf32>
    %225 = math.rsqrt %224 : vector<48x1xf32>
    %226 = vector.broadcast %225 : vector<48x1xf32> to vector<48x128xf32>
    %227 = arith.mulf %217, %226 : vector<48x128xf32>
    %228 = vector.broadcast %209 : vector<1x128xf32> to vector<48x128xf32>
    %229 = arith.mulf %227, %228 : vector<48x128xf32>
    %230 = vector.broadcast %211 : vector<1x128xf32> to vector<48x128xf32>
    %231 = arith.addf %229, %230 : vector<48x128xf32>
    %232 = arith.truncf %231 : vector<48x128xf32> to vector<48x128xbf16>
    %c1_97 = arith.constant 1 : index
    %c0_98 = arith.constant 0 : index
    %c0_99 = arith.constant 0 : index
    %233 = vector.load %arg9[%c1_97, %c0_98, %c0_99] : memref<2x128x256xbf16, #tpu.memory_space<vmem>>, vector<1x128x256xbf16>
    %234 = vector.shape_cast %233 : vector<1x128x256xbf16> to vector<128x256xbf16>
    %cst_100 = arith.constant dense<0.000000e+00> : vector<48x256xf32>
    %235 = tpu.matmul %232, %234, %cst_100 {dimension_numbers = #tpu.dot_dimension_numbers<[1], [0], [0], [1], [0, 0, 1, 1], [], []>} : vector<48x128xbf16>, vector<128x256xbf16>, vector<48x256xf32> -> vector<48x256xf32>
    %c1_101 = arith.constant 1 : index
    %c0_102 = arith.constant 0 : index
    %c0_103 = arith.constant 0 : index
    %236 = vector.load %arg10[%c1_101, %c0_102, %c0_103] : memref<2x1x256xf32, #tpu.memory_space<vmem>>, vector<1x1x256xf32>
    %237 = vector.shape_cast %236 : vector<1x1x256xf32> to vector<1x256xf32>
    %238 = vector.broadcast %237 : vector<1x256xf32> to vector<48x256xf32>
    %239 = arith.addf %235, %238 : vector<48x256xf32>
    %cst_104 = arith.constant 0.000000e+00 : f32
    %240 = vector.broadcast %cst_104 : f32 to vector<48x256xf32>
    %241 = arith.maximumf %239, %240 : vector<48x256xf32>
    %242 = arith.truncf %241 : vector<48x256xf32> to vector<48x256xbf16>
    %c1_105 = arith.constant 1 : index
    %c0_106 = arith.constant 0 : index
    %c0_107 = arith.constant 0 : index
    %243 = vector.load %arg11[%c1_105, %c0_106, %c0_107] : memref<2x256x128xbf16, #tpu.memory_space<vmem>>, vector<1x256x128xbf16>
    %244 = vector.shape_cast %243 : vector<1x256x128xbf16> to vector<256x128xbf16>
    %cst_108 = arith.constant dense<0.000000e+00> : vector<48x128xf32>
    %245 = tpu.matmul %242, %244, %cst_108 {dimension_numbers = #tpu.dot_dimension_numbers<[1], [0], [0], [1], [0, 0, 1, 1], [], []>} : vector<48x256xbf16>, vector<256x128xbf16>, vector<48x128xf32> -> vector<48x128xf32>
    %c1_109 = arith.constant 1 : index
    %c0_110 = arith.constant 0 : index
    %c0_111 = arith.constant 0 : index
    %246 = vector.load %arg12[%c1_109, %c0_110, %c0_111] : memref<2x1x128xf32, #tpu.memory_space<vmem>>, vector<1x1x128xf32>
    %247 = vector.shape_cast %246 : vector<1x1x128xf32> to vector<1x128xf32>
    %248 = vector.broadcast %247 : vector<1x128xf32> to vector<48x128xf32>
    %249 = arith.addf %245, %248 : vector<48x128xf32>
    %250 = arith.addf %231, %249 : vector<48x128xf32>
    %c1_112 = arith.constant 1 : index
    %c0_113 = arith.constant 0 : index
    %c0_114 = arith.constant 0 : index
    %251 = vector.load %arg13[%c1_112, %c0_113, %c0_114] : memref<2x1x128xf32, #tpu.memory_space<vmem>>, vector<1x1x128xf32>
    %252 = vector.shape_cast %251 : vector<1x1x128xf32> to vector<1x128xf32>
    %c1_115 = arith.constant 1 : index
    %c0_116 = arith.constant 0 : index
    %c0_117 = arith.constant 0 : index
    %253 = vector.load %arg14[%c1_115, %c0_116, %c0_117] : memref<2x1x128xf32, #tpu.memory_space<vmem>>, vector<1x1x128xf32>
    %254 = vector.shape_cast %253 : vector<1x1x128xf32> to vector<1x128xf32>
    %cst_118 = arith.constant dense<0.000000e+00> : vector<48xf32>
    %255 = vector.multi_reduction <add>, %250, %cst_118 [1] : vector<48x128xf32> to vector<48xf32>
    %256 = vector.shape_cast %255 : vector<48xf32> to vector<48x1xf32>
    %cst_119 = arith.constant 1.280000e+02 : f32
    %257 = vector.broadcast %cst_119 : f32 to vector<48x1xf32>
    %258 = arith.divf %256, %257 : vector<48x1xf32>
    %259 = vector.broadcast %258 : vector<48x1xf32> to vector<48x128xf32>
    %260 = arith.subf %250, %259 : vector<48x128xf32>
    %261 = arith.mulf %260, %260 : vector<48x128xf32>
    %cst_120 = arith.constant dense<0.000000e+00> : vector<48xf32>
    %262 = vector.multi_reduction <add>, %261, %cst_120 [1] : vector<48x128xf32> to vector<48xf32>
    %263 = vector.shape_cast %262 : vector<48xf32> to vector<48x1xf32>
    %cst_121 = arith.constant 1.280000e+02 : f32
    %264 = vector.broadcast %cst_121 : f32 to vector<48x1xf32>
    %265 = arith.divf %263, %264 : vector<48x1xf32>
    %cst_122 = arith.constant 9.99999974E-6 : f32
    %266 = vector.broadcast %cst_122 : f32 to vector<48x1xf32>
    %267 = arith.addf %265, %266 : vector<48x1xf32>
    %268 = math.rsqrt %267 : vector<48x1xf32>
    %269 = vector.broadcast %268 : vector<48x1xf32> to vector<48x128xf32>
    %270 = arith.mulf %260, %269 : vector<48x128xf32>
    %271 = vector.broadcast %252 : vector<1x128xf32> to vector<48x128xf32>
    %272 = arith.mulf %270, %271 : vector<48x128xf32>
    %273 = vector.broadcast %254 : vector<1x128xf32> to vector<48x128xf32>
    %274 = arith.addf %272, %273 : vector<48x128xf32>
    %275 = vector.extract_strided_slice %274 {offsets = [0, 0], sizes = [1, 128], strides = [1, 1]} : vector<48x128xf32> to vector<1x128xf32>
    %276 = vector.extract_strided_slice %274 {offsets = [24, 0], sizes = [1, 128], strides = [1, 1]} : vector<48x128xf32> to vector<1x128xf32>
    %277 = tpu.concatenate %275, %276 in 0 : vector<1x128xf32>, vector<1x128xf32> -> vector<2x128xf32>
    %278 = arith.truncf %277 : vector<2x128xf32> to vector<2x128xbf16>
    %c0_123 = arith.constant 0 : index
    %c0_124 = arith.constant 0 : index
    %279 = vector.load %arg15[%c0_123, %c0_124] : memref<128x128xbf16, #tpu.memory_space<vmem>>, vector<128x128xbf16>
    %cst_125 = arith.constant dense<0.000000e+00> : vector<2x128xf32>
    %280 = tpu.matmul %278, %279, %cst_125 {dimension_numbers = #tpu.dot_dimension_numbers<[1], [0], [0], [1], [0, 0, 1, 1], [], []>} : vector<2x128xbf16>, vector<128x128xbf16>, vector<2x128xf32> -> vector<2x128xf32>
    %c0_126 = arith.constant 0 : index
    %c0_127 = arith.constant 0 : index
    %281 = vector.load %arg16[%c0_126, %c0_127] : memref<1x128xf32, #tpu.memory_space<vmem>>, vector<1x128xf32>
    %282 = vector.broadcast %281 : vector<1x128xf32> to vector<2x128xf32>
    %283 = arith.addf %280, %282 : vector<2x128xf32>
    %c0_128 = arith.constant 0 : index
    %c0_129 = arith.constant 0 : index
    %284 = vector.load %arg17[%c0_128, %c0_129] : memref<2x128xf32, #tpu.memory_space<vmem>>, vector<2x128xf32>
    tpu.vector_store %arg17[%c0_128, %c0_129], %283 {strides = array<i32>} : memref<2x128xf32, #tpu.memory_space<vmem>>, vector<2x128xf32>,
    return
  }
}

</mosaic_0001>

<bundles_post_ra>
// kernel: mobilevit_forward.2
= control target key start
LH: loop header
LB: loop body
LE: loop exit
PB: predicated region body
PF: predicated region fallthrough
CT: control target
= control target key end

     0   :  { %vm563_vm0 = vcmask 1040384   ;;  %s1147_s1 = inlined_call_operand.vmem [shape: bf16[768,128], index: 1, kind: input, shape index: {}]   ;;  %s1148_s2 = inlined_call_operand.vmem [shape: f32[1,128], index: 2, kind: input, shape index: {}]   ;;  %s1149_s0 = inlined_call_operand.vmem [shape: f32[32,768], index: 0, kind: input, shape index: {}]   ;;  %s1150_s3 = inlined_call_operand.vmem [shape: f32[24,128], index: 3, kind: input, shape index: {}]   ;;  %s1151_s4 = inlined_call_operand.vmem [shape: f32[48,128], index: 4, kind: output, shape index: {}]  }
   0x1   :  { %v803_v0 = vld [vmem:[%s1147_s1 + $0x38] sm:$0xff]  ;;  %v802_v4 = vld [vmem:[%s1147_s1 + $0x30] sm:$0xff]  ;;  %v801_v8 = vld [vmem:[%s1147_s1 + $0x28] sm:$0xff] }
   0x2   :  { %v811_v1 = vld [vmem:[%s1147_s1 + $0x78] sm:$0xff]  ;;  %441 = vmatpush.bf16.msra.mxu0 %v803_v0  ;;  %v810_v5 = vld [vmem:[%s1147_s1 + $0x70] sm:$0xff]  ;;  %v809_v9 = vld [vmem:[%s1147_s1 + $0x68] sm:$0xff] }
   0x3   :  { %v819_v2 = vld [vmem:[%s1147_s1 + $0xb8] sm:$0xff]  ;;  %460 = vmatpush.bf16.msra.mxu1 %v811_v1  ;;  %v818_v6 = vld [vmem:[%s1147_s1 + $0xb0] sm:$0xff]  ;;  %v817_v10 = vld [vmem:[%s1147_s1 + $0xa8] sm:$0xff] }
   0x4   :  { %v827_v3 = vld [vmem:[%s1147_s1 + $0xf8] sm:$0xff]  ;;  %479 = vmatpush.bf16.msra.mxu2 %v819_v2  ;;  %v826_v7 = vld [vmem:[%s1147_s1 + $0xf0] sm:$0xff]  ;;  %v825_v11 = vld [vmem:[%s1147_s1 + $0xe8] sm:$0xff] }
   0x5   :  { %498 = vmatpush.bf16.msra.mxu3 %v827_v3  ;;  %v800_v12 = vld [vmem:[%s1147_s1 + $0x20] sm:$0xff]  ;;  %v799_v16 = vld [vmem:[%s1147_s1 + $0x18] sm:$0xff]  ;;  %v798_v20 = vld [vmem:[%s1147_s1 + $0x10] sm:$0xff] }
   0x6   :  { %442 = vmatpush.bf16.msra.mxu0 %v802_v4  ;;  %v808_v13 = vld [vmem:[%s1147_s1 + $0x60] sm:$0xff]  ;;  %v807_v17 = vld [vmem:[%s1147_s1 + $0x58] sm:$0xff]  ;;  %v806_v21 = vld [vmem:[%s1147_s1 + $0x50] sm:$0xff] }
   0x7   :  { %461 = vmatpush.bf16.msra.mxu1 %v810_v5  ;;  %v816_v14 = vld [vmem:[%s1147_s1 + $0xa0] sm:$0xff]  ;;  %v815_v18 = vld [vmem:[%s1147_s1 + $0x98] sm:$0xff]  ;;  %v814_v22 = vld [vmem:[%s1147_s1 + $0x90] sm:$0xff] }
   0x8   :  { %480 = vmatpush.bf16.msra.mxu2 %v818_v6  ;;  %v824_v15 = vld [vmem:[%s1147_s1 + $0xe0] sm:$0xff]  ;;  %v823_v19 = vld [vmem:[%s1147_s1 + $0xd8] sm:$0xff]  ;;  %v822_v23 = vld [vmem:[%s1147_s1 + $0xd0] sm:$0xff] }
   0x9   :  { %499 = vmatpush.bf16.msra.mxu3 %v826_v7  ;;  %v797_v24 = vld [vmem:[%s1147_s1 + $0x8] sm:$0xff]  ;;  %v796_v28 = vld [vmem:[%s1147_s1] sm:$0xff]  ;;  %v23_v33 = vld [vmem:[%s1149_s0 + $0x30] sm:$0xff] }
   0xa   :  { %443 = vmatpush.bf16.msra.mxu0 %v801_v8  ;;  %v805_v25 = vld [vmem:[%s1147_s1 + $0x48] sm:$0xff]  ;;  %v804_v29 = vld [vmem:[%s1147_s1 + $0x40] sm:$0xff]  ;;  %v24_v35 = vld [vmem:[%s1149_s0 + $0x38] sm:$0xff] }
   0xb   :  { %462 = vmatpush.bf16.msra.mxu1 %v809_v9  ;;  %v813_v26 = vld [vmem:[%s1147_s1 + $0x88] sm:$0xff]  ;;  %v812_v30 = vld [vmem:[%s1147_s1 + $0x80] sm:$0xff]  ;;  %v19_v36 = vld [vmem:[%s1149_s0 + $0x10] sm:$0xff] }
   0xc   :  { %481 = vmatpush.bf16.msra.mxu2 %v817_v10  ;;  %v821_v27 = vld [vmem:[%s1147_s1 + $0xc8] sm:$0xff]  ;;  %v820_v31 = vld [vmem:[%s1147_s1 + $0xc0] sm:$0xff]  ;;  %v20_v38 = vld [vmem:[%s1149_s0 + $0x18] sm:$0xff] }
   0xd   :  { %500 = vmatpush.bf16.msra.mxu3 %v825_v11  ;;  %v17_v32 = vld [vmem:[%s1149_s0] sm:$0xff]  ;;  %v18_v34 = vld [vmem:[%s1149_s0 + $0x8] sm:$0xff]  ;;  %v835_v40 = vld [vmem:[%s1147_s1 + $0x138] sm:$0xff] }
   0xe   :  { %444 = vmatpush.bf16.msra.mxu0 %v800_v12  ;;  %v25_v37 = vld [vmem:[%s1149_s0 + $0x40] sm:$0xff]  ;;  %v26_v39 = vld [vmem:[%s1149_s0 + $0x48] sm:$0xff]  ;;  %v41_v41 = vpack.c.bf16 %v23_v33, %v17_v32  ;;  %v42_v42 = vpack.c.bf16 %v24_v35, %v18_v34  ;;  %v843_v45 = vld [vmem:[%s1147_s1 + $0x178] sm:$0xff] }
   0xf   :  { %463 = vmatpush.bf16.msra.mxu1 %v808_v13  ;;  %v43_v43 = vpack.c.bf16 %v25_v37, %v19_v36  ;;  %v44_v44 = vpack.c.bf16 %v26_v39, %v20_v38  ;;  %v834_v46 = vld [vmem:[%s1147_s1 + $0x130] sm:$0xff]  ;;  %v833_v48 = vld [vmem:[%s1147_s1 + $0x128] sm:$0xff]  ;;  %v832_v50 = vld [vmem:[%s1147_s1 + $0x120] sm:$0xff] }
  0x10   :  { %482 = vmatpush.bf16.msra.mxu2 %v816_v14  ;;  %v842_v47 = vld [vmem:[%s1147_s1 + $0x170] sm:$0xff]  ;;  %v841_v49 = vld [vmem:[%s1147_s1 + $0x168] sm:$0xff]  ;;  %v840_v51 = vld [vmem:[%s1147_s1 + $0x160] sm:$0xff] }
  0x11   :  { %501 = vmatpush.bf16.msra.mxu3 %v824_v15  ;;  %v29_v52 = vld [vmem:[%s1149_s0 + $0x60] sm:$0xff]  ;;  %v35_v53 = vld [vmem:[%s1149_s0 + $0x90] sm:$0xff]  ;;  %v30_v54 = vld [vmem:[%s1149_s0 + $0x68] sm:$0xff] }
  0x12   :  { %445 = vmatpush.bf16.msra.mxu0 %v799_v16  ;;  %v36_v55 = vld [vmem:[%s1149_s0 + $0x98] sm:$0xff]  ;;  %v31_v56 = vld [vmem:[%s1149_s0 + $0x70] sm:$0xff]  ;;  %v37_v57 = vld [vmem:[%s1149_s0 + $0xa0] sm:$0xff]  ;;  %v47_v61 = vpack.c.bf16 %v35_v53, %v29_v52 }
  0x13   :  { %464 = vmatpush.bf16.msra.mxu1 %v807_v17  ;;  %v32_v58 = vld [vmem:[%s1149_s0 + $0x78] sm:$0xff]  ;;  %v38_v59 = vld [vmem:[%s1149_s0 + $0xa8] sm:$0xff]  ;;  %v48_v62 = vpack.c.bf16 %v36_v55, %v30_v54  ;;  %v49_v63 = vpack.c.bf16 %v37_v57, %v31_v56  ;;  %v830_v2 = vld [vmem:[%s1147_s1 + $0x110] sm:$0xff] }
  0x14   :  { %483 = vmatpush.bf16.msra.mxu2 %v815_v18  ;;  %v831_v60 = vld [vmem:[%s1147_s1 + $0x118] sm:$0xff]  ;;  %v50_v0 = vpack.c.bf16 %v38_v59, %v32_v58  ;;  %v838_v3 = vld [vmem:[%s1147_s1 + $0x150] sm:$0xff]  ;;  %v829_v4 = vld [vmem:[%s1147_s1 + $0x108] sm:$0xff] }
  0x15   :  { %502 = vmatpush.bf16.msra.mxu3 %v823_v19  ;;  %v839_v1 = vld [vmem:[%s1147_s1 + $0x158] sm:$0xff]  ;;  %v837_v5 = vld [vmem:[%s1147_s1 + $0x148] sm:$0xff]  ;;  %v828_v6 = vld [vmem:[%s1147_s1 + $0x100] sm:$0xff] }
  0x16   :  { %446 = vmatpush.bf16.msra.mxu0 %v798_v20  ;;  %v836_v7 = vld [vmem:[%s1147_s1 + $0x140] sm:$0xff]  ;;  %v27_v9 = vld [vmem:[%s1149_s0 + $0x50] sm:$0xff]  ;;  %v22_v12 = vld [vmem:[%s1149_s0 + $0x28] sm:$0xff] }
  0x17   :  { %465 = vmatpush.bf16.msra.mxu1 %v806_v21  ;;  %v21_v8 = vld [vmem:[%s1149_s0 + $0x20] sm:$0xff]  ;;  %v39_v11 = vld [vmem:[%s1149_s0 + $0xb0] sm:$0xff]  ;;  %v28_v13 = vld [vmem:[%s1149_s0 + $0x58] sm:$0xff] }
  0x18   :  { %484 = vmatpush.bf16.msra.mxu2 %v814_v22  ;;  %v33_v10 = vld [vmem:[%s1149_s0 + $0x80] sm:$0xff]  ;;  %v34_v14 = vld [vmem:[%s1149_s0 + $0x88] sm:$0xff]  ;;  %v40_v15 = vld [vmem:[%s1149_s0 + $0xb8] sm:$0xff]  ;;  %v45_v16 = vpack.c.bf16 %v27_v9, %v21_v8  ;;  %v46_v18 = vpack.c.bf16 %v28_v13, %v22_v12 }
  0x19   :  { %503 = vmatpush.bf16.msra.mxu3 %v822_v23  ;;  %v51_v17 = vpack.c.bf16 %v39_v11, %v33_v10  ;;  %v52_v19 = vpack.c.bf16 %v40_v15, %v34_v14  ;;  %v555_v55 = vld [vmem:[%s1150_s3] sm:$0x1] }
  0x1a   :  { %447 = vmatpush.bf16.msra.mxu0 %v797_v24  ;;  %v578_v8 = vld [vmem:[%s1150_s3] sm:$0x1] }
  0x1b   :  { %466 = vmatpush.bf16.msra.mxu1 %v805_v25 }
  0x1c   :  { %485 = vmatpush.bf16.msra.mxu2 %v813_v26  ;;  %v860_v26 = vld [vmem:[%s1148_s2] ss:$0 sm:$0xff] }
  0x1d   :  { %504 = vmatpush.bf16.msra.mxu3 %v821_v27 }
  0x1e   :  { %448 = vmatpush.bf16.msra.mxu0 %v796_v28 }
  0x1f   :  { %467 = vmatpush.bf16.msra.mxu1 %v804_v29 }
  0x20   :  { %486 = vmatpush.bf16.msra.mxu2 %v812_v30 }
  0x21   :  { %505 = vmatpush.bf16.msra.mxu3 %v820_v31  ;;  %449 = vmatmul.bf16.vlgmr.msra.gmra.mxu0 %v41_v41 }
  0x22   :  { %517 = vmatpush.bf16.msrb.mxu0 %v835_v40  ;;  %468 = vmatmul.bf16.vlgmr.msra.gmra.mxu1 %v42_v42 }
  0x23   :  { %487 = vmatmul.bf16.vlgmr.msra.gmra.mxu2 %v43_v43  ;;  %536 = vmatpush.bf16.msrb.mxu1 %v843_v45 }
  0x24   :  { %844 = vmatpush.bf16.msrb.mxu2 %v835_v40  ;;  %506 = vmatmul.bf16.vlgmr.msra.gmra.mxu3 %v44_v44 }
  0x25   :  { %852 = vmatpush.bf16.msrb.mxu3 %v843_v45 }
  0x26   :  { %518 = vmatpush.bf16.msrb.mxu0 %v834_v46 }
  0x27   :  { %537 = vmatpush.bf16.msrb.mxu1 %v842_v47 }
  0x28   :  { %845 = vmatpush.bf16.msrb.mxu2 %v834_v46 }
  0x29   :  { %853 = vmatpush.bf16.msrb.mxu3 %v842_v47 }
  0x2a   :  { %519 = vmatpush.bf16.msrb.mxu0 %v833_v48 }
  0x2b   :  { %538 = vmatpush.bf16.msrb.mxu1 %v841_v49 }
  0x2c   :  { %846 = vmatpush.bf16.msrb.mxu2 %v833_v48 }
  0x2d   :  { %854 = vmatpush.bf16.msrb.mxu3 %v841_v49  ;;  %v556_v49 = vld [vmem:[%s1150_s3 + $0x1] sm:$0xff] }
  0x2e   :  { %520 = vmatpush.bf16.msrb.mxu0 %v832_v50 }
  0x2f   :  { %539 = vmatpush.bf16.msrb.mxu1 %v840_v51 }
  0x30   :  { %847 = vmatpush.bf16.msrb.mxu2 %v832_v50 }
  0x31   :  { %855 = vmatpush.bf16.msrb.mxu3 %v840_v51  ;;  %454 = vmatmul.bf16.gmra.mxu0 %v47_v61 }
  0x32   :  { %521 = vmatpush.bf16.msrb.mxu0 %v831_v60  ;;  %473 = vmatmul.bf16.gmra.mxu1 %v48_v62 }
  0x33   :  { %492 = vmatmul.bf16.gmra.mxu2 %v49_v63  ;;  %540 = vmatpush.bf16.msrb.mxu1 %v839_v1 }
  0x34   :  { %848 = vmatpush.bf16.msrb.mxu2 %v831_v60  ;;  %511 = vmatmul.bf16.gmra.mxu3 %v50_v0 }
  0x35   :  { %856 = vmatpush.bf16.msrb.mxu3 %v839_v1 }
  0x36   :  { %522 = vmatpush.bf16.msrb.mxu0 %v830_v2 }
  0x37   :  { %541 = vmatpush.bf16.msrb.mxu1 %v838_v3 }
  0x38   :  { %849 = vmatpush.bf16.msrb.mxu2 %v830_v2 }
  0x39   :  { %857 = vmatpush.bf16.msrb.mxu3 %v838_v3 }
  0x3a   :  { %523 = vmatpush.bf16.msrb.mxu0 %v829_v4 }
  0x3b   :  { %542 = vmatpush.bf16.msrb.mxu1 %v837_v5 }
  0x3c   :  { %850 = vmatpush.bf16.msrb.mxu2 %v829_v4  ;;  %v557_v4 = vld [vmem:[%s1150_s3 + $0x9] sm:$0xff] }
  0x3d   :  { %858 = vmatpush.bf16.msrb.mxu3 %v837_v5  ;;  %v560_v5 = vld [vmem:[%s1150_s3 + $0x11] sm:$0x7f] }
  0x3e   :  { %524 = vmatpush.bf16.msrb.mxu0 %v828_v6  ;;  %v571_v10 = vrot.slane %v560_v5, 7 }
  0x3f   :  { %543 = vmatpush.bf16.msrb.mxu1 %v836_v7 }
  0x40   :  { %851 = vmatpush.bf16.msrb.mxu2 %v828_v6 }
  0x41   :  { %859 = vmatpush.bf16.msrb.mxu3 %v836_v7  ;;  %525 = vmatmul.bf16.vlgmr.msrb.gmra.mxu0 %v45_v16 }
  0x42   :  { %544 = vmatmul.bf16.vlgmr.msrb.gmra.mxu1 %v46_v18 }
  0x43   :  { %530 = vmatmul.bf16.vlgmr.msrb.gmra.mxu2 %v51_v17 }
  0x44   :  { %549 = vmatmul.bf16.vlgmr.msrb.gmra.mxu3 %v52_v19 }
  0x9e   :  { %v450_v20 = vpop.f32.mrf.mxu0 }
  0x9f   :  { %v469_v21 = vpop.f32.mrf.mxu1  ;;  %v451_v31 = vadd.f32 %v860_v26, %v450_v20  ;;  %v583_v20 = vld [vmem:[%s1150_s3 + $0x11] sm:$0x7f] }
  0xa1   :  { %v470_v32 = vadd.f32 %v469_v21, %v451_v31 }
  0xa6   :  { %v488_v22 = vpop.f32.mrf.mxu2  ;;  %v452_v24 = vpop.f32.mrf.mxu0 }
  0xa7   :  { %v507_v23 = vpop.f32.mrf.mxu3  ;;  %v471_v25 = vpop.f32.mrf.mxu1  ;;  %v489_v38 = vadd.f32 %v488_v22, %v470_v32  ;;  %v453_v39 = vadd.f32 %v860_v26, %v452_v24 }
  0xa9   :  { %v508_v41 = vadd.f32 %v507_v23, %v489_v38  ;;  %v472_v45 = vadd.f32 %v471_v25, %v453_v39  ;;  %v593_v23 = vrot.slane %v583_v20, 7 }
  0xae   :  { %v490_v27 = vpop.f32.mrf.mxu2  ;;  %v455_v29 = vpop.f32.mrf.mxu0 }
  0xaf   :  { %v509_v28 = vpop.f32.mrf.mxu3  ;;  %v474_v30 = vpop.f32.mrf.mxu1  ;;  %v456_v37 = vadd.f32 %v860_v26, %v455_v29  ;;  %v491_v50 = vadd.f32 %v490_v27, %v472_v45 }
  0xb1   :  { %v475_v40 = vadd.f32 %v474_v30, %v456_v37  ;;  %v510_v56 = vadd.f32 %v509_v28, %v491_v50 }
  0xb6   :  { %v493_v33 = vpop.f32.mrf.mxu2  ;;  %v457_v35 = vpop.f32.mrf.mxu0 }
  0xb7   :  { %v512_v34 = vpop.f32.mrf.mxu3  ;;  %v476_v36 = vpop.f32.mrf.mxu1  ;;  %v494_v48 = vadd.f32 %v493_v33, %v475_v40  ;;  %v458_v52 = vadd.f32 %v860_v26, %v457_v35 }
  0xb9   :  { %v513_v54 = vadd.f32 %v512_v34, %v494_v48  ;;  %v477_v59 = vadd.f32 %v476_v36, %v458_v52 }
  0xbe   :  { %v495_v42 = vpop.f32.mrf.mxu2  ;;  %v526_v44 = vpop.f32.mrf.mxu0 }
  0xbf   :  { %v514_v43 = vpop.f32.mrf.mxu3  ;;  %v527_v46 = vadd.f32 %v526_v44, %v508_v41  ;;  %v545_v47 = vpop.f32.mrf.mxu1  ;;  %v496_v1 = vadd.f32 %v495_v42, %v477_v59 }
  0xc1   :  { %v546_v51 = vadd.f32 %v545_v47, %v527_v46  ;;  %v515_v11 = vadd.f32 %v514_v43, %v496_v1 }
  0xc3   :  { %v558_v53 = vadd.f32 %v556_v49, %v546_v51 }
  0xc5   :  { %v564_v57 = vrot.slane %v558_v53, 7 }
  0xc6   :  { %v531_v58 = vpop.f32.mrf.mxu2  ;;  %v528_v62 = vpop.f32.mrf.mxu0 }
  0xc7   :  { %v532_v60 = vadd.f32 %v531_v58, %v513_v54  ;;  %v550_v61 = vpop.f32.mrf.mxu3  ;;  %v573_v63 = vsel %vm563_vm0, %v555_v55, %v564_v57  ;;  %v529_v0 = vadd.f32 %v528_v62, %v510_v56  ;;  %v547_v3 = vpop.f32.mrf.mxu1 }
  0xc8   :  { %575 = vst [vmem:[%s1151_s4] sm:$0xff] %v573_v63 }
  0xc9   :  { %v551_v2 = vadd.f32 %v550_v61, %v532_v60  ;;  %v548_v6 = vadd.f32 %v547_v3, %v529_v0 }
  0xcb   :  { %v581_v7 = vadd.f32 %v556_v49, %v551_v2  ;;  %v559_v9 = vadd.f32 %v557_v4, %v548_v6 }
  0xcd   :  { %v586_v12 = vrot.slane %v581_v7, 7  ;;  %v565_v13 = vrot.slane %v559_v9, 7 }
  0xce   :  { %v533_v14 = vpop.f32.mrf.mxu2 }
  0xcf   :  { %v595_v15 = vsel %vm563_vm0, %v578_v8, %v586_v12  ;;  %v534_v16 = vadd.f32 %v533_v14, %v515_v11  ;;  %v566_v17 = vsel %vm563_vm0, %v564_v57, %v565_v13  ;;  %v574_v18 = vsel %vm563_vm0, %v565_v13, %v571_v10  ;;  %v552_v19 = vpop.f32.mrf.mxu3 }
  0xd0   :  { %597 = vst [vmem:[%s1151_s4 + $0x18] sm:$0xff] %v595_v15 }
  0xd1   :  { %576 = vst [vmem:[%s1151_s4 + $0x8] sm:$0xff] %v566_v17  ;;  %v553_v21 = vadd.f32 %v552_v19, %v534_v16 }
  0xd2   :  { %577 = vst [vmem:[%s1151_s4 + $0x10] sm:$0xff] %v574_v18 }
  0xd3   :  { %v582_v22 = vadd.f32 %v557_v4, %v553_v21 }
  0xd5   :  { %v587_v24 = vrot.slane %v582_v22, 7 }
  0xd7   :  { %v588_v25 = vsel %vm563_vm0, %v586_v12, %v587_v24  ;;  %v596_v26 = vsel %vm563_vm0, %v587_v24, %v593_v23 }
  0xd8   :  { %598 = vst [vmem:[%s1151_s4 + $0x20] sm:$0xff] %v588_v25 }
  0xd9   :  { %599 = vst [vmem:[%s1151_s4 + $0x28] sm:$0xff] %v596_v26 }

// kernel: mobilevit_forward.3
= control target key start
LH: loop header
LB: loop body
LE: loop exit
PB: predicated region body
PF: predicated region fallthrough
CT: control target
= control target key end

     0   :  { %s5183_s0 = inlined_call_operand.vmem [shape: f32[48,128], index: 0, kind: input, shape index: {}]   ;;  %s5184_s1 = inlined_call_operand.vmem [shape: f32[128,8], index: 1, kind: input, shape index: {}]   ;;  %s5185_s2 = inlined_call_operand.vmem [shape: f32[8,128], index: 2, kind: input, shape index: {}]   ;;  %s5186_s3 = inlined_call_operand.vmem [shape: bf16[2,128,384], index: 3, kind: input, shape index: {}]   ;;  %s5187_s4 = inlined_call_operand.vmem [shape: f32[2,1,384], index: 4, kind: input, shape index: {}]   ;;  %s5188_s5 = inlined_call_operand.vmem [shape: bf16[2,128,128], index: 5, kind: input, shape index: {}]   ;;  %s5189_s6 = inlined_call_operand.vmem [shape: f32[2,1,128], index: 6, kind: input, shape index: {}]   ;;  %s5190_s7 = inlined_call_operand.vmem [shape: f32[2,1,128], index: 7, kind: input, shape index: {}]   ;;  %s5191_s8 = inlined_call_operand.vmem [shape: f32[2,1,128], index: 8, kind: input, shape index: {}]   ;;  %s5192_s9 = inlined_call_operand.vmem [shape: bf16[2,128,256], index: 9, kind: input, shape index: {}]   ;;  %s5193_s10 = inlined_call_operand.vmem [shape: f32[2,1,256], index: 10, kind: input, shape index: {}]   ;;  %s5194_s11 = inlined_call_operand.vmem [shape: bf16[2,256,128], index: 11, kind: input, shape index: {}]   ;;  %s5195_s12 = inlined_call_operand.vmem [shape: f32[2,1,128], index: 12, kind: input, shape index: {}]   ;;  %s5196_s13 = inlined_call_operand.vmem [shape: f32[2,1,128], index: 13, kind: input, shape index: {}]   ;;  %s5197_s14 = inlined_call_operand.vmem [shape: f32[2,1,128], index: 14, kind: input, shape index: {}]   ;;  %s5198_s15 = inlined_call_operand.vmem [shape: bf16[128,128], index: 15, kind: input, shape index: {}]   ;;  %s5199_s16 = inlined_call_operand.vmem [shape: f32[1,128], index: 16, kind: input, shape index: {}]   ;;  %s5200_s17 = inlined_call_operand.hbm [shape: f32[2,128], index: 17, kind: output, shape index: {}]  }
   0x1   :  { %5203 = sst [smem:[#allocation5_spill]] %s5183_s0 }
   0x2   :  { %5204 = sst [smem:[#allocation6_spill]] %s5184_s1 }
   0x3   :  { %v2844_v0 = vld [vmem:[%s5186_s3 + $0xa8] sm:$0xf]  ;;  %v3452_v1 = vld [vmem:[%s5186_s3 + $0xb0] sm:$0xf0]  ;;  %v3451_v2 = vld [vmem:[%s5186_s3 + $0xac] sm:$0xf] }
   0x4   :  { %v2845_v3 = vor.u32 %v3452_v1, %v2844_v0  ;;  %v2846_v4 = vld [vmem:[%s5186_s3 + $0xb4] sm:$0xf0]  ;;  %v2832_v5 = vld [vmem:[%s5186_s3 + $0x90] sm:$0xf]  ;;  %v3449_v6 = vld [vmem:[%s5186_s3 + $0x98] sm:$0xf0] }
   0x5   :  { %v2849_v7 = vor.u32 %v3451_v2, %v2846_v4  ;;  %v3448_v8 = vld [vmem:[%s5186_s3 + $0x94] sm:$0xf]  ;;  %v2834_v9 = vld [vmem:[%s5186_s3 + $0x9c] sm:$0xf0]  ;;  %v2833_v10 = vor.u32 %v3449_v6, %v2832_v5  ;;  %v2820_v12 = vld [vmem:[%s5186_s3 + $0x78] sm:$0xf] }
   0x6   :  { %251 = vmatpush.bf16.msra.mxu0 %v2845_v3  ;;  %v2837_v11 = vor.u32 %v3448_v8, %v2834_v9  ;;  %v3446_v13 = vld [vmem:[%s5186_s3 + $0x80] sm:$0xf0]  ;;  %v3445_v14 = vld [vmem:[%s5186_s3 + $0x7c] sm:$0xf]  ;;  %v2822_v15 = vld [vmem:[%s5186_s3 + $0x84] sm:$0xf0] }
   0x7   :  { %275 = vmatpush.bf16.msra.mxu1 %v2849_v7  ;;  %v2821_v16 = vor.u32 %v3446_v13, %v2820_v12  ;;  %v2825_v17 = vor.u32 %v3445_v14, %v2822_v15  ;;  %v2808_v18 = vld [vmem:[%s5186_s3 + $0x60] sm:$0xf]  ;;  %v3443_v19 = vld [vmem:[%s5186_s3 + $0x68] sm:$0xf0]  ;;  %v3442_v20 = vld [vmem:[%s5186_s3 + $0x64] sm:$0xf] }
   0x8   :  { %v2810_v21 = vld [vmem:[%s5186_s3 + $0x6c] sm:$0xf0]  ;;  %v2796_v22 = vld [vmem:[%s5186_s3 + $0x48] sm:$0xf]  ;;  %v2809_v23 = vor.u32 %v3443_v19, %v2808_v18  ;;  %v3440_v24 = vld [vmem:[%s5186_s3 + $0x50] sm:$0xf0] }
   0x9   :  { %v3439_v25 = vld [vmem:[%s5186_s3 + $0x4c] sm:$0xf]  ;;  %v2798_v26 = vld [vmem:[%s5186_s3 + $0x54] sm:$0xf0]  ;;  %v2813_v27 = vor.u32 %v3442_v20, %v2810_v21  ;;  %v2784_v28 = vld [vmem:[%s5186_s3 + $0x30] sm:$0xf]  ;;  %v2797_v29 = vor.u32 %v3440_v24, %v2796_v22 }
   0xa   :  { %252 = vmatpush.bf16.msra.mxu0 %v2833_v10  ;;  %v2801_v30 = vor.u32 %v3439_v25, %v2798_v26  ;;  %v3437_v31 = vld [vmem:[%s5186_s3 + $0x38] sm:$0xf0] }
   0xb   :  { %276 = vmatpush.bf16.msra.mxu1 %v2837_v11 }
   0xe   :  { %253 = vmatpush.bf16.msra.mxu0 %v2821_v16 }
   0xf   :  { %277 = vmatpush.bf16.msra.mxu1 %v2825_v17 }
  0x12   :  { %254 = vmatpush.bf16.msra.mxu0 %v2809_v23 }
  0x13   :  { %278 = vmatpush.bf16.msra.mxu1 %v2813_v27 }
  0x14   :  { %22 = vsyncpa [#allocation3], 0  ;;  %v3436_v32 = vld [vmem:[%s5186_s3 + $0x34] sm:$0xf]  ;;  %v2786_v33 = vld [vmem:[%s5186_s3 + $0x3c] sm:$0xf0]  ;;  %v2785_v34 = vor.u32 %v3437_v31, %v2784_v28 }
  0x15   :  { %v2789_v35 = vor.u32 %v3436_v32, %v2786_v33  ;;  %v2772_v36 = vld [vmem:[%s5186_s3 + $0x18] sm:$0xf]  ;;  %v3434_v37 = vld [vmem:[%s5186_s3 + $0x20] sm:$0xf0]  ;;  %v3433_v38 = vld [vmem:[%s5186_s3 + $0x1c] sm:$0xf] }
  0x16   :  { %255 = vmatpush.bf16.msra.mxu0 %v2797_v29  ;;  %v2774_v39 = vld [vmem:[%s5186_s3 + $0x24] sm:$0xf0]  ;;  %v2773_v40 = vor.u32 %v3434_v37, %v2772_v36  ;;  %v2760_v42 = vld [vmem:[%s5186_s3] sm:$0xf]  ;;  %v3431_v43 = vld [vmem:[%s5186_s3 + $0x8] sm:$0xf0] }
  0x17   :  { %279 = vmatpush.bf16.msra.mxu1 %v2801_v30  ;;  %v2777_v41 = vor.u32 %v3433_v38, %v2774_v39  ;;  %v3430_v44 = vld [vmem:[%s5186_s3 + $0x4] sm:$0xf]  ;;  %v2762_v45 = vld [vmem:[%s5186_s3 + $0xc] sm:$0xf0]  ;;  %v2761_v46 = vor.u32 %v3431_v43, %v2760_v42  ;;  %s5205_s0 = sld [smem:[#allocation5_spill]]  ;;  %vm417_vm0 = vcmask 64512  }
  0x18   :  { %v2765_v49 = vor.u32 %v3430_v44, %v2762_v45  ;;  %s5206_s20 = sld [smem:[#allocation6_spill]]  ;;  %v2852_v53 = vld [vmem:[%s5186_s3 + $0xb0] sm:$0xf]  ;;  %v3453_v54 = vld [vmem:[%s5186_s3 + $0xb8] sm:$0xf0] }
  0x19   :  { %v2853_v56 = vor.u32 %v3453_v54, %v2852_v53  ;;  %v2840_v57 = vld [vmem:[%s5186_s3 + $0x98] sm:$0xf]  ;;  %v3450_v58 = vld [vmem:[%s5186_s3 + $0xa0] sm:$0xf0]  ;;  %v2828_v61 = vld [vmem:[%s5186_s3 + $0x80] sm:$0xf] }
  0x1a   :  { %256 = vmatpush.bf16.msra.mxu0 %v2785_v34  ;;  %v2841_v60 = vor.u32 %v3450_v58, %v2840_v57  ;;  %v3447_v62 = vld [vmem:[%s5186_s3 + $0x88] sm:$0xf0]  ;;  %v2816_v4 = vld [vmem:[%s5186_s3 + $0x68] sm:$0xf]  ;;  %v3444_v5 = vld [vmem:[%s5186_s3 + $0x70] sm:$0xf0] }
  0x1b   :  { %280 = vmatpush.bf16.msra.mxu1 %v2789_v35  ;;  %3566 = vmatpush.bf16.msra.mxu2 %v2853_v56  ;;  %v2829_v3 = vor.u32 %v3447_v62, %v2828_v61  ;;  %v2817_v9 = vor.u32 %v3444_v5, %v2816_v4  ;;  %v2804_v10 = vld [vmem:[%s5186_s3 + $0x50] sm:$0xf]  ;;  %v3441_v11 = vld [vmem:[%s5186_s3 + $0x58] sm:$0xf0]  ;;  %v2792_v15 = vld [vmem:[%s5186_s3 + $0x38] sm:$0xf] }
  0x1c   :  { %v2805_v14 = vor.u32 %v3441_v11, %v2804_v10  ;;  %v3438_v16 = vld [vmem:[%s5186_s3 + $0x40] sm:$0xf0]  ;;  %v2780_v20 = vld [vmem:[%s5186_s3 + $0x20] sm:$0xf]  ;;  %v3435_v21 = vld [vmem:[%s5186_s3 + $0x28] sm:$0xf0] }
  0x1d   :  { %v3937_v47 = vld [vmem:[%s5205_s0] sm:$0xff]  ;;  %v3942_v48 = vld [vmem:[%s5205_s0 + $0x8] sm:$0xff]  ;;  %v4000_v0 = vld [vmem:[%s5205_s0 + $0x10] sm:$0xff]  ;;  %v2793_v19 = vor.u32 %v3438_v16, %v2792_v15  ;;  %v2781_v26 = vor.u32 %v3435_v21, %v2780_v20 }
  0x1e   :  { %257 = vmatpush.bf16.msra.mxu0 %v2773_v40  ;;  %v3946_v50 = vpack.c.bf16 %v3942_v48, %v3937_v47  ;;  %v3953_v51 = vld [vmem:[%s5206_s20 + $0x78] sm:$0xff]  ;;  %v3958_v52 = vld [vmem:[%s5206_s20 + $0x70] sm:$0xff]  ;;  %v3970_v55 = vld [vmem:[%s5206_s20 + $0x68] sm:$0xff] }
  0x1f   :  { %281 = vmatpush.bf16.msra.mxu1 %v2777_v41  ;;  %332 = vmatpush.msra.mxu3 %v3953_v51  ;;  %v3982_v59 = vld [vmem:[%s5206_s20 + $0x60] sm:$0xff]  ;;  %v3994_v63 = vld [vmem:[%s5206_s20 + $0x58] sm:$0xff]  ;;  %v4010_v2 = vld [vmem:[%s5206_s20 + $0x50] sm:$0xff] }
  0x20   :  { %v4005_v1 = vld [vmem:[%s5205_s0 + $0x18] sm:$0xff]  ;;  %3567 = vmatpush.bf16.msra.mxu2 %v2841_v60  ;;  %v4022_v6 = vld [vmem:[%s5206_s20 + $0x48] sm:$0xff]  ;;  %v4030_v8 = vld [vmem:[%s5206_s20 + $0x40] sm:$0xff] }
  0x21   :  { %333 = vmatpush.msra.mxu3 %v3958_v52  ;;  %v81_v7 = vpack.c.bf16 %v4005_v1, %v4000_v0  ;;  %v4042_v12 = vld [vmem:[%s5206_s20 + $0x38] sm:$0xff]  ;;  %v4048_v13 = vld [vmem:[%s5206_s20 + $0x30] sm:$0xff]  ;;  %v4060_v17 = vld [vmem:[%s5206_s20 + $0x28] sm:$0xff] }
  0x22   :  { %258 = vmatpush.bf16.msra.mxu0 %v2761_v46  ;;  %v4066_v18 = vld [vmem:[%s5206_s20 + $0x20] sm:$0xff]  ;;  %v4078_v22 = vld [vmem:[%s5206_s20 + $0x18] sm:$0xff]  ;;  %v4089_v24 = vld [vmem:[%s5205_s0 + $0x28] sm:$0xff] }
  0x23   :  { %282 = vmatpush.bf16.msra.mxu1 %v2765_v49  ;;  %334 = vmatpush.msra.mxu3 %v3970_v55  ;;  %v4084_v23 = vld [vmem:[%s5205_s0 + $0x20] sm:$0xff]  ;;  %v4094_v25 = vld [vmem:[%s5206_s20 + $0x10] sm:$0xff]  ;;  %v4100_v27 = vld [vmem:[%s5206_s20 + $0x8] sm:$0xff] }
  0x24   :  { %3568 = vmatpush.bf16.msra.mxu2 %v2829_v3  ;;  %v2768_v28 = vld [vmem:[%s5186_s3 + $0x8] sm:$0xf]  ;;  %v3432_v29 = vld [vmem:[%s5186_s3 + $0x10] sm:$0xf0]  ;;  %v82_v30 = vpack.c.bf16 %v4089_v24, %v4084_v23  ;;  %v4114_v31 = vld [vmem:[%s5206_s20] sm:$0xff] }
  0x25   :  { %259 = vmatmul.bf16.vlgmr.msra.gmra.mxu0 %v3946_v50  ;;  %335 = vmatpush.msra.mxu3 %v3982_v59  ;;  %v2769_v32 = vor.u32 %v3432_v29, %v2768_v28  ;;  %v4154_v33 = vld [vmem:[%s5187_s4] sm:$0x7] }
  0x26   :  { %283 = vmatmul.bf16.vlgmr.msra.gmra.mxu1 %v3946_v50  ;;  %v117_v34 = vperm.slane %v4154_v33, 0  ;;  %v118_v35 = vperm.slane %v4154_v33, 1 }
  0x27   :  { %299 = vmatpush.bf16.msrb.mxu1 %v2853_v56  ;;  %336 = vmatpush.msra.mxu3 %v3994_v63 }
  0x28   :  { %3569 = vmatpush.bf16.msra.mxu2 %v2817_v9 }
  0x29   :  { %337 = vmatpush.msra.mxu3 %v4010_v2 }
  0x2b   :  { %300 = vmatpush.bf16.msrb.mxu1 %v2841_v60  ;;  %338 = vmatpush.msra.mxu3 %v4022_v6 }
  0x2c   :  { %3570 = vmatpush.bf16.msra.mxu2 %v2805_v14 }
  0x2d   :  { %339 = vmatpush.msra.mxu3 %v4030_v8 }
  0x2f   :  { %301 = vmatpush.bf16.msrb.mxu1 %v2829_v3  ;;  %340 = vmatpush.msra.mxu3 %v4042_v12 }
  0x30   :  { %3571 = vmatpush.bf16.msra.mxu2 %v2793_v19 }
  0x31   :  { %341 = vmatpush.msra.mxu3 %v4048_v13 }
  0x33   :  { %302 = vmatpush.bf16.msrb.mxu1 %v2817_v9  ;;  %342 = vmatpush.msra.mxu3 %v4060_v17 }
  0x34   :  { %3572 = vmatpush.bf16.msra.mxu2 %v2781_v26 }
  0x35   :  { %264 = vmatmul.bf16.gmra.mxu0 %v81_v7  ;;  %343 = vmatpush.msra.mxu3 %v4066_v18 }
  0x36   :  { %288 = vmatmul.bf16.gmra.mxu1 %v81_v7 }
  0x37   :  { %303 = vmatpush.bf16.msrb.mxu1 %v2805_v14  ;;  %344 = vmatpush.msra.mxu3 %v4078_v22 }
  0x38   :  { %3573 = vmatpush.bf16.msra.mxu2 %v2769_v32 }
  0x39   :  { %345 = vmatpush.msra.mxu3 %v4094_v25 }
  0x3b   :  { %304 = vmatpush.bf16.msrb.mxu1 %v2793_v19  ;;  %346 = vmatpush.msra.mxu3 %v4100_v27 }
  0x3c   :  { %503 = vmatpush.msrb.mxu2 %v3953_v51 }
  0x3d   :  { %347 = vmatpush.msra.mxu3 %v4114_v31  ;;  %312 = vmatmul.bf16.vlgmr.msra.gmra.mxu2 %v81_v7 }
  0x3e   :  { %504 = vmatpush.msrb.mxu2 %v3958_v52 }
  0x3f   :  { %305 = vmatpush.bf16.msrb.mxu1 %v2781_v26  ;;  %361 = vmatpush.msrb.mxu3 %v3953_v51 }
  0x40   :  { %505 = vmatpush.msrb.mxu2 %v3970_v55 }
  0x41   :  { %362 = vmatpush.msrb.mxu3 %v3958_v52 }
  0x42   :  { %506 = vmatpush.msrb.mxu2 %v3982_v59 }
  0x43   :  { %306 = vmatpush.bf16.msrb.mxu1 %v2769_v32  ;;  %363 = vmatpush.msrb.mxu3 %v3970_v55 }
  0x44   :  { %507 = vmatpush.msrb.mxu2 %v3994_v63 }
  0x45   :  { %269 = vmatmul.bf16.gmra.mxu0 %v82_v30  ;;  %364 = vmatpush.msrb.mxu3 %v3982_v59 }
  0x46   :  { %293 = vmatmul.bf16.gmra.mxu1 %v82_v30  ;;  %508 = vmatpush.msrb.mxu2 %v4010_v2 }
  0x47   :  { %365 = vmatpush.msrb.mxu3 %v3994_v63 }
  0x48   :  { %509 = vmatpush.msrb.mxu2 %v4022_v6 }
  0x49   :  { %366 = vmatpush.msrb.mxu3 %v4010_v2 }
  0x4a   :  { %510 = vmatpush.msrb.mxu2 %v4030_v8 }
  0x4b   :  { %367 = vmatpush.msrb.mxu3 %v4022_v6 }
  0x4c   :  { %511 = vmatpush.msrb.mxu2 %v4042_v12 }
  0x4d   :  { %368 = vmatpush.msrb.mxu3 %v4030_v8  ;;  %317 = vmatmul.bf16.gmra.mxu2 %v82_v30 }
  0x4e   :  { %512 = vmatpush.msrb.mxu2 %v4048_v13 }
  0x4f   :  { %369 = vmatpush.msrb.mxu3 %v4042_v12 }
  0x50   :  { %513 = vmatpush.msrb.mxu2 %v4060_v17 }
  0x51   :  { %370 = vmatpush.msrb.mxu3 %v4048_v13 }
  0x52   :  { %514 = vmatpush.msrb.mxu2 %v4066_v18 }
  0x53   :  { %371 = vmatpush.msrb.mxu3 %v4060_v17 }
  0x54   :  { %515 = vmatpush.msrb.mxu2 %v4078_v22 }
  0x55   :  { %372 = vmatpush.msrb.mxu3 %v4066_v18 }
  0x56   :  { %307 = vmatmul.bf16.vlgmr.msrb.gmra.mxu1 %v3946_v50  ;;  %516 = vmatpush.msrb.mxu2 %v4094_v25 }
  0x57   :  { %373 = vmatpush.msrb.mxu3 %v4078_v22 }
  0x58   :  { %517 = vmatpush.msrb.mxu2 %v4100_v27 }
  0x59   :  { %374 = vmatpush.msrb.mxu3 %v4094_v25 }
  0x5a   :  { %518 = vmatpush.msrb.mxu2 %v4114_v31 }
  0x5b   :  { %375 = vmatpush.msrb.mxu3 %v4100_v27 }
  0x5d   :  { %376 = vmatpush.msrb.mxu3 %v4114_v31 }
  0xa2   :  { %v260_v36 = vpop.f32.mrf.mxu0 }
  0xa3   :  { %v261_v37 = vadd.f32 %v260_v36, %v117_v34  ;;  %v284_v38 = vpop.f32.mrf.mxu1 }
  0xa4   :  { %v285_v39 = vadd.f32 %v284_v38, %v118_v35 }
  0xa5   :  { %v323_v40 = vmul.f32 0.25, %v261_v37 }
  0xa7   :  { %v329_v41 = vmul.f32 %v323_v40, %v285_v39 }
  0xa9   :  { %348 = vmatmul.f32.vlgmr.msra.gmra.mxu3 %v329_v41 }
  0xaa   :  { %v262_v42 = vpop.f32.mrf.mxu0  ;;  %532 = vmatpush.msra.mxu3 %v3953_v51 }
  0xab   :  { %v263_v43 = vadd.f32 %v262_v42, %v117_v34  ;;  %v286_v44 = vpop.f32.mrf.mxu1 }
  0xac   :  { %533 = vmatpush.msra.mxu3 %v3958_v52  ;;  %v287_v46 = vadd.f32 %v286_v44, %v118_v35 }
  0xad   :  { %v324_v45 = vmul.f32 0.25, %v263_v43 }
  0xae   :  { %534 = vmatpush.msra.mxu3 %v3970_v55 }
  0xaf   :  { %v330_v49 = vmul.f32 %v324_v45, %v287_v46 }
  0xb0   :  { %535 = vmatpush.msra.mxu3 %v3982_v59 }
  0xb1   :  { %351 = vmatmul.f32.gmra.mxu3 %v330_v49 }
  0xb2   :  { %v265_v50 = vpop.f32.mrf.mxu0  ;;  %536 = vmatpush.msra.mxu3 %v3994_v63 }
  0xb3   :  { %v266_v53 = vadd.f32 %v265_v50, %v117_v34  ;;  %v289_v54 = vpop.f32.mrf.mxu1 }
  0xb4   :  { %v290_v56 = vadd.f32 %v289_v54, %v118_v35  ;;  %537 = vmatpush.msra.mxu3 %v4010_v2 }
  0xb5   :  { %v325_v51 = vmul.f32 0.25, %v266_v53 }
  0xb6   :  { %538 = vmatpush.msra.mxu3 %v4022_v6 }
  0xb7   :  { %v331_v52 = vmul.f32 %v325_v51, %v290_v56 }
  0xb8   :  { %539 = vmatpush.msra.mxu3 %v4030_v8 }
  0xb9   :  { %354 = vmatmul.f32.gmra.mxu3 %v331_v52 }
  0xba   :  { %v267_v55 = vpop.f32.mrf.mxu0  ;;  %540 = vmatpush.msra.mxu3 %v4042_v12 }
  0xbb   :  { %v268_v57 = vadd.f32 %v267_v55, %v117_v34  ;;  %v291_v58 = vpop.f32.mrf.mxu1 }
  0xbc   :  { %v292_v59 = vadd.f32 %v291_v58, %v118_v35  ;;  %541 = vmatpush.msra.mxu3 %v4048_v13 }
  0xbd   :  { %v326_v60 = vmul.f32 0.25, %v268_v57 }
  0xbe   :  { %542 = vmatpush.msra.mxu3 %v4060_v17  ;;  %v358_v61 = vmul.f32 %v323_v40, %v292_v59 }
  0xbf   :  { %v500_v62 = vmul.f32 %v326_v60, %v285_v39  ;;  %v529_v15 = vmul.f32 %v326_v60, %v292_v59 }
  0xc0   :  { %543 = vmatpush.msra.mxu3 %v4066_v18  ;;  %v79_v18 = vld [vmem:[%s5185_s2] sm:$0xff]  ;;  %v4177_v20 = vpop.f32.mrf.mxu2 }
  0xc1   :  { %377 = vmatmul.f32.vlgmr.msrb.gmra.mxu3 %v358_v61  ;;  %519 = vmatmul.f32.vlgmr.msrb.gmra.mxu2 %v500_v62 }
  0xc2   :  { %v270_v63 = vpop.f32.mrf.mxu0  ;;  %544 = vmatpush.msra.mxu3 %v4078_v22  ;;  %442 = vmatpush.msrb.mxu0 %v79_v18 }
  0xc3   :  { %v271_v2 = vadd.f32 %v270_v63, %v117_v34  ;;  %v294_v3 = vpop.f32.mrf.mxu1  ;;  %483 = vmatpush.msra.mxu1 %v79_v18 }
  0xc4   :  { %v295_v4 = vadd.f32 %v294_v3, %v118_v35  ;;  %545 = vmatpush.msra.mxu3 %v4094_v25  ;;  %612 = vmatpush.msra.mxu0 %v79_v18 }
  0xc5   :  { %v327_v5 = vmul.f32 0.25, %v271_v2  ;;  %653 = vmatpush.msrb.mxu1 %v79_v18 }
  0xc6   :  { %546 = vmatpush.msra.mxu3 %v4100_v27  ;;  %v359_v6 = vmul.f32 %v324_v45, %v295_v4 }
  0xc7   :  { %v501_v7 = vmul.f32 %v327_v5, %v287_v46  ;;  %v530_v16 = vmul.f32 %v327_v5, %v295_v4 }
  0xc8   :  { %547 = vmatpush.msra.mxu3 %v4114_v31  ;;  %v4179_v22 = vpop.f32.mrf.mxu2 }
  0xc9   :  { %380 = vmatmul.f32.gmra.mxu3 %v359_v6  ;;  %522 = vmatmul.f32.gmra.mxu2 %v501_v7 }
  0xca   :  { %v272_v8 = vpop.f32.mrf.mxu0 }
  0xcb   :  { %v273_v9 = vadd.f32 %v272_v8, %v117_v34  ;;  %v296_v10 = vpop.f32.mrf.mxu1 }
  0xcc   :  { %v297_v11 = vadd.f32 %v296_v10, %v118_v35 }
  0xcd   :  { %v328_v12 = vmul.f32 0.25, %v273_v9 }
  0xce   :  { %v360_v13 = vmul.f32 %v325_v51, %v297_v11 }
  0xcf   :  { %v502_v14 = vmul.f32 %v328_v12, %v290_v56  ;;  %v531_v17 = vmul.f32 %v328_v12, %v297_v11  ;;  %v3461_v12 = vld [vmem:[%s5188_s5 + $0x38] sm:$0xff] }
  0xd0   :  { %v4181_v26 = vpop.f32.mrf.mxu2  ;;  %741 = vmatpush.bf16.msra.mxu2 %v3461_v12 }
  0xd1   :  { %383 = vmatmul.f32.gmra.mxu3 %v360_v13  ;;  %525 = vmatmul.f32.gmra.mxu2 %v502_v14 }
  0xd8   :  { %v4183_v36 = vpop.f32.mrf.mxu2 }
  0xd9   :  { %548 = vmatmul.f32.vlgmr.msra.gmra.mxu3 %v529_v15  ;;  %v3460_v15 = vld [vmem:[%s5188_s5 + $0x30] sm:$0xff] }
  0xda   :  { %742 = vmatpush.bf16.msra.mxu2 %v3460_v15 }
  0xe1   :  { %551 = vmatmul.f32.gmra.mxu3 %v530_v16 }
  0xe9   :  { %554 = vmatmul.f32.gmra.mxu3 %v531_v17 }
 0x12c   :  { %v349_v19 = vpop.f32.mrf.mxu3 }
 0x134   :  { %v352_v21 = vpop.f32.mrf.mxu3 }
 0x13c   :  { %v355_v25 = vpop.f32.mrf.mxu3 }
 0x144   :  { %v378_v27 = vpop.f32.mrf.mxu3  ;;  %v520_v50 = vpop.f32.mrf.mxu2 }
 0x145   :  { %v387_v28 = vmax.f32 %v349_v19, %v378_v27 }
 0x147   :  { %v390_v29 = vsub.f32 %v349_v19, %v387_v28  ;;  %v399_v30 = vsub.f32 %v378_v27, %v387_v28 }
 0x149   :  { %v393_v31 = vmul.f32 1.442695, %v390_v29  ;;  %v402_v32 = vmul.f32 1.442695, %v399_v30 }
 0x14b   :  { %3589 = vpow2.f32 %v393_v31  ;;  %v3459_v31 = vld [vmem:[%s5188_s5 + $0x28] sm:$0xff] }
 0x14c   :  { %3591 = vpow2.f32 %v402_v32  ;;  %v381_v34 = vpop.f32.mrf.mxu3  ;;  %v523_v5 = vpop.f32.mrf.mxu2  ;;  %743 = vmatpush.bf16.msra.mxu2 %v3459_v31 }
 0x14d   :  { %v388_v35 = vmax.f32 %v352_v21, %v381_v34 }
 0x14f   :  { %v391_v37 = vsub.f32 %v352_v21, %v388_v35  ;;  %v400_v38 = vsub.f32 %v381_v34, %v388_v35 }
 0x151   :  { %v3590_v39 = vpop.eup %3589  ;;  %v395_v40 = vmul.f32 1.442695, %v391_v37  ;;  %v404_v41 = vmul.f32 1.442695, %v400_v38  ;;  %v3458_v37 = vld [vmem:[%s5188_s5 + $0x20] sm:$0xff] }
 0x152   :  { %v3592_v42 = vpop.eup %3591  ;;  %744 = vmatpush.bf16.msra.mxu2 %v3458_v37 }
 0x153   :  { %v408_v43 = vadd.f32 %v3592_v42, %v3590_v39  ;;  %3593 = vpow2.f32 %v395_v40 }
 0x154   :  { %3595 = vpow2.f32 %v404_v41  ;;  %v384_v44 = vpop.f32.mrf.mxu3  ;;  %v526_v27 = vpop.f32.mrf.mxu2 }
 0x155   :  { %3597 = vrcp.f32 %v408_v43  ;;  %v389_v45 = vmax.f32 %v355_v25, %v384_v44 }
 0x157   :  { %v392_v46 = vsub.f32 %v355_v25, %v389_v45  ;;  %v401_v49 = vsub.f32 %v384_v44, %v389_v45 }
 0x159   :  { %v3594_v53 = vpop.eup %3593  ;;  %v397_v54 = vmul.f32 1.442695, %v392_v46  ;;  %v406_v56 = vmul.f32 1.442695, %v401_v49 }
 0x15a   :  { %v3596_v51 = vpop.eup %3595 }
 0x15b   :  { %v3598_v52 = vpop.eup %3597  ;;  %3599 = vpow2.f32 %v397_v54  ;;  %v409_v55 = vadd.f32 %v3596_v51, %v3594_v53 }
 0x15c   :  { %v456_v57 = vmul.f32 %v3598_v52, %v3592_v42  ;;  %3601 = vpow2.f32 %v406_v56  ;;  %v549_v58 = vpop.f32.mrf.mxu3  ;;  %v414_v59 = vmul.f32 %v3598_v52, %v3590_v39 }
 0x15d   :  { %v558_v60 = vmax.f32 %v520_v50, %v549_v58  ;;  %3603 = vrcp.f32 %v409_v55 }
 0x15e   :  { %2854 = vmatmul.msk.f32.vlgmr.msrb.gmra.mxu0 %vm417_vm0, %v414_v59  ;;  %2857 = vmatmul.msk.f32.vlgmr.msra.gmra.mxu1 %vm417_vm0, %v456_v57  ;;  %v3457_v57 = vld [vmem:[%s5188_s5 + $0x18] sm:$0xff]  ;;  %v3455_v59 = vld [vmem:[%s5188_s5 + $0x8] sm:$0xff] }
 0x15f   :  { %v561_v61 = vsub.f32 %v520_v50, %v558_v60  ;;  %v570_v62 = vsub.f32 %v549_v58, %v558_v60  ;;  %745 = vmatpush.bf16.msra.mxu2 %v3457_v57  ;;  %v3456_v58 = vld [vmem:[%s5188_s5 + $0x10] sm:$0xff]  ;;  %v3454_v60 = vld [vmem:[%s5188_s5] sm:$0xff] }
 0x161   :  { %v3600_v63 = vpop.eup %3599  ;;  %v564_v2 = vmul.f32 1.442695, %v561_v61  ;;  %v573_v3 = vmul.f32 1.442695, %v570_v62  ;;  %v308_v61 = vpop.f32.mrf.mxu1 }
 0x162   :  { %v3602_v4 = vpop.eup %3601 }
 0x163   :  { %v3604_v6 = vpop.eup %3603  ;;  %v410_v7 = vadd.f32 %v3602_v4, %v3600_v63  ;;  %3605 = vpow2.f32 %v564_v2  ;;  %746 = vmatpush.bf16.msra.mxu2 %v3456_v58 }
 0x164   :  { %3607 = vpow2.f32 %v573_v3  ;;  %v552_v8 = vpop.f32.mrf.mxu3  ;;  %v415_v9 = vmul.f32 %v3604_v6, %v3594_v53  ;;  %v457_v10 = vmul.f32 %v3604_v6, %v3596_v51  ;;  %v119_v3 = vperm.slane %v4154_v33, 2 }
 0x165   :  { %3609 = vrcp.f32 %v410_v7  ;;  %v559_v11 = vmax.f32 %v523_v5, %v552_v8 }
 0x166   :  { %2855 = vmatmul.msk.f32.gmra.mxu0 %vm417_vm0, %v415_v9  ;;  %2858 = vmatmul.msk.f32.gmra.mxu1 %vm417_vm0, %v457_v10  ;;  %v319_v6 = vadd.f32 %v4181_v26, %v119_v3  ;;  %v314_v33 = vadd.f32 %v4177_v20, %v119_v3 }
 0x167   :  { %v562_v13 = vsub.f32 %v523_v5, %v559_v11  ;;  %v571_v14 = vsub.f32 %v552_v8, %v559_v11  ;;  %747 = vmatpush.bf16.msra.mxu2 %v3455_v59  ;;  %v309_v5 = vadd.f32 %v308_v61, %v119_v3 }
 0x169   :  { %v3606_v16 = vpop.eup %3605  ;;  %v566_v17 = vmul.f32 1.442695, %v562_v13  ;;  %v575_v18 = vmul.f32 1.442695, %v571_v14  ;;  %v310_v62 = vpop.f32.mrf.mxu1 }
 0x16a   :  { %v3608_v19 = vpop.eup %3607  ;;  %v311_v7 = vadd.f32 %v310_v62, %v119_v3  ;;  %v3746_v62 = vmov 128.0  }
 0x16b   :  { %v3610_v21 = vpop.eup %3609  ;;  %v579_v25 = vadd.f32 %v3608_v19, %v3606_v16  ;;  %3611 = vpow2.f32 %v566_v17  ;;  %748 = vmatpush.bf16.msra.mxu2 %v3454_v60 }
 0x16c   :  { %3613 = vpow2.f32 %v575_v18  ;;  %v555_v28 = vpop.f32.mrf.mxu3  ;;  %v416_v29 = vmul.f32 %v3610_v21, %v3600_v63  ;;  %v458_v30 = vmul.f32 %v3610_v21, %v3602_v4  ;;  %v316_v4 = vadd.f32 %v4179_v22, %v119_v3 }
 0x16d   :  { %3615 = vrcp.f32 %v579_v25  ;;  %v560_v32 = vmax.f32 %v526_v27, %v555_v28  ;;  %v321_v22 = vadd.f32 %v4183_v36, %v119_v3 }
 0x16e   :  { %2856 = vmatmul.msk.f32.gmra.mxu0 %vm417_vm0, %v416_v29  ;;  %2859 = vmatmul.msk.f32.gmra.mxu1 %vm417_vm0, %v458_v30 }
 0x16f   :  { %v563_v34 = vsub.f32 %v526_v27, %v560_v32  ;;  %v572_v35 = vsub.f32 %v555_v28, %v560_v32 }
 0x171   :  { %v3612_v38 = vpop.eup %3611  ;;  %v568_v39 = vmul.f32 1.442695, %v563_v34  ;;  %v577_v40 = vmul.f32 1.442695, %v572_v35 }
 0x172   :  { %v3614_v41 = vpop.eup %3613 }
 0x173   :  { %v3616_v42 = vpop.eup %3615  ;;  %v580_v43 = vadd.f32 %v3614_v41, %v3612_v38  ;;  %3617 = vpow2.f32 %v568_v39 }
 0x174   :  { %v626_v44 = vmul.f32 %v3616_v42, %v3608_v19  ;;  %3619 = vpow2.f32 %v577_v40  ;;  %v585_v45 = vmul.f32 %v3616_v42, %v3606_v16 }
 0x175   :  { %3621 = vrcp.f32 %v580_v43  ;;  %v3576_v43 = vld [vmem:[%s5189_s6] ss:$0 sm:$0xff] }
 0x176   :  { %2860 = vmatmul.msk.f32.vlgmr.msra.gmra.mxu0 %vm417_vm0, %v585_v45  ;;  %2863 = vmatmul.msk.f32.vlgmr.msrb.gmra.mxu1 %vm417_vm0, %v626_v44 }
 0x179   :  { %v3618_v46 = vpop.eup %3617 }
 0x17a   :  { %v3620_v49 = vpop.eup %3619 }
 0x17b   :  { %v3622_v50 = vpop.eup %3621  ;;  %v581_v53 = vadd.f32 %v3620_v49, %v3618_v46 }
 0x17c   :  { %v586_v54 = vmul.f32 %v3622_v50, %v3612_v38  ;;  %v627_v56 = vmul.f32 %v3622_v50, %v3614_v41 }
 0x17d   :  { %3623 = vrcp.f32 %v581_v53 }
 0x17e   :  { %2861 = vmatmul.msk.f32.gmra.mxu0 %vm417_vm0, %v586_v54  ;;  %2864 = vmatmul.msk.f32.gmra.mxu1 %vm417_vm0, %v627_v56  ;;  %3625 = vrcp.f32 %v3746_v62 }
 0x183   :  { %v3624_v51 = vpop.eup %3623 }
 0x184   :  { %v587_v52 = vmul.f32 %v3624_v51, %v3618_v46  ;;  %v628_v55 = vmul.f32 %v3624_v51, %v3620_v49 }
 0x186   :  { %2862 = vmatmul.msk.f32.gmra.mxu0 %vm417_vm0, %v587_v52  ;;  %2865 = vmatmul.msk.f32.gmra.mxu1 %vm417_vm0, %v628_v55 }
 0x1db   :  { %v444_v63 = vpop.f32.mrf.mxu0  ;;  %v485_v2 = vpop.f32.mrf.mxu1 }
 0x1dc   :  { %v453_v8 = vmul.f32 %v444_v63, %v309_v5  ;;  %v494_v9 = vmul.f32 %v485_v2, %v316_v4  ;;  %v3626_v63 = vpop.eup %3625 }
 0x1dd   :  { %vm790_vm1 = vweird.f32 %v3626_v63 }
 0x1de   :  { %v497_v14 = vadd.f32 %v494_v9, %v453_v8 }
 0x1e3   :  { %v447_v10 = vpop.f32.mrf.mxu0  ;;  %v488_v11 = vpop.f32.mrf.mxu1 }
 0x1e4   :  { %v454_v12 = vmul.f32 %v447_v10, %v311_v7  ;;  %v495_v13 = vmul.f32 %v488_v11, %v319_v6 }
 0x1e6   :  { %v498_v15 = vadd.f32 %v495_v13, %v454_v12 }
 0x1e8   :  { %v670_v16 = vpack.c.bf16 %v498_v15, %v497_v14 }
 0x1ea   :  { %749 = vmatmul.bf16.vlgmr.msra.gmra.mxu2 %v670_v16 }
 0x1eb   :  { %v450_v17 = vpop.f32.mrf.mxu0  ;;  %v491_v18 = vpop.f32.mrf.mxu1 }
 0x1ec   :  { %v455_v19 = vmul.f32 %v450_v17, %v314_v33  ;;  %v496_v21 = vmul.f32 %v491_v18, %v321_v22 }
 0x1ee   :  { %v499_v29 = vadd.f32 %v496_v21, %v455_v19 }
 0x1f3   :  { %v614_v26 = vpop.f32.mrf.mxu0  ;;  %v655_v25 = vpop.f32.mrf.mxu1 }
 0x1f4   :  { %v623_v27 = vmul.f32 %v614_v26, %v309_v5  ;;  %v664_v28 = vmul.f32 %v655_v25, %v316_v4 }
 0x1f6   :  { %v667_v30 = vadd.f32 %v664_v28, %v623_v27 }
 0x1f8   :  { %v671_v31 = vpack.c.bf16 %v667_v30, %v499_v29  ;;  %v2956_v29 = vld [vmem:[%s5192_s9 + $0x70] sm:$0xf]  ;;  %v3477_v30 = vld [vmem:[%s5192_s9 + $0x74] sm:$0xf0] }
 0x1fa   :  { %754 = vmatmul.bf16.gmra.mxu2 %v671_v31  ;;  %v3476_v31 = vld [vmem:[%s5192_s9 + $0x74] sm:$0xf] }
 0x1fb   :  { %v617_v32 = vpop.f32.mrf.mxu0  ;;  %v658_v34 = vpop.f32.mrf.mxu1 }
 0x1fc   :  { %v624_v35 = vmul.f32 %v617_v32, %v311_v7  ;;  %v665_v37 = vmul.f32 %v658_v34, %v319_v6  ;;  %v2957_v32 = vor.u32 %v3477_v30, %v2956_v29  ;;  %v2958_v34 = vld [vmem:[%s5192_s9 + $0x78] sm:$0xf0] }
 0x1fe   :  { %v668_v41 = vadd.f32 %v665_v37, %v624_v35  ;;  %v2961_v35 = vor.u32 %v3476_v31, %v2958_v34  ;;  %1023 = vmatpush.bf16.msrb.mxu3 %v2957_v32  ;;  %v2948_v37 = vld [vmem:[%s5192_s9 + $0x60] sm:$0xf] }
 0x200   :  { %1047 = vmatpush.bf16.msrb.mxu0 %v2961_v35 }
 0x203   :  { %v620_v38 = vpop.f32.mrf.mxu0  ;;  %v661_v39 = vpop.f32.mrf.mxu1 }
 0x204   :  { %v625_v40 = vmul.f32 %v620_v38, %v314_v33  ;;  %v666_v20 = vmul.f32 %v661_v39, %v321_v22  ;;  %v3475_v38 = vld [vmem:[%s5192_s9 + $0x64] sm:$0xf0]  ;;  %v3474_v39 = vld [vmem:[%s5192_s9 + $0x64] sm:$0xf] }
 0x206   :  { %v669_v36 = vadd.f32 %v666_v20, %v625_v40  ;;  %v2949_v40 = vor.u32 %v3475_v38, %v2948_v37  ;;  %v2950_v20 = vld [vmem:[%s5192_s9 + $0x68] sm:$0xf0] }
 0x208   :  { %v672_v42 = vpack.c.bf16 %v669_v36, %v668_v41  ;;  %v2953_v41 = vor.u32 %v3474_v39, %v2950_v20  ;;  %1024 = vmatpush.bf16.msrb.mxu3 %v2949_v40  ;;  %v2940_v36 = vld [vmem:[%s5192_s9 + $0x50] sm:$0xf] }
 0x20a   :  { %759 = vmatmul.bf16.gmra.mxu2 %v672_v42  ;;  %1048 = vmatpush.bf16.msrb.mxu0 %v2953_v41  ;;  %v3473_v42 = vld [vmem:[%s5192_s9 + $0x54] sm:$0xf0] }
 0x26d   :  { %v750_v44 = vpop.f32.mrf.mxu2 }
 0x26e   :  { %v751_v45 = vadd.f32 %v3576_v43, %v750_v44  ;;  %v2941_v44 = vor.u32 %v3473_v42, %v2940_v36 }
 0x270   :  { %v765_v46 = vadd.f32 %v751_v45, %v3937_v47  ;;  %v2942_v45 = vld [vmem:[%s5192_s9 + $0x58] sm:$0xf0]  ;;  %1025 = vmatpush.bf16.msrb.mxu3 %v2941_v44 }
 0x272   :  { %773 = vadd.xlane.f32.xlu0 %v765_v46 }
 0x275   :  { %v752_v49 = vpop.f32.mrf.mxu2 }
 0x276   :  { %v753_v50 = vadd.f32 %v3576_v43, %v752_v49  ;;  %v2932_v49 = vld [vmem:[%s5192_s9 + $0x40] sm:$0xf] }
 0x278   :  { %v766_v53 = vadd.f32 %v753_v50, %v3942_v48  ;;  %v3471_v50 = vld [vmem:[%s5192_s9 + $0x44] sm:$0xf0] }
 0x27a   :  { %775 = vadd.xlane.f32.xlu0 %v766_v53 }
 0x27d   :  { %v755_v54 = vpop.f32.mrf.mxu2 }
 0x27e   :  { %v756_v56 = vadd.f32 %v3576_v43, %v755_v54  ;;  %v2933_v54 = vor.u32 %v3471_v50, %v2932_v49 }
 0x280   :  { %v767_v51 = vadd.f32 %v756_v56, %v4000_v0  ;;  %v786_v0 = vmul.f32 128.0, %v3626_v63  ;;  %v2934_v56 = vld [vmem:[%s5192_s9 + $0x48] sm:$0xf0]  ;;  %1026 = vmatpush.bf16.msrb.mxu3 %v2933_v54 }
 0x282   :  { %777 = vadd.xlane.f32.xlu1 %v767_v51  ;;  %v787_v2 = vsub.f32 1.0, %v786_v0 }
 0x284   :  { %v788_v3 = vmul.f32 %v3626_v63, %v787_v2  ;;  %v2908_v2 = vld [vmem:[%s5192_s9 + $0x10] sm:$0xf] }
 0x285   :  { %v757_v52 = vpop.f32.mrf.mxu2 }
 0x286   :  { %v758_v55 = vadd.f32 %v3576_v43, %v757_v52  ;;  %v789_v4 = vadd.f32 %v3626_v63, %v788_v3  ;;  %v2924_v52 = vld [vmem:[%s5192_s9 + $0x30] sm:$0xf]  ;;  %v3465_v3 = vld [vmem:[%s5192_s9 + $0x14] sm:$0xf0] }
 0x288   :  { %v768_v57 = vadd.f32 %v758_v55, %v4005_v1  ;;  %v4235_v1 = vsel %vm790_vm1, %v3626_v63, %v789_v4  ;;  %v3469_v55 = vld [vmem:[%s5192_s9 + $0x34] sm:$0xf0]  ;;  %v2918_v63 = vld [vmem:[%s5192_s9 + $0x28] sm:$0xf0]  ;;  %v3464_v4 = vld [vmem:[%s5192_s9 + $0x14] sm:$0xf] }
 0x28a   :  { %779 = vadd.xlane.f32.xlu1 %v768_v57 }
 0x28d   :  { %v760_v58 = vpop.f32.mrf.mxu2 }
 0x28e   :  { %v761_v59 = vadd.f32 %v3576_v43, %v760_v58  ;;  %v2925_v58 = vor.u32 %v3469_v55, %v2924_v52 }
 0x290   :  { %v769_v47 = vadd.f32 %v761_v59, %v4084_v23  ;;  %v2926_v59 = vld [vmem:[%s5192_s9 + $0x38] sm:$0xf0]  ;;  %1027 = vmatpush.bf16.msrb.mxu3 %v2925_v58 }
 0x292   :  { %781 = vadd.xlane.f32.xlu2 %v769_v47 }
 0x295   :  { %v762_v60 = vpop.f32.mrf.mxu2 }
 0x296   :  { %v763_v61 = vadd.f32 %v3576_v43, %v762_v60  ;;  %v3472_v43 = vld [vmem:[%s5192_s9 + $0x54] sm:$0xf]  ;;  %v2916_v60 = vld [vmem:[%s5192_s9 + $0x20] sm:$0xf] }
 0x298   :  { %v770_v48 = vadd.f32 %v763_v61, %v4089_v24  ;;  %v3467_v61 = vld [vmem:[%s5192_s9 + $0x24] sm:$0xf0] }
 0x299   :  { %v2917_v62 = vor.u32 %v3467_v61, %v2916_v60 }
 0x29a   :  { %783 = vadd.xlane.f32.xlu2 %v770_v48 }
 0x29b   :  { %1028 = vmatpush.bf16.msrb.mxu3 %v2917_v62 }
 0x2e5   :  { %v774_v5 = vpop.xlane.xlu0 %773 }
 0x2e6   :  { %v792_v6 = vmul.f32 %v4235_v1, %v774_v5  ;;  %v2909_v5 = vor.u32 %v3465_v3, %v2908_v2  ;;  %v3493_v3 = vld [vmem:[%s5194_s11 + $0x78] sm:$0xff] }
 0x2e7   :  { %1245 = vmatpush.bf16.msrb.mxu2 %v3493_v3  ;;  %v4520_v2 = vld [vmem:[%s5206_s20 + $0x38] sm:$0xff]  ;;  %v4526_v3 = vld [vmem:[%s5206_s20 + $0x30] sm:$0xff] }
 0x2e8   :  { %v4238_v23 = vsub.f32 %v765_v46, %v792_v6  ;;  %v2945_v46 = vor.u32 %v3472_v43, %v2942_v45  ;;  %v2910_v6 = vld [vmem:[%s5192_s9 + $0x18] sm:$0xf0]  ;;  %1029 = vmatpush.bf16.msrb.mxu3 %v2909_v5 }
 0x2ea   :  { %v804_v7 = vmul.f32 %v4238_v23, %v4238_v23  ;;  %1049 = vmatpush.bf16.msrb.mxu0 %v2945_v46  ;;  %v4371_v46 = vld [vmem:[%s5190_s7] ss:$0 sm:$0xff] }
 0x2ec   :  { %810 = vadd.xlane.f32.xlu0 %v804_v7  ;;  %v2913_v7 = vor.u32 %v3464_v4, %v2910_v6 }
 0x2ed   :  { %v776_v24 = vpop.xlane.xlu0 %775 }
 0x2ee   :  { %v793_v8 = vmul.f32 %v4235_v1, %v776_v24 }
 0x2f0   :  { %v4243_v9 = vsub.f32 %v766_v53, %v793_v8  ;;  %v3470_v53 = vld [vmem:[%s5192_s9 + $0x44] sm:$0xf] }
 0x2f2   :  { %v805_v10 = vmul.f32 %v4243_v9, %v4243_v9 }
 0x2f4   :  { %812 = vadd.xlane.f32.xlu1 %v805_v10  ;;  %v2900_v10 = vld [vmem:[%s5192_s9] sm:$0xf] }
 0x2f5   :  { %v778_v11 = vpop.xlane.xlu1 %777 }
 0x2f6   :  { %v794_v12 = vmul.f32 %v4235_v1, %v778_v11  ;;  %v3463_v11 = vld [vmem:[%s5192_s9 + $0x4] sm:$0xf0] }
 0x2f8   :  { %v4248_v13 = vsub.f32 %v767_v51, %v794_v12  ;;  %v2937_v51 = vor.u32 %v3470_v53, %v2934_v56  ;;  %v3462_v12 = vld [vmem:[%s5192_s9 + $0x4] sm:$0xf] }
 0x2fa   :  { %v806_v14 = vmul.f32 %v4248_v13, %v4248_v13  ;;  %1050 = vmatpush.bf16.msrb.mxu0 %v2937_v51 }
 0x2fc   :  { %814 = vadd.xlane.f32.xlu2 %v806_v14  ;;  %v2901_v14 = vor.u32 %v3463_v11, %v2900_v10  ;;  %v3484_v11 = vld [vmem:[%s5194_s11 + $0x30] sm:$0xff] }
 0x2fd   :  { %v780_v15 = vpop.xlane.xlu1 %779 }
 0x2fe   :  { %v795_v16 = vmul.f32 %v4235_v1, %v780_v15  ;;  %v2902_v15 = vld [vmem:[%s5192_s9 + $0x8] sm:$0xf0]  ;;  %1030 = vmatpush.bf16.msrb.mxu3 %v2901_v14 }
 0x300   :  { %v4253_v17 = vsub.f32 %v768_v57, %v795_v16  ;;  %v3468_v57 = vld [vmem:[%s5192_s9 + $0x34] sm:$0xf] }
 0x302   :  { %v807_v18 = vmul.f32 %v4253_v17, %v4253_v17 }
 0x304   :  { %816 = vadd.xlane.f32.xlu0 %v807_v18  ;;  %v2905_v18 = vor.u32 %v3462_v12, %v2902_v15 }
 0x305   :  { %v782_v33 = vpop.xlane.xlu2 %781 }
 0x306   :  { %v796_v22 = vmul.f32 %v4235_v1, %v782_v33 }
 0x308   :  { %v4258_v19 = vsub.f32 %v769_v47, %v796_v22  ;;  %v2929_v47 = vor.u32 %v3468_v57, %v2926_v59 }
 0x30a   :  { %v808_v21 = vmul.f32 %v4258_v19, %v4258_v19  ;;  %1051 = vmatpush.bf16.msrb.mxu0 %v2929_v47 }
 0x30c   :  { %818 = vadd.xlane.f32.xlu1 %v808_v21 }
 0x30d   :  { %v784_v26 = vpop.xlane.xlu2 %783 }
 0x30e   :  { %v797_v25 = vmul.f32 %v4235_v1, %v784_v26 }
 0x310   :  { %v4263_v27 = vsub.f32 %v770_v48, %v797_v25  ;;  %v3466_v48 = vld [vmem:[%s5192_s9 + $0x24] sm:$0xf] }
 0x311   :  { %v2921_v0 = vor.u32 %v3466_v48, %v2918_v63 }
 0x312   :  { %v809_v28 = vmul.f32 %v4263_v27, %v4263_v27 }
 0x313   :  { %1052 = vmatpush.bf16.msrb.mxu0 %v2921_v0 }
 0x314   :  { %820 = vadd.xlane.f32.xlu2 %v809_v28 }
 0x317   :  { %1053 = vmatpush.bf16.msrb.mxu0 %v2913_v7  ;;  %v3485_v7 = vld [vmem:[%s5194_s11 + $0x38] sm:$0xff] }
 0x318   :  { %1221 = vmatpush.bf16.msra.mxu1 %v3485_v7 }
 0x31b   :  { %1054 = vmatpush.bf16.msrb.mxu0 %v2905_v18 }
 0x31c   :  { %1222 = vmatpush.bf16.msra.mxu1 %v3484_v11 }
 0x35f   :  { %v811_v24 = vpop.xlane.xlu0 %810 }
 0x360   :  { %v822_v8 = vmul.f32 %v811_v24, %v4235_v1 }
 0x362   :  { %v828_v16 = vadd.f32 1e-05, %v822_v8  ;;  %v3492_v8 = vld [vmem:[%s5194_s11 + $0x70] sm:$0xff] }
 0x363   :  { %1246 = vmatpush.bf16.msrb.mxu2 %v3492_v8  ;;  %v4547_v8 = vld [vmem:[%s5206_s20 + $0x18] sm:$0xff] }
 0x364   :  { %3627 = vrsqrt.f32 %v828_v16  ;;  %vm840_vm3 = vweird.f32 %v828_v16 }
 0x367   :  { %v813_v33 = vpop.xlane.xlu1 %812 }
 0x368   :  { %v823_v22 = vmul.f32 %v813_v33, %v4235_v1  ;;  %v3491_v33 = vld [vmem:[%s5194_s11 + $0x68] sm:$0xff] }
 0x369   :  { %1247 = vmatpush.bf16.msrb.mxu2 %v3491_v33 }
 0x36a   :  { %v3628_v21 = vpop.eup %3627  ;;  %v829_v26 = vadd.f32 1e-05, %v823_v22 }
 0x36b   :  { %v835_v25 = vmul.f32 %v3628_v21, %v828_v16  ;;  %vm841_vm2 = vweird.f32 %v3628_v21 }
 0x36c   :  { %3629 = vrsqrt.f32 %v829_v26  ;;  %vm842_vm4 = vmor %vm840_vm3, %vm841_vm2  ;;  %vm850_vm6 = vweird.f32 %v829_v26 }
 0x36d   :  { %v836_v28 = vmul.f32 %v3628_v21, %v835_v25 }
 0x36f   :  { %v837_v29 = vmul.f32 0.5, %v836_v28  ;;  %v815_v30 = vpop.xlane.xlu2 %814 }
 0x370   :  { %v824_v31 = vmul.f32 %v815_v30, %v4235_v1  ;;  %v3490_v30 = vld [vmem:[%s5194_s11 + $0x60] sm:$0xff] }
 0x371   :  { %v838_v32 = vsub.f32 1.5, %v837_v29  ;;  %1248 = vmatpush.bf16.msrb.mxu2 %v3490_v30 }
 0x372   :  { %v3630_v34 = vpop.eup %3629  ;;  %v830_v35 = vadd.f32 1e-05, %v824_v31 }
 0x373   :  { %v839_v37 = vmul.f32 %v3628_v21, %v838_v32  ;;  %v845_v38 = vmul.f32 %v3630_v34, %v829_v26  ;;  %vm851_vm5 = vweird.f32 %v3630_v34  ;;  %v3483_v26 = vld [vmem:[%s5194_s11 + $0x28] sm:$0xff] }
 0x374   :  { %3631 = vrsqrt.f32 %v830_v35  ;;  %vm852_vm7 = vmor %vm850_vm6, %vm851_vm5  ;;  %vm860_vm9 = vweird.f32 %v830_v35  ;;  %1223 = vmatpush.bf16.msra.mxu1 %v3483_v26 }
 0x375   :  { %v846_v39 = vmul.f32 %v3630_v34, %v845_v38  ;;  %v843_v40 = vsel %vm842_vm4, %v3628_v21, %v839_v37 }
 0x376   :  { %v894_v44 = vmul.f32 %v843_v40, %v4238_v23  ;;  %v4378_v23 = vld [vmem:[%s5191_s8] ss:$0 sm:$0xff] }
 0x377   :  { %v847_v20 = vmul.f32 0.5, %v846_v39  ;;  %v817_v41 = vpop.xlane.xlu0 %816  ;;  %v3489_v39 = vld [vmem:[%s5194_s11 + $0x58] sm:$0xff] }
 0x378   :  { %v825_v36 = vmul.f32 %v817_v41, %v4235_v1  ;;  %v903_v51 = vmul.f32 %v4371_v46, %v894_v44  ;;  %1249 = vmatpush.bf16.msrb.mxu2 %v3489_v39 }
 0x379   :  { %v848_v42 = vsub.f32 1.5, %v847_v20 }
 0x37a   :  { %v3632_v43 = vpop.eup %3631  ;;  %v831_v45 = vadd.f32 1e-05, %v825_v36  ;;  %v4383_v61 = vadd.f32 %v4378_v23, %v903_v51  ;;  %v3488_v36 = vld [vmem:[%s5194_s11 + $0x50] sm:$0xff]  ;;  %v3482_v51 = vld [vmem:[%s5194_s11 + $0x20] sm:$0xff] }
 0x37b   :  { %v849_v49 = vmul.f32 %v3630_v34, %v848_v42  ;;  %v855_v50 = vmul.f32 %v3632_v43, %v830_v35  ;;  %vm861_vm8 = vweird.f32 %v3632_v43  ;;  %1224 = vmatpush.bf16.msra.mxu1 %v3482_v51 }
 0x37c   :  { %3633 = vrsqrt.f32 %v831_v45  ;;  %vm4390_vm10 = vmor %vm860_vm9, %vm861_vm8  ;;  %vm870_vm12 = vweird.f32 %v831_v45  ;;  %1250 = vmatpush.bf16.msrb.mxu2 %v3488_v36 }
 0x37d   :  { %v853_v53 = vsel %vm852_vm7, %v3630_v34, %v849_v49  ;;  %v856_v54 = vmul.f32 %v3632_v43, %v855_v50 }
 0x37e   :  { %v895_v56 = vmul.f32 %v853_v53, %v4243_v9 }
 0x37f   :  { %v857_v52 = vmul.f32 0.5, %v856_v54  ;;  %v819_v55 = vpop.xlane.xlu1 %818 }
 0x380   :  { %v826_v57 = vmul.f32 %v819_v55, %v4235_v1  ;;  %v904_v58 = vmul.f32 %v4371_v46, %v895_v56  ;;  %v3479_v55 = vld [vmem:[%s5194_s11 + $0x8] sm:$0xff] }
 0x381   :  { %v858_v59 = vsub.f32 1.5, %v857_v52  ;;  %v3486_v52 = vld [vmem:[%s5194_s11 + $0x40] sm:$0xff] }
 0x382   :  { %v3634_v47 = vpop.eup %3633  ;;  %v832_v60 = vadd.f32 1e-05, %v826_v57  ;;  %v4386_v9 = vadd.f32 %v4378_v23, %v904_v58  ;;  %v4469_v57 = vld [vmem:[%s5206_s20 + $0x78] sm:$0xff]  ;;  %v4475_v58 = vld [vmem:[%s5206_s20 + $0x70] sm:$0xff] }
 0x383   :  { %v859_v48 = vmul.f32 %v3632_v43, %v858_v59  ;;  %v865_v62 = vmul.f32 %v3634_v47, %v831_v45  ;;  %vm871_vm11 = vweird.f32 %v3634_v47  ;;  %v3478_v59 = vld [vmem:[%s5194_s11] sm:$0xff] }
 0x384   :  { %3635 = vrsqrt.f32 %v832_v60  ;;  %v918_v63 = vpack.c.bf16 %v4386_v9, %v4383_v61  ;;  %vm872_vm13 = vmor %vm870_vm12, %vm871_vm11  ;;  %vm880_vm15 = vweird.f32 %v832_v60 }
 0x385   :  { %v866_v0 = vmul.f32 %v3634_v47, %v865_v62  ;;  %v863_v6 = vsel %vm4390_vm10, %v3632_v43, %v859_v48  ;;  %v4496_v48 = vld [vmem:[%s5206_s20 + $0x58] sm:$0xff]  ;;  %v4502_v62 = vld [vmem:[%s5206_s20 + $0x50] sm:$0xff] }
 0x386   :  { %1031 = vmatmul.bf16.vlgmr.msrb.gmra.mxu3 %v918_v63  ;;  %1055 = vmatmul.bf16.vlgmr.msrb.gmra.mxu0 %v918_v63  ;;  %v896_v15 = vmul.f32 %v863_v6, %v4248_v13  ;;  %v4508_v63 = vld [vmem:[%s5206_s20 + $0x48] sm:$0xff] }
 0x387   :  { %v867_v4 = vmul.f32 0.5, %v866_v0  ;;  %v821_v5 = vpop.xlane.xlu2 %820  ;;  %v4514_v0 = vld [vmem:[%s5206_s20 + $0x40] sm:$0xff]  ;;  %v4535_v6 = vld [vmem:[%s5206_s20 + $0x28] sm:$0xff] }
 0x388   :  { %v827_v24 = vmul.f32 %v821_v5, %v4235_v1  ;;  %v905_v13 = vmul.f32 %v4371_v46, %v896_v15 }
 0x389   :  { %v868_v10 = vsub.f32 1.5, %v867_v4  ;;  %v937_v4 = vld [vmem:[%s5193_s10] sm:$0x3] }
 0x38a   :  { %v3636_v12 = vpop.eup %3635  ;;  %v833_v14 = vadd.f32 1e-05, %v827_v24  ;;  %v4423_v34 = vadd.f32 %v4378_v23, %v905_v13  ;;  %v940_v7 = vperm.slane %v937_v4, 1  ;;  %v4541_v24 = vld [vmem:[%s5206_s20 + $0x20] sm:$0xff]  ;;  %v939_v15 = vperm.slane %v937_v4, 0 }
 0x38b   :  { %v869_v16 = vmul.f32 %v3634_v47, %v868_v10  ;;  %v875_v18 = vmul.f32 %v3636_v12, %v832_v60  ;;  %vm881_vm14 = vweird.f32 %v3636_v12  ;;  %v4490_v60 = vld [vmem:[%s5206_s20 + $0x60] sm:$0xff] }
 0x38c   :  { %3637 = vrsqrt.f32 %v833_v14  ;;  %vm882_vm1 = vmor %vm880_vm15, %vm881_vm14  ;;  %vm890_vm3 = vweird.f32 %v833_v14 }
 0x38d   :  { %v876_v22 = vmul.f32 %v3636_v12, %v875_v18  ;;  %v873_v21 = vsel %vm872_vm13, %v3634_v47, %v869_v16  ;;  %v4484_v47 = vld [vmem:[%s5206_s20 + $0x68] sm:$0xff] }
 0x38e   :  { %v897_v25 = vmul.f32 %v873_v21, %v4253_v17  ;;  %v4559_v18 = vld [vmem:[%s5206_s20 + $0x8] sm:$0xff]  ;;  %v4565_v21 = vld [vmem:[%s5206_s20] sm:$0xff] }
 0x38f   :  { %v877_v28 = vmul.f32 0.5, %v876_v22 }
 0x390   :  { %v906_v29 = vmul.f32 %v4371_v46, %v897_v25 }
 0x391   :  { %v878_v31 = vsub.f32 1.5, %v877_v28 }
 0x392   :  { %v3638_v32 = vpop.eup %3637  ;;  %v4426_v35 = vadd.f32 %v4378_v23, %v906_v29 }
 0x393   :  { %v879_v17 = vmul.f32 %v3636_v12, %v878_v31  ;;  %v885_v37 = vmul.f32 %v3638_v32, %v833_v14  ;;  %vm891_vm2 = vweird.f32 %v3638_v32 }
 0x394   :  { %v919_v38 = vpack.c.bf16 %v4426_v35, %v4423_v34  ;;  %vm892_vm4 = vmor %vm890_vm3, %vm891_vm2 }
 0x395   :  { %v886_v40 = vmul.f32 %v3638_v32, %v885_v37  ;;  %v883_v41 = vsel %vm882_vm1, %v3636_v12, %v879_v17  ;;  %v4553_v12 = vld [vmem:[%s5206_s20 + $0x10] sm:$0xff] }
 0x396   :  { %1036 = vmatmul.bf16.gmra.mxu3 %v919_v38  ;;  %1060 = vmatmul.bf16.gmra.mxu0 %v919_v38  ;;  %v898_v43 = vmul.f32 %v883_v41, %v4258_v19 }
 0x397   :  { %v887_v20 = vmul.f32 0.5, %v886_v40 }
 0x398   :  { %v907_v50 = vmul.f32 %v4371_v46, %v898_v43 }
 0x399   :  { %v888_v42 = vsub.f32 1.5, %v887_v20 }
 0x39a   :  { %v4441_v54 = vadd.f32 %v4378_v23, %v907_v50 }
 0x39b   :  { %v889_v44 = vmul.f32 %v3638_v32, %v888_v42 }
 0x39d   :  { %v893_v45 = vsel %vm892_vm4, %v3638_v32, %v889_v44 }
 0x39e   :  { %v899_v49 = vmul.f32 %v893_v45, %v4263_v27  ;;  %v3487_v27 = vld [vmem:[%s5194_s11 + $0x48] sm:$0xff] }
 0x39f   :  { %1251 = vmatpush.bf16.msrb.mxu2 %v3487_v27 }
 0x3a0   :  { %v908_v53 = vmul.f32 %v4371_v46, %v899_v49  ;;  %v3481_v46 = vld [vmem:[%s5194_s11 + $0x18] sm:$0xff] }
 0x3a1   :  { %1225 = vmatpush.bf16.msra.mxu1 %v3481_v46 }
 0x3a2   :  { %v4444_v56 = vadd.f32 %v4378_v23, %v908_v53  ;;  %v3480_v23 = vld [vmem:[%s5194_s11 + $0x10] sm:$0xff] }
 0x3a3   :  { %1252 = vmatpush.bf16.msrb.mxu2 %v3486_v52 }
 0x3a4   :  { %v920_v19 = vpack.c.bf16 %v4444_v56, %v4441_v54 }
 0x3a5   :  { %1226 = vmatpush.bf16.msra.mxu1 %v3480_v23 }
 0x3a6   :  { %1041 = vmatmul.bf16.gmra.mxu3 %v920_v19  ;;  %1065 = vmatmul.bf16.gmra.mxu0 %v920_v19 }
 0x3a7   :  { %1669 = vmatpush.msra.mxu2 %v4469_v57 }
 0x3a9   :  { %1227 = vmatpush.bf16.msra.mxu1 %v3479_v55  ;;  %1670 = vmatpush.msra.mxu2 %v4475_v58 }
 0x3ab   :  { %1671 = vmatpush.msra.mxu2 %v4484_v47 }
 0x3ad   :  { %1228 = vmatpush.bf16.msra.mxu1 %v3478_v59  ;;  %1672 = vmatpush.msra.mxu2 %v4490_v60 }
 0x3af   :  { %1673 = vmatpush.msra.mxu2 %v4496_v48 }
 0x3b1   :  { %1674 = vmatpush.msra.mxu2 %v4502_v62 }
 0x3b3   :  { %1675 = vmatpush.msra.mxu2 %v4508_v63 }
 0x3b5   :  { %1676 = vmatpush.msra.mxu2 %v4514_v0 }
 0x3b7   :  { %1677 = vmatpush.msra.mxu2 %v4520_v2 }
 0x3b9   :  { %1678 = vmatpush.msra.mxu2 %v4526_v3 }
 0x3bb   :  { %1679 = vmatpush.msra.mxu2 %v4535_v6 }
 0x3bd   :  { %1680 = vmatpush.msra.mxu2 %v4541_v24 }
 0x3bf   :  { %1681 = vmatpush.msra.mxu2 %v4547_v8 }
 0x3c1   :  { %1682 = vmatpush.msra.mxu2 %v4553_v12 }
 0x3c3   :  { %1683 = vmatpush.msra.mxu2 %v4559_v18 }
 0x3c5   :  { %1684 = vmatpush.msra.mxu2 %v4565_v21 }
 0x403   :  { %v1056_v5 = vpop.f32.mrf.mxu0 }
 0x404   :  { %v1057_v11 = vadd.f32 %v1056_v5, %v940_v7 }
 0x406   :  { %v1072_v33 = vmax.f32 %v1057_v11, 0.0 }
 0x409   :  { %v1032_v10 = vpop.f32.mrf.mxu3 }
 0x40a   :  { %v1033_v26 = vadd.f32 %v1032_v10, %v939_v15 }
 0x40b   :  { %v1058_v14 = vpop.f32.mrf.mxu0 }
 0x40c   :  { %v1059_v16 = vadd.f32 %v1058_v14, %v940_v7  ;;  %v1071_v30 = vmax.f32 %v1033_v26, 0.0 }
 0x40e   :  { %v1074_v22 = vmax.f32 %v1059_v16, 0.0 }
 0x410   :  { %v1084_v25 = vpack.c.bf16 %v1074_v22, %v1072_v33 }
 0x411   :  { %v1034_v13 = vpop.f32.mrf.mxu3 }
 0x412   :  { %v1035_v28 = vadd.f32 %v1034_v13, %v939_v15  ;;  %1253 = vmatmul.bf16.vlgmr.msrb.gmra.mxu2 %v1084_v25 }
 0x413   :  { %v1061_v29 = vpop.f32.mrf.mxu0  ;;  %1839 = vmatpush.msrb.mxu2 %v4469_v57 }
 0x414   :  { %v1073_v31 = vmax.f32 %v1035_v28, 0.0  ;;  %v1062_v37 = vadd.f32 %v1061_v29, %v940_v7 }
 0x415   :  { %1840 = vmatpush.msrb.mxu2 %v4475_v58 }
 0x416   :  { %v1083_v32 = vpack.c.bf16 %v1073_v31, %v1071_v30  ;;  %v1076_v40 = vmax.f32 %v1062_v37, 0.0 }
 0x417   :  { %1841 = vmatpush.msrb.mxu2 %v4484_v47 }
 0x418   :  { %1229 = vmatmul.bf16.vlgmr.msra.gmra.mxu1 %v1083_v32 }
 0x419   :  { %v1037_v17 = vpop.f32.mrf.mxu3  ;;  %1842 = vmatpush.msrb.mxu2 %v4490_v60 }
 0x41a   :  { %v1038_v41 = vadd.f32 %v1037_v17, %v939_v15 }
 0x41b   :  { %v1063_v38 = vpop.f32.mrf.mxu0  ;;  %1843 = vmatpush.msrb.mxu2 %v4496_v48 }
 0x41c   :  { %v1064_v39 = vadd.f32 %v1063_v38, %v940_v7  ;;  %v1075_v45 = vmax.f32 %v1038_v41, 0.0 }
 0x41d   :  { %1844 = vmatpush.msrb.mxu2 %v4502_v62 }
 0x41e   :  { %v1078_v20 = vmax.f32 %v1064_v39, 0.0 }
 0x41f   :  { %1845 = vmatpush.msrb.mxu2 %v4508_v63 }
 0x420   :  { %v1086_v36 = vpack.c.bf16 %v1078_v20, %v1076_v40 }
 0x421   :  { %v1039_v42 = vpop.f32.mrf.mxu3  ;;  %1846 = vmatpush.msrb.mxu2 %v4514_v0 }
 0x422   :  { %v1040_v43 = vadd.f32 %v1039_v42, %v939_v15  ;;  %1258 = vmatmul.bf16.gmra.mxu2 %v1086_v36 }
 0x423   :  { %v1066_v44 = vpop.f32.mrf.mxu0  ;;  %1847 = vmatpush.msrb.mxu2 %v4520_v2 }
 0x424   :  { %v1077_v49 = vmax.f32 %v1040_v43, 0.0  ;;  %v1067_v19 = vadd.f32 %v1066_v44, %v940_v7 }
 0x425   :  { %1848 = vmatpush.msrb.mxu2 %v4526_v3 }
 0x426   :  { %v1085_v50 = vpack.c.bf16 %v1077_v49, %v1075_v45  ;;  %v1080_v46 = vmax.f32 %v1067_v19, 0.0 }
 0x427   :  { %1849 = vmatpush.msrb.mxu2 %v4535_v6 }
 0x428   :  { %1234 = vmatmul.bf16.gmra.mxu1 %v1085_v50 }
 0x429   :  { %v1042_v53 = vpop.f32.mrf.mxu3  ;;  %1850 = vmatpush.msrb.mxu2 %v4541_v24 }
 0x42a   :  { %v1043_v52 = vadd.f32 %v1042_v53, %v939_v15 }
 0x42b   :  { %v1068_v51 = vpop.f32.mrf.mxu0  ;;  %1851 = vmatpush.msrb.mxu2 %v4547_v8 }
 0x42c   :  { %v1069_v27 = vadd.f32 %v1068_v51, %v940_v7  ;;  %v1079_v5 = vmax.f32 %v1043_v52, 0.0  ;;  %v3579_v7 = vld [vmem:[%s5195_s12] ss:$0 sm:$0xff]  ;;  %v3147_v52 = vld [vmem:[%s5186_s3 + $0x174] sm:$0xf0] }
 0x42d   :  { %1852 = vmatpush.msrb.mxu2 %v4553_v12 }
 0x42e   :  { %v1082_v23 = vmax.f32 %v1069_v27, 0.0 }
 0x42f   :  { %1853 = vmatpush.msrb.mxu2 %v4559_v18 }
 0x430   :  { %v1088_v55 = vpack.c.bf16 %v1082_v23, %v1080_v46 }
 0x431   :  { %v1044_v59 = vpop.f32.mrf.mxu3  ;;  %1854 = vmatpush.msrb.mxu2 %v4565_v21 }
 0x432   :  { %v1045_v4 = vadd.f32 %v1044_v59, %v939_v15  ;;  %1263 = vmatmul.bf16.gmra.mxu2 %v1088_v55  ;;  %v3512_v55 = vld [vmem:[%s5186_s3 + $0x154] sm:$0xf] }
 0x434   :  { %v1081_v10 = vmax.f32 %v1045_v4, 0.0 }
 0x436   :  { %v1087_v11 = vpack.c.bf16 %v1081_v10, %v1079_v5  ;;  %v3135_v5 = vld [vmem:[%s5186_s3 + $0x15c] sm:$0xf0] }
 0x438   :  { %1239 = vmatmul.bf16.gmra.mxu1 %v1087_v11  ;;  %v3138_v11 = vor.u32 %v3512_v55, %v3135_v5  ;;  %v3507_v55 = vld [vmem:[%s5186_s3 + $0x128] sm:$0xf0] }
 0x495   :  { %v1230_v14 = vpop.f32.mrf.mxu1  ;;  %v1254_v16 = vpop.f32.mrf.mxu2 }
 0x496   :  { %v1231_v33 = vadd.f32 %v3579_v7, %v1230_v14 }
 0x498   :  { %v1255_v22 = vadd.f32 %v1254_v16, %v1231_v33 }
 0x49a   :  { %v1269_v26 = vadd.f32 %v1255_v22, %v4383_v61 }
 0x49c   :  { %1277 = vadd.xlane.f32.xlu0 %v1269_v26 }
 0x49d   :  { %v1232_v25 = vpop.f32.mrf.mxu1  ;;  %v1256_v13 = vpop.f32.mrf.mxu2 }
 0x49e   :  { %v1233_v28 = vadd.f32 %v3579_v7, %v1232_v25 }
 0x4a0   :  { %v1257_v15 = vadd.f32 %v1256_v13, %v1233_v28 }
 0x4a2   :  { %v1270_v29 = vadd.f32 %v1257_v15, %v4386_v9 }
 0x4a4   :  { %1279 = vadd.xlane.f32.xlu1 %v1270_v29 }
 0x4a5   :  { %v1235_v30 = vpop.f32.mrf.mxu1  ;;  %v1259_v31 = vpop.f32.mrf.mxu2 }
 0x4a6   :  { %v1236_v32 = vadd.f32 %v3579_v7, %v1235_v30 }
 0x4a8   :  { %v1260_v17 = vadd.f32 %v1259_v31, %v1236_v32 }
 0x4aa   :  { %v1271_v37 = vadd.f32 %v1260_v17, %v4423_v34  ;;  %v3145_v17 = vld [vmem:[%s5186_s3 + $0x168] sm:$0xf] }
 0x4ac   :  { %1281 = vadd.xlane.f32.xlu2 %v1271_v37 }
 0x4ad   :  { %v1237_v38 = vpop.f32.mrf.mxu1  ;;  %v1261_v39 = vpop.f32.mrf.mxu2 }
 0x4ae   :  { %v1238_v40 = vadd.f32 %v3579_v7, %v1237_v38  ;;  %v3153_v38 = vld [vmem:[%s5186_s3 + $0x170] sm:$0xf] }
 0x4b0   :  { %v1262_v20 = vadd.f32 %v1261_v39, %v1238_v40  ;;  %v3517_v40 = vld [vmem:[%s5186_s3 + $0x178] sm:$0xf0] }
 0x4b2   :  { %v1272_v61 = vadd.f32 %v1262_v20, %v4426_v35  ;;  %v3154_v20 = vor.u32 %v3517_v40, %v3153_v38  ;;  %v3501_v38 = vld [vmem:[%s5186_s3 + $0xf8] sm:$0xf0]  ;;  %v3502_v40 = vld [vmem:[%s5186_s3 + $0x100] sm:$0xf0] }
 0x4b4   :  { %1283 = vadd.xlane.f32.xlu0 %v1272_v61  ;;  %1636 = vmatpush.bf16.msrb.mxu1 %v3154_v20 }
 0x4b5   :  { %v1240_v41 = vpop.f32.mrf.mxu1  ;;  %v1264_v36 = vpop.f32.mrf.mxu2 }
 0x4b6   :  { %v1241_v42 = vadd.f32 %v3579_v7, %v1240_v41  ;;  %v3513_v41 = vld [vmem:[%s5186_s3 + $0x158] sm:$0xf0] }
 0x4b8   :  { %v1265_v43 = vadd.f32 %v1264_v36, %v1241_v42  ;;  %v3141_v36 = vld [vmem:[%s5186_s3 + $0x158] sm:$0xf] }
 0x4ba   :  { %v1273_v9 = vadd.f32 %v1265_v43, %v4441_v54  ;;  %v3514_v43 = vld [vmem:[%s5186_s3 + $0x160] sm:$0xf0] }
 0x4bc   :  { %1285 = vadd.xlane.f32.xlu1 %v1273_v9 }
 0x4bd   :  { %v1242_v44 = vpop.f32.mrf.mxu1  ;;  %v1266_v49 = vpop.f32.mrf.mxu2 }
 0x4be   :  { %v1243_v45 = vadd.f32 %v3579_v7, %v1242_v44  ;;  %v3509_v44 = vld [vmem:[%s5186_s3 + $0x13c] sm:$0xf] }
 0x4c0   :  { %v1267_v50 = vadd.f32 %v1266_v49, %v1243_v45  ;;  %v3123_v45 = vld [vmem:[%s5186_s3 + $0x144] sm:$0xf0]  ;;  %v3121_v49 = vld [vmem:[%s5186_s3 + $0x138] sm:$0xf] }
 0x4c2   :  { %v1274_v34 = vadd.f32 %v1267_v50, %v4444_v56  ;;  %v3515_v56 = vld [vmem:[%s5186_s3 + $0x16c] sm:$0xf]  ;;  %v3126_v50 = vor.u32 %v3509_v44, %v3123_v45  ;;  %v3081_v44 = vld [vmem:[%s5186_s3 + $0xe0] sm:$0xf] }
 0x4c3   :  { %v3150_v4 = vor.u32 %v3515_v56, %v3147_v52  ;;  %v3109_v56 = vld [vmem:[%s5186_s3 + $0x120] sm:$0xf]  ;;  %v3499_v45 = vld [vmem:[%s5186_s3 + $0xe8] sm:$0xf0] }
 0x4c4   :  { %1287 = vadd.xlane.f32.xlu2 %v1274_v34  ;;  %v3110_v5 = vor.u32 %v3507_v55, %v3109_v56  ;;  %v3069_v56 = vld [vmem:[%s5186_s3 + $0xc8] sm:$0xf] }
 0x4c5   :  { %1612 = vmatpush.bf16.msra.mxu0 %v3150_v4  ;;  %v3508_v4 = vld [vmem:[%s5186_s3 + $0x130] sm:$0xf0] }
 0x4c9   :  { %1613 = vmatpush.bf16.msra.mxu0 %v3138_v11  ;;  %v3503_v11 = vld [vmem:[%s5186_s3 + $0x10c] sm:$0xf] }
 0x4cd   :  { %1614 = vmatpush.bf16.msra.mxu0 %v3126_v50  ;;  %v3082_v50 = vor.u32 %v3499_v45, %v3081_v44 }
 0x50f   :  { %v1278_v53 = vpop.xlane.xlu0 %1277 }
 0x510   :  { %v1289_v19 = vmul.f32 %v1278_v53, %v4235_v1  ;;  %v3129_v53 = vld [vmem:[%s5186_s3 + $0x140] sm:$0xf] }
 0x512   :  { %v4594_v51 = vsub.f32 %v1269_v26, %v1289_v19  ;;  %v3511_v19 = vld [vmem:[%s5186_s3 + $0x148] sm:$0xf0] }
 0x514   :  { %v1301_v35 = vmul.f32 %v4594_v51, %v4594_v51 }
 0x516   :  { %1307 = vadd.xlane.f32.xlu0 %v1301_v35 }
 0x517   :  { %v1280_v27 = vpop.xlane.xlu1 %1279 }
 0x518   :  { %v1290_v54 = vmul.f32 %v1280_v27, %v4235_v1  ;;  %v3130_v27 = vor.u32 %v3511_v19, %v3129_v53  ;;  %v3494_v19 = vld [vmem:[%s5186_s3 + $0xc4] sm:$0xf] }
 0x51a   :  { %v4599_v46 = vsub.f32 %v1270_v29, %v1290_v54  ;;  %v3506_v54 = vld [vmem:[%s5186_s3 + $0x124] sm:$0xf] }
 0x51c   :  { %v1302_v23 = vmul.f32 %v4599_v46, %v4599_v46 }
 0x51e   :  { %1309 = vadd.xlane.f32.xlu1 %v1302_v23  ;;  %v3111_v23 = vld [vmem:[%s5186_s3 + $0x12c] sm:$0xf0] }
 0x51f   :  { %v1282_v59 = vpop.xlane.xlu2 %1281  ;;  %v3114_v52 = vor.u32 %v3506_v54, %v3111_v23  ;;  %v3495_v23 = vld [vmem:[%s5186_s3 + $0xc8] sm:$0xf0] }
 0x520   :  { %v1291_v10 = vmul.f32 %v1282_v59, %v4235_v1  ;;  %v3117_v59 = vld [vmem:[%s5186_s3 + $0x128] sm:$0xf] }
 0x521   :  { %1615 = vmatpush.bf16.msra.mxu0 %v3114_v52  ;;  %v3496_v52 = vld [vmem:[%s5186_s3 + $0xd0] sm:$0xf0] }
 0x522   :  { %v4616_v7 = vsub.f32 %v1271_v37, %v1291_v10  ;;  %v3516_v37 = vld [vmem:[%s5186_s3 + $0x170] sm:$0xf0]  ;;  %v3118_v10 = vor.u32 %v3508_v4, %v3117_v59  ;;  %v3070_v4 = vor.u32 %v3496_v52, %v3069_v56 }
 0x523   :  { %v3146_v39 = vor.u32 %v3516_v37, %v3145_v17  ;;  %v3085_v17 = vld [vmem:[%s5186_s3 + $0xf0] sm:$0xf] }
 0x524   :  { %v1303_v14 = vmul.f32 %v4616_v7, %v4616_v7  ;;  %v3086_v20 = vor.u32 %v3501_v38, %v3085_v17 }
 0x525   :  { %1588 = vmatpush.bf16.msra.mxu3 %v3146_v39  ;;  %v3093_v39 = vld [vmem:[%s5186_s3 + $0xf8] sm:$0xf] }
 0x526   :  { %1311 = vadd.xlane.f32.xlu2 %v1303_v14  ;;  %v3099_v14 = vld [vmem:[%s5186_s3 + $0x114] sm:$0xf0] }
 0x527   :  { %v1284_v16 = vpop.xlane.xlu0 %1283 }
 0x528   :  { %v1292_v33 = vmul.f32 %v1284_v16, %v4235_v1  ;;  %v3097_v16 = vld [vmem:[%s5186_s3 + $0x108] sm:$0xf] }
 0x52a   :  { %v4621_v22 = vsub.f32 %v1272_v61, %v1292_v33  ;;  %v3133_v61 = vld [vmem:[%s5186_s3 + $0x150] sm:$0xf]  ;;  %v3102_v33 = vor.u32 %v3503_v11, %v3099_v14 }
 0x52b   :  { %v3134_v42 = vor.u32 %v3513_v41, %v3133_v61  ;;  %v3094_v61 = vor.u32 %v3502_v40, %v3093_v39  ;;  %v3497_v41 = vld [vmem:[%s5186_s3 + $0xdc] sm:$0xf] }
 0x52c   :  { %v1304_v26 = vmul.f32 %v4621_v22, %v4621_v22  ;;  %1616 = vmatpush.bf16.msra.mxu0 %v3102_v33 }
 0x52d   :  { %1589 = vmatpush.bf16.msra.mxu3 %v3134_v42  ;;  %v3073_v42 = vld [vmem:[%s5186_s3 + $0xd8] sm:$0xf] }
 0x52e   :  { %1313 = vadd.xlane.f32.xlu0 %v1304_v26  ;;  %v3504_v26 = vld [vmem:[%s5186_s3 + $0x110] sm:$0xf0] }
 0x52f   :  { %v1286_v25 = vpop.xlane.xlu1 %1285 }
 0x530   :  { %v1293_v13 = vmul.f32 %v1286_v25, %v4235_v1  ;;  %v3105_v25 = vld [vmem:[%s5186_s3 + $0x110] sm:$0xf] }
 0x532   :  { %v4626_v28 = vsub.f32 %v1273_v9, %v1293_v13  ;;  %v3142_v9 = vor.u32 %v3514_v43, %v3141_v36  ;;  %v3505_v13 = vld [vmem:[%s5186_s3 + $0x118] sm:$0xf0]  ;;  %v3075_v36 = vld [vmem:[%s5186_s3 + $0xe4] sm:$0xf0] }
 0x533   :  { %v3078_v43 = vor.u32 %v3497_v41, %v3075_v36 }
 0x534   :  { %v1305_v15 = vmul.f32 %v4626_v28, %v4626_v28  ;;  %1637 = vmatpush.bf16.msrb.mxu1 %v3142_v9  ;;  %v3498_v9 = vld [vmem:[%s5186_s3 + $0xe0] sm:$0xf0] }
 0x536   :  { %1315 = vadd.xlane.f32.xlu1 %v1305_v15  ;;  %v3098_v15 = vor.u32 %v3504_v26, %v3097_v16 }
 0x537   :  { %v1288_v29 = vpop.xlane.xlu2 %1287 }
 0x538   :  { %v1294_v30 = vmul.f32 %v1288_v29, %v4235_v1  ;;  %1638 = vmatpush.bf16.msrb.mxu1 %v3130_v27  ;;  %v3106_v29 = vor.u32 %v3505_v13, %v3105_v25  ;;  %v3061_v27 = vld [vmem:[%s5186_s3 + $0xc0] sm:$0xf] }
 0x539   :  { %v3062_v59 = vor.u32 %v3495_v23, %v3061_v27 }
 0x53a   :  { %v4631_v31 = vsub.f32 %v1274_v34, %v1294_v30  ;;  %v3510_v34 = vld [vmem:[%s5186_s3 + $0x140] sm:$0xf0]  ;;  %v3500_v30 = vld [vmem:[%s5186_s3 + $0xf4] sm:$0xf] }
 0x53b   :  { %v3122_v35 = vor.u32 %v3510_v34, %v3121_v49  ;;  %v3074_v49 = vor.u32 %v3498_v9, %v3073_v42  ;;  %v4793_v9 = vld [vmem:[%s5196_s13] ss:$0 sm:$0xff] }
 0x53c   :  { %v1306_v32 = vmul.f32 %v4631_v31, %v4631_v31  ;;  %1639 = vmatpush.bf16.msrb.mxu1 %v3118_v10 }
 0x53d   :  { %1590 = vmatpush.bf16.msra.mxu3 %v3122_v35  ;;  %v3063_v35 = vld [vmem:[%s5186_s3 + $0xcc] sm:$0xf0] }
 0x53e   :  { %1317 = vadd.xlane.f32.xlu2 %v1306_v32  ;;  %v3087_v32 = vld [vmem:[%s5186_s3 + $0xfc] sm:$0xf0]  ;;  %v3066_v54 = vor.u32 %v3494_v19, %v3063_v35 }
 0x53f   :  { %v3090_v37 = vor.u32 %v3500_v30, %v3087_v32 }
 0x540   :  { %1640 = vmatpush.bf16.msrb.mxu1 %v3106_v29 }
 0x541   :  { %1591 = vmatpush.bf16.msra.mxu3 %v3110_v5  ;;  %1617 = vmatpush.bf16.msra.mxu0 %v3090_v37  ;;  %v4772_v5 = vld [vmem:[%s5185_s2] sm:$0xff] }
 0x544   :  { %1641 = vmatpush.bf16.msrb.mxu1 %v3094_v61 }
 0x545   :  { %1592 = vmatpush.bf16.msra.mxu3 %v3098_v15  ;;  %1618 = vmatpush.bf16.msra.mxu0 %v3078_v43 }
 0x548   :  { %1642 = vmatpush.bf16.msrb.mxu1 %v3082_v50 }
 0x549   :  { %1593 = vmatpush.bf16.msra.mxu3 %v3086_v20  ;;  %1619 = vmatpush.bf16.msra.mxu0 %v3066_v54 }
 0x54c   :  { %1643 = vmatpush.bf16.msrb.mxu1 %v3070_v4 }
 0x54d   :  { %1594 = vmatpush.bf16.msra.mxu3 %v3074_v49  ;;  %1778 = vmatpush.msrb.mxu0 %v4772_v5 }
 0x550   :  { %1819 = vmatpush.msra.mxu1 %v4772_v5 }
 0x551   :  { %1595 = vmatpush.bf16.msra.mxu3 %v3062_v59 }
 0x555   :  { %1698 = vmatpush.msrb.mxu3 %v4469_v57 }
 0x557   :  { %1699 = vmatpush.msrb.mxu3 %v4475_v58 }
 0x559   :  { %1700 = vmatpush.msrb.mxu3 %v4484_v47 }
 0x55b   :  { %1701 = vmatpush.msrb.mxu3 %v4490_v60 }
 0x55d   :  { %1702 = vmatpush.msrb.mxu3 %v4496_v48 }
 0x55f   :  { %1703 = vmatpush.msrb.mxu3 %v4502_v62 }
 0x561   :  { %1704 = vmatpush.msrb.mxu3 %v4508_v63 }
 0x563   :  { %1705 = vmatpush.msrb.mxu3 %v4514_v0 }
 0x565   :  { %1706 = vmatpush.msrb.mxu3 %v4520_v2 }
 0x567   :  { %1707 = vmatpush.msrb.mxu3 %v4526_v3 }
 0x569   :  { %1708 = vmatpush.msrb.mxu3 %v4535_v6 }
 0x56b   :  { %1709 = vmatpush.msrb.mxu3 %v4541_v24 }
 0x56d   :  { %1710 = vmatpush.msrb.mxu3 %v4547_v8 }
 0x56f   :  { %1711 = vmatpush.msrb.mxu3 %v4553_v12 }
 0x571   :  { %1712 = vmatpush.msrb.mxu3 %v4559_v18 }
 0x573   :  { %1713 = vmatpush.msrb.mxu3 %v4565_v21 }
 0x589   :  { %v1308_v34 = vpop.xlane.xlu0 %1307 }
 0x58a   :  { %v1319_v53 = vmul.f32 %v1308_v34, %v4235_v1 }
 0x58c   :  { %v1325_v55 = vadd.f32 1e-05, %v1319_v53  ;;  %v4802_v53 = vld [vmem:[%s5197_s14] ss:$0 sm:$0xff] }
 0x58e   :  { %3639 = vrsqrt.f32 %v1325_v55  ;;  %vm1337_vm6 = vweird.f32 %v1325_v55 }
 0x591   :  { %v1310_v10 = vpop.xlane.xlu1 %1309 }
 0x592   :  { %v1320_v11 = vmul.f32 %v1310_v10, %v4235_v1 }
 0x594   :  { %v3640_v14 = vpop.eup %3639  ;;  %v1326_v16 = vadd.f32 1e-05, %v1320_v11 }
 0x595   :  { %v1332_v33 = vmul.f32 %v3640_v14, %v1325_v55  ;;  %vm1338_vm5 = vweird.f32 %v3640_v14 }
 0x596   :  { %3641 = vrsqrt.f32 %v1326_v16  ;;  %vm1339_vm7 = vmor %vm1337_vm6, %vm1338_vm5  ;;  %vm1347_vm9 = vweird.f32 %v1326_v16 }
 0x597   :  { %v1333_v26 = vmul.f32 %v3640_v14, %v1332_v33 }
 0x599   :  { %v1334_v25 = vmul.f32 0.5, %v1333_v26  ;;  %v1312_v13 = vpop.xlane.xlu2 %1311 }
 0x59a   :  { %v1321_v15 = vmul.f32 %v1312_v13, %v4235_v1 }
 0x59b   :  { %v1335_v29 = vsub.f32 1.5, %v1334_v25 }
 0x59c   :  { %v3642_v30 = vpop.eup %3641  ;;  %v1327_v32 = vadd.f32 1e-05, %v1321_v15 }
 0x59d   :  { %v1336_v17 = vmul.f32 %v3640_v14, %v1335_v29  ;;  %v1342_v37 = vmul.f32 %v3642_v30, %v1326_v16  ;;  %vm1348_vm8 = vweird.f32 %v3642_v30 }
 0x59e   :  { %3643 = vrsqrt.f32 %v1327_v32  ;;  %vm1349_vm10 = vmor %vm1347_vm9, %vm1348_vm8  ;;  %vm1357_vm12 = vweird.f32 %v1327_v32 }
 0x59f   :  { %v1343_v38 = vmul.f32 %v3642_v30, %v1342_v37  ;;  %v1340_v39 = vsel %vm1339_vm7, %v3640_v14, %v1336_v17 }
 0x5a0   :  { %v1391_v42 = vmul.f32 %v1340_v39, %v4594_v51 }
 0x5a1   :  { %v1344_v40 = vmul.f32 0.5, %v1343_v38  ;;  %v1314_v20 = vpop.xlane.xlu0 %1313 }
 0x5a2   :  { %v1322_v61 = vmul.f32 %v1314_v20, %v4235_v1  ;;  %v1400_v51 = vmul.f32 %v4793_v9, %v1391_v42 }
 0x5a3   :  { %v1345_v41 = vsub.f32 1.5, %v1344_v40 }
 0x5a4   :  { %v3644_v36 = vpop.eup %3643  ;;  %v1328_v43 = vadd.f32 1e-05, %v1322_v61  ;;  %v4809_v52 = vadd.f32 %v4802_v53, %v1400_v51 }
 0x5a5   :  { %v1346_v44 = vmul.f32 %v3642_v30, %v1345_v41  ;;  %v1352_v45 = vmul.f32 %v3644_v36, %v1327_v32  ;;  %vm1358_vm11 = vweird.f32 %v3644_v36 }
 0x5a6   :  { %3645 = vrsqrt.f32 %v1328_v43  ;;  %vm1359_vm13 = vmor %vm1357_vm12, %vm1358_vm11  ;;  %vm1367_vm15 = vweird.f32 %v1328_v43 }
 0x5a7   :  { %v1350_v49 = vsel %vm1349_vm10, %v3642_v30, %v1346_v44  ;;  %v1353_v50 = vmul.f32 %v3644_v36, %v1352_v45 }
 0x5a8   :  { %v1392_v34 = vmul.f32 %v1350_v49, %v4599_v46 }
 0x5a9   :  { %v1354_v19 = vmul.f32 0.5, %v1353_v50  ;;  %v1316_v35 = vpop.xlane.xlu1 %1315 }
 0x5aa   :  { %v1323_v27 = vmul.f32 %v1316_v35, %v4235_v1  ;;  %v1401_v54 = vmul.f32 %v4793_v9, %v1392_v34 }
 0x5ab   :  { %v1355_v23 = vsub.f32 1.5, %v1354_v19 }
 0x5ac   :  { %v3646_v56 = vpop.eup %3645  ;;  %v1329_v46 = vadd.f32 1e-05, %v1323_v27  ;;  %v4812_v55 = vadd.f32 %v4802_v53, %v1401_v54 }
 0x5ad   :  { %v1356_v59 = vmul.f32 %v3644_v36, %v1355_v23  ;;  %v1362_v4 = vmul.f32 %v3646_v56, %v1328_v43  ;;  %vm1368_vm14 = vweird.f32 %v3646_v56 }
 0x5ae   :  { %3647 = vrsqrt.f32 %v1329_v46  ;;  %v1415_v10 = vpack.c.bf16 %v4812_v55, %v4809_v52  ;;  %vm1369_vm1 = vmor %vm1367_vm15, %vm1368_vm14  ;;  %vm1377_vm3 = vweird.f32 %v1329_v46 }
 0x5af   :  { %v1363_v11 = vmul.f32 %v3646_v56, %v1362_v4  ;;  %v1360_v14 = vsel %vm1359_vm13, %v3644_v36, %v1356_v59 }
 0x5b0   :  { %1596 = vmatmul.bf16.vlgmr.msra.gmra.mxu3 %v1415_v10  ;;  %1620 = vmatmul.bf16.vlgmr.msra.gmra.mxu0 %v1415_v10  ;;  %v1393_v15 = vmul.f32 %v1360_v14, %v4616_v7 }
 0x5b1   :  { %v1364_v16 = vmul.f32 0.5, %v1363_v11  ;;  %1644 = vmatmul.bf16.vlgmr.msrb.gmra.mxu1 %v1415_v10  ;;  %v1318_v33 = vpop.xlane.xlu2 %1317  ;;  %1868 = vmatpush.msra.mxu3 %v4469_v57 }
 0x5b2   :  { %v1324_v26 = vmul.f32 %v1318_v33, %v4235_v1  ;;  %1948 = vmatpush.msra.mxu0 %v4772_v5  ;;  %1989 = vmatpush.msrb.mxu1 %v4772_v5  ;;  %v1402_v37 = vmul.f32 %v4793_v9, %v1393_v15 }
 0x5b3   :  { %v1365_v25 = vsub.f32 1.5, %v1364_v16  ;;  %1869 = vmatpush.msra.mxu3 %v4475_v58 }
 0x5b4   :  { %v3648_v13 = vpop.eup %3647  ;;  %v1330_v29 = vadd.f32 1e-05, %v1324_v26 }
 0x5b5   :  { %v1366_v30 = vmul.f32 %v3646_v56, %v1365_v25  ;;  %v1372_v32 = vmul.f32 %v3648_v13, %v1329_v46  ;;  %1870 = vmatpush.msra.mxu3 %v4484_v47  ;;  %v4831_v47 = vadd.f32 %v4802_v53, %v1402_v37  ;;  %vm1378_vm2 = vweird.f32 %v3648_v13 }
 0x5b6   :  { %3649 = vrsqrt.f32 %v1330_v29  ;;  %vm1379_vm4 = vmor %vm1377_vm3, %vm1378_vm2  ;;  %vm1387_vm6 = vweird.f32 %v1330_v29 }
 0x5b7   :  { %v1370_v57 = vsel %vm1369_vm1, %v3646_v56, %v1366_v30  ;;  %v1373_v17 = vmul.f32 %v3648_v13, %v1372_v32  ;;  %1871 = vmatpush.msra.mxu3 %v4490_v60 }
 0x5b8   :  { %v1394_v5 = vmul.f32 %v1370_v57, %v4621_v22 }
 0x5b9   :  { %v1374_v58 = vmul.f32 0.5, %v1373_v17  ;;  %1872 = vmatpush.msra.mxu3 %v4496_v48 }
 0x5ba   :  { %v1403_v7 = vmul.f32 %v4793_v9, %v1394_v5 }
 0x5bb   :  { %v1375_v38 = vsub.f32 1.5, %v1374_v58  ;;  %1873 = vmatpush.msra.mxu3 %v4502_v62 }
 0x5bc   :  { %v3650_v39 = vpop.eup %3649  ;;  %v4834_v40 = vadd.f32 %v4802_v53, %v1403_v7 }
 0x5bd   :  { %v1376_v60 = vmul.f32 %v3648_v13, %v1375_v38  ;;  %v1382_v22 = vmul.f32 %v3650_v39, %v1330_v29  ;;  %1874 = vmatpush.msra.mxu3 %v4508_v63  ;;  %vm1388_vm5 = vweird.f32 %v3650_v39 }
 0x5be   :  { %v1416_v48 = vpack.c.bf16 %v4834_v40, %v4831_v47  ;;  %vm1389_vm7 = vmor %vm1387_vm6, %vm1388_vm5 }
 0x5bf   :  { %v1383_v20 = vmul.f32 %v3650_v39, %v1382_v22  ;;  %1875 = vmatpush.msra.mxu3 %v4514_v0  ;;  %v1380_v62 = vsel %vm1379_vm4, %v3648_v13, %v1376_v60 }
 0x5c0   :  { %1601 = vmatmul.bf16.gmra.mxu3 %v1416_v48  ;;  %1625 = vmatmul.bf16.gmra.mxu0 %v1416_v48  ;;  %v1395_v63 = vmul.f32 %v1380_v62, %v4626_v28 }
 0x5c1   :  { %v1384_v61 = vmul.f32 0.5, %v1383_v20  ;;  %1649 = vmatmul.bf16.gmra.mxu1 %v1416_v48  ;;  %1876 = vmatpush.msra.mxu3 %v4520_v2 }
 0x5c2   :  { %v1404_v43 = vmul.f32 %v4793_v9, %v1395_v63 }
 0x5c3   :  { %v1385_v41 = vsub.f32 1.5, %v1384_v61  ;;  %1877 = vmatpush.msra.mxu3 %v4526_v3 }
 0x5c4   :  { %v4851_v3 = vadd.f32 %v4802_v53, %v1404_v43 }
 0x5c5   :  { %v1386_v36 = vmul.f32 %v3650_v39, %v1385_v41  ;;  %1878 = vmatpush.msra.mxu3 %v4535_v6 }
 0x5c7   :  { %v1390_v0 = vsel %vm1389_vm7, %v3650_v39, %v1386_v36  ;;  %1879 = vmatpush.msra.mxu3 %v4541_v24 }
 0x5c8   :  { %v1396_v42 = vmul.f32 %v1390_v0, %v4631_v31 }
 0x5c9   :  { %1880 = vmatpush.msra.mxu3 %v4547_v8  ;;  %v4863_v8 = vld [vmem:[%s5187_s4 + $0x3] sm:$0x7] }
 0x5ca   :  { %v1405_v2 = vmul.f32 %v4793_v9, %v1396_v42  ;;  %v1455_v31 = vperm.slane %v4863_v8, 1 }
 0x5cb   :  { %1881 = vmatpush.msra.mxu3 %v4553_v12  ;;  %v1454_v12 = vperm.slane %v4863_v8, 0 }
 0x5cc   :  { %v4854_v28 = vadd.f32 %v4802_v53, %v1405_v2 }
 0x5cd   :  { %1882 = vmatpush.msra.mxu3 %v4559_v18 }
 0x5ce   :  { %v1417_v6 = vpack.c.bf16 %v4854_v28, %v4851_v3 }
 0x5cf   :  { %1883 = vmatpush.msra.mxu3 %v4565_v21 }
 0x5d0   :  { %1606 = vmatmul.bf16.gmra.mxu3 %v1417_v6  ;;  %1630 = vmatmul.bf16.gmra.mxu0 %v1417_v6 }
 0x5d1   :  { %1654 = vmatmul.bf16.gmra.mxu1 %v1417_v6 }
 0x62d   :  { %v1621_v24 = vpop.f32.mrf.mxu0 }
 0x62e   :  { %v1622_v45 = vadd.f32 %v1621_v24, %v1455_v31 }
 0x633   :  { %v1597_v9 = vpop.f32.mrf.mxu3 }
 0x634   :  { %v1598_v18 = vadd.f32 %v1597_v9, %v1454_v12 }
 0x635   :  { %v1623_v44 = vpop.f32.mrf.mxu0 }
 0x636   :  { %v1660_v49 = vmul.f32 0.25, %v1598_v18  ;;  %v1624_v53 = vadd.f32 %v1623_v44, %v1455_v31 }
 0x638   :  { %v1666_v50 = vmul.f32 %v1660_v49, %v1622_v45 }
 0x63a   :  { %1685 = vmatmul.f32.vlgmr.msra.gmra.mxu2 %v1666_v50 }
 0x63b   :  { %v1599_v21 = vpop.f32.mrf.mxu3 }
 0x63c   :  { %v1600_v34 = vadd.f32 %v1599_v21, %v1454_v12 }
 0x63d   :  { %v1626_v51 = vpop.f32.mrf.mxu0 }
 0x63e   :  { %v1661_v19 = vmul.f32 0.25, %v1600_v34  ;;  %v1627_v56 = vadd.f32 %v1626_v51, %v1455_v31 }
 0x640   :  { %v1667_v35 = vmul.f32 %v1661_v19, %v1624_v53 }
 0x642   :  { %1688 = vmatmul.f32.gmra.mxu2 %v1667_v35 }
 0x643   :  { %v1602_v27 = vpop.f32.mrf.mxu3 }
 0x644   :  { %v1603_v54 = vadd.f32 %v1602_v27, %v1454_v12 }
 0x645   :  { %v1628_v23 = vpop.f32.mrf.mxu0 }
 0x646   :  { %v1662_v46 = vmul.f32 0.25, %v1603_v54  ;;  %v1629_v59 = vadd.f32 %v1628_v23, %v1455_v31 }
 0x648   :  { %v1695_v4 = vmul.f32 %v1660_v49, %v1629_v59  ;;  %v1668_v10 = vmul.f32 %v1662_v46, %v1627_v56 }
 0x64a   :  { %1691 = vmatmul.f32.gmra.mxu2 %v1668_v10  ;;  %1714 = vmatmul.f32.vlgmr.msrb.gmra.mxu3 %v1695_v4 }
 0x64b   :  { %v1604_v11 = vpop.f32.mrf.mxu3 }
 0x64c   :  { %v1605_v14 = vadd.f32 %v1604_v11, %v1454_v12 }
 0x64d   :  { %v1631_v16 = vpop.f32.mrf.mxu0 }
 0x64e   :  { %v1663_v33 = vmul.f32 0.25, %v1605_v14  ;;  %v1632_v26 = vadd.f32 %v1631_v16, %v1455_v31 }
 0x650   :  { %v1836_v25 = vmul.f32 %v1663_v33, %v1622_v45  ;;  %v1696_v13 = vmul.f32 %v1661_v19, %v1632_v26  ;;  %v1865_v38 = vmul.f32 %v1663_v33, %v1629_v59 }
 0x652   :  { %1717 = vmatmul.f32.gmra.mxu3 %v1696_v13  ;;  %1855 = vmatmul.f32.vlgmr.msrb.gmra.mxu2 %v1836_v25 }
 0x653   :  { %v1607_v15 = vpop.f32.mrf.mxu3 }
 0x654   :  { %v1608_v29 = vadd.f32 %v1607_v15, %v1454_v12 }
 0x655   :  { %v1633_v30 = vpop.f32.mrf.mxu0 }
 0x656   :  { %v1664_v32 = vmul.f32 0.25, %v1608_v29  ;;  %v1634_v57 = vadd.f32 %v1633_v30, %v1455_v31 }
 0x658   :  { %v1697_v17 = vmul.f32 %v1662_v46, %v1634_v57  ;;  %v1837_v5 = vmul.f32 %v1664_v32, %v1624_v53  ;;  %v1866_v60 = vmul.f32 %v1664_v32, %v1632_v26 }
 0x65a   :  { %1720 = vmatmul.f32.gmra.mxu3 %v1697_v17  ;;  %1858 = vmatmul.f32.gmra.mxu2 %v1837_v5 }
 0x65b   :  { %v1609_v37 = vpop.f32.mrf.mxu3 }
 0x65c   :  { %v1610_v58 = vadd.f32 %v1609_v37, %v1454_v12  ;;  %v3524_v37 = vld [vmem:[%s5188_s5 + $0x70] sm:$0xff] }
 0x65e   :  { %v1665_v7 = vmul.f32 0.25, %v1610_v58 }
 0x660   :  { %v1838_v39 = vmul.f32 %v1665_v7, %v1627_v56  ;;  %v1867_v22 = vmul.f32 %v1665_v7, %v1634_v57  ;;  %v3525_v57 = vld [vmem:[%s5188_s5 + $0x78] sm:$0xff] }
 0x661   :  { %2079 = vmatpush.bf16.msra.mxu2 %v3525_v57 }
 0x662   :  { %1861 = vmatmul.f32.gmra.mxu2 %v1838_v39  ;;  %1884 = vmatmul.f32.vlgmr.msra.gmra.mxu3 %v1865_v38 }
 0x665   :  { %2080 = vmatpush.bf16.msra.mxu2 %v3524_v37 }
 0x66a   :  { %1887 = vmatmul.f32.gmra.mxu3 %v1866_v60 }
 0x672   :  { %1890 = vmatmul.f32.gmra.mxu3 %v1867_v22 }
 0x6bd   :  { %v1686_v48 = vpop.f32.mrf.mxu2 }
 0x6c5   :  { %v1689_v20 = vpop.f32.mrf.mxu2 }
 0x6cd   :  { %v1715_v62 = vpop.f32.mrf.mxu3  ;;  %v1692_v2 = vpop.f32.mrf.mxu2 }
 0x6ce   :  { %v1724_v61 = vmax.f32 %v1686_v48, %v1715_v62 }
 0x6d0   :  { %v1727_v41 = vsub.f32 %v1686_v48, %v1724_v61  ;;  %v1736_v63 = vsub.f32 %v1715_v62, %v1724_v61 }
 0x6d2   :  { %v1730_v36 = vmul.f32 1.442695, %v1727_v41  ;;  %v1739_v0 = vmul.f32 1.442695, %v1736_v63  ;;  %v3523_v41 = vld [vmem:[%s5188_s5 + $0x68] sm:$0xff] }
 0x6d3   :  { %2081 = vmatpush.bf16.msra.mxu2 %v3523_v41 }
 0x6d4   :  { %3651 = vpow2.f32 %v1730_v36 }
 0x6d5   :  { %3653 = vpow2.f32 %v1739_v0  ;;  %v1718_v42 = vpop.f32.mrf.mxu3  ;;  %v1856_v34 = vpop.f32.mrf.mxu2 }
 0x6d6   :  { %v1725_v43 = vmax.f32 %v1689_v20, %v1718_v42 }
 0x6d8   :  { %v1728_v6 = vsub.f32 %v1689_v20, %v1725_v43  ;;  %v1737_v24 = vsub.f32 %v1718_v42, %v1725_v43  ;;  %v3522_v42 = vld [vmem:[%s5188_s5 + $0x60] sm:$0xff] }
 0x6d9   :  { %2082 = vmatpush.bf16.msra.mxu2 %v3522_v42 }
 0x6da   :  { %v3652_v12 = vpop.eup %3651  ;;  %v1732_v31 = vmul.f32 1.442695, %v1728_v6  ;;  %v1741_v9 = vmul.f32 1.442695, %v1737_v24 }
 0x6db   :  { %v3654_v18 = vpop.eup %3653 }
 0x6dc   :  { %v1745_v44 = vadd.f32 %v3654_v18, %v3652_v12  ;;  %3655 = vpow2.f32 %v1732_v31 }
 0x6dd   :  { %3657 = vpow2.f32 %v1741_v9  ;;  %v1721_v45 = vpop.f32.mrf.mxu3  ;;  %v1859_v26 = vpop.f32.mrf.mxu2 }
 0x6de   :  { %3659 = vrcp.f32 %v1745_v44  ;;  %v1726_v49 = vmax.f32 %v1692_v2, %v1721_v45 }
 0x6e0   :  { %v1729_v50 = vsub.f32 %v1692_v2, %v1726_v49  ;;  %v1738_v21 = vsub.f32 %v1721_v45, %v1726_v49 }
 0x6e2   :  { %v3656_v51 = vpop.eup %3655  ;;  %v1734_v53 = vmul.f32 1.442695, %v1729_v50  ;;  %v1743_v19 = vmul.f32 1.442695, %v1738_v21 }
 0x6e3   :  { %v3658_v35 = vpop.eup %3657 }
 0x6e4   :  { %v3660_v27 = vpop.eup %3659  ;;  %v1746_v54 = vadd.f32 %v3658_v35, %v3656_v51  ;;  %3661 = vpow2.f32 %v1734_v53 }
 0x6e5   :  { %v1751_v23 = vmul.f32 %v3660_v27, %v3652_v12  ;;  %v1792_v56 = vmul.f32 %v3660_v27, %v3654_v18  ;;  %3663 = vpow2.f32 %v1743_v19  ;;  %v1885_v46 = vpop.f32.mrf.mxu3  ;;  %v1862_v48 = vpop.f32.mrf.mxu2 }
 0x6e6   :  { %3665 = vrcp.f32 %v1746_v54  ;;  %v1894_v59 = vmax.f32 %v1856_v34, %v1885_v46 }
 0x6e7   :  { %3155 = vmatmul.msk.f32.vlgmr.msrb.gmra.mxu0 %vm417_vm0, %v1751_v23  ;;  %3158 = vmatmul.msk.f32.vlgmr.msra.gmra.mxu1 %vm417_vm0, %v1792_v56  ;;  %v3521_v23 = vld [vmem:[%s5188_s5 + $0x58] sm:$0xff]  ;;  %v3520_v56 = vld [vmem:[%s5188_s5 + $0x50] sm:$0xff] }
 0x6e8   :  { %v1897_v4 = vsub.f32 %v1856_v34, %v1894_v59  ;;  %v1906_v10 = vsub.f32 %v1885_v46, %v1894_v59  ;;  %2083 = vmatpush.bf16.msra.mxu2 %v3521_v23  ;;  %v3519_v59 = vld [vmem:[%s5188_s5 + $0x48] sm:$0xff] }
 0x6ea   :  { %v3662_v11 = vpop.eup %3661  ;;  %v1900_v14 = vmul.f32 1.442695, %v1897_v4  ;;  %v1909_v16 = vmul.f32 1.442695, %v1906_v10  ;;  %v3518_v4 = vld [vmem:[%s5188_s5 + $0x40] sm:$0xff] }
 0x6eb   :  { %v3664_v33 = vpop.eup %3663 }
 0x6ec   :  { %v3666_v25 = vpop.eup %3665  ;;  %v1747_v13 = vadd.f32 %v3664_v33, %v3662_v11  ;;  %3667 = vpow2.f32 %v1900_v14  ;;  %2084 = vmatpush.bf16.msra.mxu2 %v3520_v56 }
 0x6ed   :  { %3669 = vpow2.f32 %v1909_v16  ;;  %v1888_v15 = vpop.f32.mrf.mxu3  ;;  %v1752_v29 = vmul.f32 %v3666_v25, %v3656_v51  ;;  %v1793_v30 = vmul.f32 %v3666_v25, %v3658_v35  ;;  %v1645_v35 = vpop.f32.mrf.mxu1 }
 0x6ee   :  { %3671 = vrcp.f32 %v1747_v13  ;;  %v1895_v32 = vmax.f32 %v1859_v26, %v1888_v15 }
 0x6ef   :  { %3156 = vmatmul.msk.f32.gmra.mxu0 %vm417_vm0, %v1752_v29  ;;  %3159 = vmatmul.msk.f32.gmra.mxu1 %vm417_vm0, %v1793_v30 }
 0x6f0   :  { %v1898_v17 = vsub.f32 %v1859_v26, %v1895_v32  ;;  %v1907_v5 = vsub.f32 %v1888_v15, %v1895_v32  ;;  %2085 = vmatpush.bf16.msra.mxu2 %v3519_v59 }
 0x6f2   :  { %v3668_v58 = vpop.eup %3667  ;;  %v1902_v7 = vmul.f32 1.442695, %v1898_v17  ;;  %v1911_v38 = vmul.f32 1.442695, %v1907_v5 }
 0x6f3   :  { %v3670_v39 = vpop.eup %3669 }
 0x6f4   :  { %v3672_v60 = vpop.eup %3671  ;;  %v1915_v22 = vadd.f32 %v3670_v39, %v3668_v58  ;;  %3673 = vpow2.f32 %v1902_v7  ;;  %2086 = vmatpush.bf16.msra.mxu2 %v3518_v4 }
 0x6f5   :  { %3675 = vpow2.f32 %v1911_v38  ;;  %v1891_v20 = vpop.f32.mrf.mxu3  ;;  %v1753_v62 = vmul.f32 %v3672_v60, %v3662_v11  ;;  %v1794_v61 = vmul.f32 %v3672_v60, %v3664_v33  ;;  %v1647_v27 = vpop.f32.mrf.mxu1  ;;  %v1456_v33 = vperm.slane %v4863_v8, 2 }
 0x6f6   :  { %3677 = vrcp.f32 %v1915_v22  ;;  %v1896_v63 = vmax.f32 %v1862_v48, %v1891_v20 }
 0x6f7   :  { %3157 = vmatmul.msk.f32.gmra.mxu0 %vm417_vm0, %v1753_v62  ;;  %3160 = vmatmul.msk.f32.gmra.mxu1 %vm417_vm0, %v1794_v61  ;;  %v1646_v26 = vadd.f32 %v1645_v35, %v1456_v33  ;;  %v1648_v13 = vadd.f32 %v1647_v27, %v1456_v33 }
 0x6f8   :  { %v1899_v36 = vsub.f32 %v1862_v48, %v1896_v63  ;;  %v1908_v0 = vsub.f32 %v1891_v20, %v1896_v63 }
 0x6fa   :  { %v3674_v43 = vpop.eup %3673  ;;  %v1904_v2 = vmul.f32 1.442695, %v1899_v36  ;;  %v1913_v6 = vmul.f32 1.442695, %v1908_v0 }
 0x6fb   :  { %v3676_v24 = vpop.eup %3675 }
 0x6fc   :  { %v3678_v12 = vpop.eup %3677  ;;  %v1916_v31 = vadd.f32 %v3676_v24, %v3674_v43  ;;  %3679 = vpow2.f32 %v1904_v2 }
 0x6fd   :  { %v1921_v9 = vmul.f32 %v3678_v12, %v3668_v58  ;;  %v1962_v18 = vmul.f32 %v3678_v12, %v3670_v39  ;;  %3681 = vpow2.f32 %v1913_v6  ;;  %v1650_v54 = vpop.f32.mrf.mxu1 }
 0x6fe   :  { %3683 = vrcp.f32 %v1916_v31  ;;  %v1651_v60 = vadd.f32 %v1650_v54, %v1456_v33 }
 0x6ff   :  { %3161 = vmatmul.msk.f32.vlgmr.msra.gmra.mxu0 %vm417_vm0, %v1921_v9  ;;  %3164 = vmatmul.msk.f32.vlgmr.msrb.gmra.mxu1 %vm417_vm0, %v1962_v18 }
 0x702   :  { %v3680_v44 = vpop.eup %3679 }
 0x703   :  { %v3682_v45 = vpop.eup %3681 }
 0x704   :  { %v3684_v49 = vpop.eup %3683  ;;  %v1917_v50 = vadd.f32 %v3682_v45, %v3680_v44 }
 0x705   :  { %v1922_v21 = vmul.f32 %v3684_v49, %v3674_v43  ;;  %v1963_v34 = vmul.f32 %v3684_v49, %v3676_v24  ;;  %v1652_v46 = vpop.f32.mrf.mxu1  ;;  %v3582_v49 = vld [vmem:[%s5189_s6 + $0x1] ss:$0 sm:$0xff] }
 0x706   :  { %3685 = vrcp.f32 %v1917_v50  ;;  %v1653_v25 = vadd.f32 %v1652_v46, %v1456_v33 }
 0x707   :  { %3162 = vmatmul.msk.f32.gmra.mxu0 %vm417_vm0, %v1922_v21  ;;  %3165 = vmatmul.msk.f32.gmra.mxu1 %vm417_vm0, %v1963_v34 }
 0x70c   :  { %v3686_v51 = vpop.eup %3685 }
 0x70d   :  { %v1923_v53 = vmul.f32 %v3686_v51, %v3680_v44  ;;  %v1964_v19 = vmul.f32 %v3686_v51, %v3682_v45  ;;  %v1655_v10 = vpop.f32.mrf.mxu1 }
 0x70e   :  { %v1656_v15 = vadd.f32 %v1655_v10, %v1456_v33 }
 0x70f   :  { %3163 = vmatmul.msk.f32.gmra.mxu0 %vm417_vm0, %v1923_v53  ;;  %3166 = vmatmul.msk.f32.gmra.mxu1 %vm417_vm0, %v1964_v19 }
 0x715   :  { %v1657_v11 = vpop.f32.mrf.mxu1 }
 0x716   :  { %v1658_v22 = vadd.f32 %v1657_v11, %v1456_v33 }
 0x764   :  { %v1780_v14 = vpop.f32.mrf.mxu0  ;;  %v1821_v16 = vpop.f32.mrf.mxu1 }
 0x765   :  { %v1789_v29 = vmul.f32 %v1780_v14, %v1646_v26  ;;  %v1830_v30 = vmul.f32 %v1821_v16, %v1653_v25 }
 0x767   :  { %v1833_v37 = vadd.f32 %v1830_v30, %v1789_v29 }
 0x76c   :  { %v1783_v32 = vpop.f32.mrf.mxu0  ;;  %v1824_v57 = vpop.f32.mrf.mxu1 }
 0x76d   :  { %v1790_v17 = vmul.f32 %v1783_v32, %v1648_v13  ;;  %v1831_v5 = vmul.f32 %v1824_v57, %v1656_v15 }
 0x76f   :  { %v1834_v58 = vadd.f32 %v1831_v5, %v1790_v17 }
 0x771   :  { %v2006_v7 = vpack.c.bf16 %v1834_v58, %v1833_v37  ;;  %v3541_v58 = vld [vmem:[%s5192_s9 + $0xf4] sm:$0xf0] }
 0x773   :  { %2087 = vmatmul.bf16.vlgmr.msra.gmra.mxu2 %v2006_v7  ;;  %v3540_v7 = vld [vmem:[%s5192_s9 + $0xf4] sm:$0xf] }
 0x774   :  { %v1786_v38 = vpop.f32.mrf.mxu0  ;;  %v1827_v39 = vpop.f32.mrf.mxu1 }
 0x775   :  { %v1791_v48 = vmul.f32 %v1786_v38, %v1651_v60  ;;  %v1832_v8 = vmul.f32 %v1827_v39, %v1658_v22 }
 0x777   :  { %v1835_v63 = vadd.f32 %v1832_v8, %v1791_v48  ;;  %v3538_v48 = vld [vmem:[%s5192_s9 + $0xe4] sm:$0xf] }
 0x77c   :  { %v1950_v20 = vpop.f32.mrf.mxu0  ;;  %v1991_v62 = vpop.f32.mrf.mxu1 }
 0x77d   :  { %v1959_v61 = vmul.f32 %v1950_v20, %v1646_v26  ;;  %v2000_v41 = vmul.f32 %v1991_v62, %v1653_v25  ;;  %v3287_v20 = vld [vmem:[%s5192_s9 + $0xe8] sm:$0xf0] }
 0x77e   :  { %v3290_v62 = vor.u32 %v3538_v48, %v3287_v20 }
 0x77f   :  { %v2003_v36 = vadd.f32 %v2000_v41, %v1959_v61  ;;  %v3277_v61 = vld [vmem:[%s5192_s9 + $0xd0] sm:$0xf]  ;;  %v3537_v41 = vld [vmem:[%s5192_s9 + $0xd4] sm:$0xf0] }
 0x781   :  { %v2007_v0 = vpack.c.bf16 %v2003_v36, %v1835_v63  ;;  %v3536_v63 = vld [vmem:[%s5192_s9 + $0xd4] sm:$0xf]  ;;  %v3278_v36 = vor.u32 %v3537_v41, %v3277_v61  ;;  %v3557_v41 = vld [vmem:[%s5194_s11 + $0xf8] sm:$0xff] }
 0x782   :  { %2578 = vmatpush.bf16.msrb.mxu2 %v3557_v41 }
 0x783   :  { %2092 = vmatmul.bf16.gmra.mxu2 %v2007_v0  ;;  %v3279_v0 = vld [vmem:[%s5192_s9 + $0xd8] sm:$0xf0] }
 0x784   :  { %v1953_v42 = vpop.f32.mrf.mxu0  ;;  %v1994_v43 = vpop.f32.mrf.mxu1 }
 0x785   :  { %v1960_v2 = vmul.f32 %v1953_v42, %v1648_v13  ;;  %v2001_v6 = vmul.f32 %v1994_v43, %v1656_v15  ;;  %v3282_v42 = vor.u32 %v3536_v63, %v3279_v0  ;;  %v3269_v43 = vld [vmem:[%s5192_s9 + $0xc0] sm:$0xf] }
 0x787   :  { %v2004_v18 = vadd.f32 %v2001_v6, %v1960_v2  ;;  %v3535_v2 = vld [vmem:[%s5192_s9 + $0xc4] sm:$0xf0]  ;;  %v3534_v6 = vld [vmem:[%s5192_s9 + $0xc4] sm:$0xf] }
 0x78c   :  { %v1956_v24 = vpop.f32.mrf.mxu0  ;;  %v1997_v12 = vpop.f32.mrf.mxu1 }
 0x78d   :  { %v1961_v31 = vmul.f32 %v1956_v24, %v1651_v60  ;;  %v2002_v9 = vmul.f32 %v1997_v12, %v1658_v22  ;;  %v3285_v60 = vld [vmem:[%s5192_s9 + $0xe0] sm:$0xf]  ;;  %v3539_v22 = vld [vmem:[%s5192_s9 + $0xe4] sm:$0xf0]  ;;  %v3270_v24 = vor.u32 %v3535_v2, %v3269_v43  ;;  %v3271_v12 = vld [vmem:[%s5192_s9 + $0xc8] sm:$0xf0] }
 0x78e   :  { %v3286_v8 = vor.u32 %v3539_v22, %v3285_v60 }
 0x78f   :  { %v2005_v44 = vadd.f32 %v2002_v9, %v1961_v31  ;;  %v3274_v31 = vor.u32 %v3534_v6, %v3271_v12  ;;  %v3261_v9 = vld [vmem:[%s5192_s9 + $0xb0] sm:$0xf] }
 0x791   :  { %v2008_v45 = vpack.c.bf16 %v2005_v44, %v2004_v18  ;;  %v3533_v18 = vld [vmem:[%s5192_s9 + $0xb4] sm:$0xf0]  ;;  %v3532_v44 = vld [vmem:[%s5192_s9 + $0xb4] sm:$0xf] }
 0x793   :  { %2097 = vmatmul.bf16.gmra.mxu2 %v2008_v45  ;;  %v3262_v45 = vor.u32 %v3533_v18, %v3261_v9 }
 0x7f6   :  { %v2088_v50 = vpop.f32.mrf.mxu2 }
 0x7f7   :  { %v2089_v21 = vadd.f32 %v3582_v49, %v2088_v50 }
 0x7f9   :  { %v2103_v34 = vadd.f32 %v2089_v21, %v4809_v52  ;;  %v3253_v21 = vld [vmem:[%s5192_s9 + $0xa0] sm:$0xf] }
 0x7fb   :  { %2113 = vadd.xlane.f32.xlu0 %v2103_v34 }
 0x7fe   :  { %v2090_v51 = vpop.f32.mrf.mxu2 }
 0x7ff   :  { %v2091_v53 = vadd.f32 %v3582_v49, %v2090_v51  ;;  %v3530_v51 = vld [vmem:[%s5192_s9 + $0xa4] sm:$0xf] }
 0x801   :  { %v2104_v19 = vadd.f32 %v2091_v53, %v4812_v55 }
 0x803   :  { %2115 = vadd.xlane.f32.xlu1 %v2104_v19 }
 0x806   :  { %v2093_v35 = vpop.f32.mrf.mxu2 }
 0x807   :  { %v2094_v27 = vadd.f32 %v3582_v49, %v2093_v35 }
 0x809   :  { %v2105_v54 = vadd.f32 %v2094_v27, %v4831_v47  ;;  %v3245_v27 = vld [vmem:[%s5192_s9 + $0x90] sm:$0xf] }
 0x80b   :  { %2117 = vadd.xlane.f32.xlu2 %v2105_v54 }
 0x80e   :  { %v2095_v23 = vpop.f32.mrf.mxu2 }
 0x80f   :  { %v2096_v56 = vadd.f32 %v3582_v49, %v2095_v23  ;;  %v3528_v23 = vld [vmem:[%s5192_s9 + $0x94] sm:$0xf] }
 0x811   :  { %v2106_v46 = vadd.f32 %v2096_v56, %v4834_v40 }
 0x813   :  { %2119 = vadd.xlane.f32.xlu0 %v2106_v46 }
 0x816   :  { %v2098_v47 = vpop.f32.mrf.mxu2 }
 0x817   :  { %v2099_v33 = vadd.f32 %v3582_v49, %v2098_v47  ;;  %v3526_v47 = vld [vmem:[%s5192_s9 + $0x84] sm:$0xf] }
 0x819   :  { %v4927_v15 = vadd.f32 %v2099_v33, %v4851_v3  ;;  %v3293_v3 = vld [vmem:[%s5192_s9 + $0xf0] sm:$0xf] }
 0x81a   :  { %v3294_v38 = vor.u32 %v3541_v58, %v3293_v3 }
 0x81c   :  { %2358 = vmatpush.bf16.msrb.mxu0 %v3294_v38 }
 0x81e   :  { %v2100_v29 = vpop.f32.mrf.mxu2 }
 0x81f   :  { %v2101_v32 = vadd.f32 %v3582_v49, %v2100_v29  ;;  %v3263_v49 = vld [vmem:[%s5192_s9 + $0xb8] sm:$0xf0] }
 0x820   :  { %2359 = vmatpush.bf16.msrb.mxu0 %v3286_v8  ;;  %v3266_v50 = vor.u32 %v3532_v44, %v3263_v49 }
 0x821   :  { %v4936_v37 = vadd.f32 %v2101_v32, %v4854_v28  ;;  %v3295_v28 = vld [vmem:[%s5192_s9 + $0xf8] sm:$0xf0] }
 0x822   :  { %v3298_v39 = vor.u32 %v3540_v7, %v3295_v28 }
 0x824   :  { %2382 = vmatpush.bf16.msra.mxu1 %v3298_v39  ;;  %2360 = vmatpush.bf16.msrb.mxu0 %v3278_v36 }
 0x828   :  { %2383 = vmatpush.bf16.msra.mxu1 %v3290_v62  ;;  %2361 = vmatpush.bf16.msrb.mxu0 %v3270_v24  ;;  %v5052_v24 = vld [vmem:[%s5190_s7 + $0x1] ss:$0 sm:$0xff] }
 0x82c   :  { %2384 = vmatpush.bf16.msra.mxu1 %v3282_v42  ;;  %2362 = vmatpush.bf16.msrb.mxu0 %v3262_v45 }
 0x830   :  { %2385 = vmatpush.bf16.msra.mxu1 %v3274_v31 }
 0x834   :  { %2386 = vmatpush.bf16.msra.mxu1 %v3266_v50 }
 0x86e   :  { %v2114_v59 = vpop.xlane.xlu0 %2113 }
 0x86f   :  { %v2125_v4 = vmul.f32 %v2114_v59, %v4235_v1 }
 0x871   :  { %v4912_v52 = vsub.f32 %v2103_v34, %v2125_v4  ;;  %v3531_v34 = vld [vmem:[%s5192_s9 + $0xa4] sm:$0xf0] }
 0x872   :  { %v3254_v53 = vor.u32 %v3531_v34, %v3253_v21  ;;  %v5063_v21 = vld [vmem:[%s5191_s8 + $0x1] ss:$0 sm:$0xff] }
 0x873   :  { %v2137_v10 = vmul.f32 %v4912_v52, %v4912_v52 }
 0x874   :  { %2363 = vmatpush.bf16.msrb.mxu0 %v3254_v53 }
 0x875   :  { %2143 = vadd.xlane.f32.xlu1 %v2137_v10 }
 0x876   :  { %v2116_v55 = vpop.xlane.xlu1 %2115 }
 0x877   :  { %v2126_v11 = vmul.f32 %v2116_v55, %v4235_v1  ;;  %v3237_v55 = vld [vmem:[%s5192_s9 + $0x80] sm:$0xf] }
 0x879   :  { %v4917_v14 = vsub.f32 %v2104_v19, %v2126_v11  ;;  %v3255_v19 = vld [vmem:[%s5192_s9 + $0xa8] sm:$0xf0]  ;;  %v3527_v11 = vld [vmem:[%s5192_s9 + $0x84] sm:$0xf0] }
 0x87a   :  { %v3258_v35 = vor.u32 %v3530_v51, %v3255_v19 }
 0x87b   :  { %v2138_v16 = vmul.f32 %v4917_v14, %v4917_v14 }
 0x87c   :  { %2387 = vmatpush.bf16.msra.mxu1 %v3258_v35 }
 0x87d   :  { %2145 = vadd.xlane.f32.xlu2 %v2138_v16  ;;  %v3238_v16 = vor.u32 %v3527_v11, %v3237_v55 }
 0x87e   :  { %v2118_v40 = vpop.xlane.xlu2 %2117 }
 0x87f   :  { %v2127_v26 = vmul.f32 %v2118_v40, %v4235_v1  ;;  %v3239_v40 = vld [vmem:[%s5192_s9 + $0x88] sm:$0xf0] }
 0x881   :  { %v4922_v25 = vsub.f32 %v2105_v54, %v2127_v26  ;;  %v3529_v54 = vld [vmem:[%s5192_s9 + $0x94] sm:$0xf0]  ;;  %v3242_v26 = vor.u32 %v3526_v47, %v3239_v40 }
 0x882   :  { %v3246_v56 = vor.u32 %v3529_v54, %v3245_v27 }
 0x883   :  { %v2139_v13 = vmul.f32 %v4922_v25, %v4922_v25 }
 0x884   :  { %2364 = vmatpush.bf16.msrb.mxu0 %v3246_v56 }
 0x885   :  { %2147 = vadd.xlane.f32.xlu0 %v2139_v13  ;;  %2121 = vadd.xlane.f32.xlu2 %v4927_v15 }
 0x886   :  { %v2120_v30 = vpop.xlane.xlu0 %2119 }
 0x887   :  { %v2128_v57 = vmul.f32 %v2120_v30, %v4235_v1 }
 0x888   :  { %2365 = vmatpush.bf16.msrb.mxu0 %v3238_v16 }
 0x889   :  { %v4931_v17 = vsub.f32 %v2106_v46, %v2128_v57  ;;  %v3247_v46 = vld [vmem:[%s5192_s9 + $0x98] sm:$0xf0] }
 0x88a   :  { %v3250_v59 = vor.u32 %v3528_v23, %v3247_v46 }
 0x88b   :  { %v2140_v5 = vmul.f32 %v4931_v17, %v4931_v17 }
 0x88c   :  { %2388 = vmatpush.bf16.msra.mxu1 %v3250_v59 }
 0x88d   :  { %2149 = vadd.xlane.f32.xlu1 %v2140_v5  ;;  %2123 = vadd.xlane.f32.xlu0 %v4936_v37 }
 0x890   :  { %2389 = vmatpush.bf16.msra.mxu1 %v3242_v26 }
 0x8e8   :  { %v2144_v4 = vpop.xlane.xlu1 %2143 }
 0x8e9   :  { %v2155_v10 = vmul.f32 %v2144_v4, %v4235_v1 }
 0x8eb   :  { %v2161_v33 = vadd.f32 1e-05, %v2155_v10 }
 0x8ed   :  { %3687 = vrsqrt.f32 %v2161_v33  ;;  %vm2173_vm8 = vweird.f32 %v2161_v33 }
 0x8f0   :  { %v2146_v13 = vpop.xlane.xlu2 %2145 }
 0x8f1   :  { %v2156_v29 = vmul.f32 %v2146_v13, %v4235_v1 }
 0x8f3   :  { %v3688_v30 = vpop.eup %3687  ;;  %v2162_v32 = vadd.f32 1e-05, %v2156_v29  ;;  %v3548_v29 = vld [vmem:[%s5194_s11 + $0xb0] sm:$0xff] }
 0x8f4   :  { %v2168_v57 = vmul.f32 %v3688_v30, %v2161_v33  ;;  %vm2174_vm0 = vweird.f32 %v3688_v30 }
 0x8f5   :  { %3689 = vrsqrt.f32 %v2162_v32  ;;  %vm2175_vm9 = vmor %vm2173_vm8, %vm2174_vm0  ;;  %vm2183_vm11 = vweird.f32 %v2162_v32 }
 0x8f6   :  { %v2169_v5 = vmul.f32 %v3688_v30, %v2168_v57  ;;  %v3554_v57 = vld [vmem:[%s5194_s11 + $0xe0] sm:$0xff] }
 0x8f8   :  { %v2170_v3 = vmul.f32 0.5, %v2169_v5  ;;  %v2148_v58 = vpop.xlane.xlu0 %2147  ;;  %v2122_v7 = vpop.xlane.xlu2 %2121  ;;  %v3546_v5 = vld [vmem:[%s5194_s11 + $0xa0] sm:$0xff] }
 0x8f9   :  { %v2157_v38 = vmul.f32 %v2148_v58, %v4235_v1  ;;  %v2129_v28 = vmul.f32 %v2122_v7, %v4235_v1  ;;  %v3545_v58 = vld [vmem:[%s5194_s11 + $0x98] sm:$0xff]  ;;  %v3552_v7 = vld [vmem:[%s5194_s11 + $0xd0] sm:$0xff] }
 0x8fa   :  { %v2171_v39 = vsub.f32 1.5, %v2170_v3  ;;  %v3553_v3 = vld [vmem:[%s5194_s11 + $0xd8] sm:$0xff] }
 0x8fb   :  { %v3690_v60 = vpop.eup %3689  ;;  %v2163_v22 = vadd.f32 1e-05, %v2157_v38  ;;  %v5040_v48 = vsub.f32 %v4927_v15, %v2129_v28  ;;  %v3544_v38 = vld [vmem:[%s5194_s11 + $0x90] sm:$0xff]  ;;  %v3551_v28 = vld [vmem:[%s5194_s11 + $0xc8] sm:$0xff] }
 0x8fc   :  { %v2172_v8 = vmul.f32 %v3688_v30, %v2171_v39  ;;  %v2178_v20 = vmul.f32 %v3690_v60, %v2162_v32  ;;  %vm2184_vm10 = vweird.f32 %v3690_v60  ;;  %v3547_v32 = vld [vmem:[%s5194_s11 + $0xa8] sm:$0xff] }
 0x8fd   :  { %3691 = vrsqrt.f32 %v2163_v22  ;;  %v2141_v62 = vmul.f32 %v5040_v48, %v5040_v48  ;;  %vm2185_vm12 = vmor %vm2183_vm11, %vm2184_vm10  ;;  %vm2193_vm14 = vweird.f32 %v2163_v22 }
 0x8fe   :  { %v2179_v61 = vmul.f32 %v3690_v60, %v2178_v20  ;;  %v2176_v63 = vsel %vm2175_vm9, %v3688_v30, %v2172_v8  ;;  %v3555_v30 = vld [vmem:[%s5194_s11 + $0xe8] sm:$0xff]  ;;  %v3550_v20 = vld [vmem:[%s5194_s11 + $0xc0] sm:$0xff] }
 0x8ff   :  { %2151 = vadd.xlane.f32.xlu1 %v2141_v62  ;;  %v2227_v12 = vmul.f32 %v2176_v63, %v4912_v52  ;;  %v3542_v62 = vld [vmem:[%s5194_s11 + $0x80] sm:$0xff] }
 0x900   :  { %v2180_v36 = vmul.f32 0.5, %v2179_v61  ;;  %v2150_v0 = vpop.xlane.xlu1 %2149  ;;  %v2124_v15 = vpop.xlane.xlu0 %2123 }
 0x901   :  { %v2158_v42 = vmul.f32 %v2150_v0, %v4235_v1  ;;  %v2130_v43 = vmul.f32 %v2124_v15, %v4235_v1  ;;  %v2236_v52 = vmul.f32 %v5052_v24, %v2227_v12 }
 0x902   :  { %v2181_v2 = vsub.f32 1.5, %v2180_v36 }
 0x903   :  { %v3692_v6 = vpop.eup %3691  ;;  %v2164_v31 = vadd.f32 1e-05, %v2158_v42  ;;  %v5056_v9 = vsub.f32 %v4936_v37, %v2130_v43  ;;  %v5069_v35 = vadd.f32 %v5063_v21, %v2236_v52 }
 0x904   :  { %v2182_v18 = vmul.f32 %v3690_v60, %v2181_v2  ;;  %v2188_v44 = vmul.f32 %v3692_v6, %v2163_v22  ;;  %vm2194_vm13 = vweird.f32 %v3692_v6 }
 0x905   :  { %3693 = vrsqrt.f32 %v2164_v31  ;;  %v2142_v45 = vmul.f32 %v5056_v9, %v5056_v9  ;;  %vm2195_vm15 = vmor %vm2193_vm14, %vm2194_vm13  ;;  %vm2203_vm2 = vweird.f32 %v2164_v31 }
 0x906   :  { %v2186_v49 = vsel %vm2185_vm12, %v3690_v60, %v2182_v18  ;;  %v2189_v50 = vmul.f32 %v3692_v6, %v2188_v44  ;;  %v3543_v60 = vld [vmem:[%s5194_s11 + $0x88] sm:$0xff] }
 0x907   :  { %v2228_v37 = vmul.f32 %v2186_v49, %v4917_v14  ;;  %2153 = vadd.xlane.f32.xlu2 %v2142_v45  ;;  %v3234_v45 = vld [vmem:[%s5193_s10 + $0x2] sm:$0x3]  ;;  %s2749_s10 = sshll.u32 %s5200_s17, 4  ;;  %s2750_s10 = int_to_ptr.hbm [resolvable:$true] %s2749_s10 }
 0x908   :  { %v2190_v34 = vmul.f32 0.5, %v2189_v50 }
 0x909   :  { %v2237_v51 = vmul.f32 %v5052_v24, %v2228_v37 }
 0x90a   :  { %v2191_v53 = vsub.f32 1.5, %v2190_v34 }
 0x90b   :  { %v3694_v19 = vpop.eup %3693  ;;  %v2246_v27 = vadd.f32 %v5063_v21, %v2237_v51  ;;  %v2274_v51 = vperm.slane %v3234_v45, 0 }
 0x90c   :  { %v2192_v54 = vmul.f32 %v3692_v6, %v2191_v53  ;;  %v2198_v23 = vmul.f32 %v3694_v19, %v2164_v31  ;;  %vm2204_vm1 = vweird.f32 %v3694_v19  ;;  %v2275_v53 = vperm.slane %v3234_v45, 1 }
 0x90d   :  { %v2251_v56 = vpack.c.bf16 %v2246_v27, %v5069_v35  ;;  %vm2205_vm3 = vmor %vm2203_vm2, %vm2204_vm1 }
 0x90e   :  { %v2199_v46 = vmul.f32 %v3694_v19, %v2198_v23  ;;  %v2196_v14 = vsel %vm2195_vm15, %v3692_v6, %v2192_v54  ;;  %vm2657_vm15 = vcmask 1040384  }
 0x90f   :  { %2366 = vmatmul.bf16.vlgmr.msrb.gmra.mxu0 %v2251_v56  ;;  %2390 = vmatmul.bf16.vlgmr.msra.gmra.mxu1 %v2251_v56  ;;  %v2229_v10 = vmul.f32 %v2196_v14, %v4922_v25  ;;  %v3549_v25 = vld [vmem:[%s5194_s11 + $0xb8] sm:$0xff] }
 0x910   :  { %v2200_v59 = vmul.f32 0.5, %v2199_v46  ;;  %2558 = vmatpush.bf16.msrb.mxu3 %v3549_v25 }
 0x911   :  { %v2238_v16 = vmul.f32 %v5052_v24, %v2229_v10 }
 0x912   :  { %v2201_v4 = vsub.f32 1.5, %v2200_v59 }
 0x913   :  { %v2247_v33 = vadd.f32 %v5063_v21, %v2238_v16 }
 0x914   :  { %v2202_v55 = vmul.f32 %v3694_v19, %v2201_v4  ;;  %2559 = vmatpush.bf16.msrb.mxu3 %v3548_v29 }
 0x916   :  { %v2206_v11 = vsel %vm2205_vm3, %v3694_v19, %v2202_v55 }
 0x917   :  { %v2230_v47 = vmul.f32 %v2206_v11, %v4931_v17  ;;  %v3556_v17 = vld [vmem:[%s5194_s11 + $0xf0] sm:$0xff] }
 0x918   :  { %2579 = vmatpush.bf16.msrb.mxu2 %v3556_v17  ;;  %2560 = vmatpush.bf16.msrb.mxu3 %v3547_v32 }
 0x919   :  { %v2239_v40 = vmul.f32 %v5052_v24, %v2230_v47 }
 0x91b   :  { %v5079_v26 = vadd.f32 %v5063_v21, %v2239_v40 }
 0x91c   :  { %2580 = vmatpush.bf16.msrb.mxu2 %v3555_v30  ;;  %2561 = vmatpush.bf16.msrb.mxu3 %v3546_v5 }
 0x91d   :  { %v2252_v13 = vpack.c.bf16 %v5079_v26, %v2247_v33 }
 0x91f   :  { %2371 = vmatmul.bf16.gmra.mxu0 %v2252_v13  ;;  %2395 = vmatmul.bf16.gmra.mxu1 %v2252_v13 }
 0x920   :  { %2581 = vmatpush.bf16.msrb.mxu2 %v3554_v57  ;;  %2562 = vmatpush.bf16.msrb.mxu3 %v3545_v58 }
 0x924   :  { %2582 = vmatpush.bf16.msrb.mxu2 %v3553_v3  ;;  %2563 = vmatpush.bf16.msrb.mxu3 %v3544_v38 }
 0x928   :  { %2583 = vmatpush.bf16.msrb.mxu2 %v3552_v7  ;;  %2564 = vmatpush.bf16.msrb.mxu3 %v3543_v60 }
 0x92c   :  { %2584 = vmatpush.bf16.msrb.mxu2 %v3551_v28  ;;  %2565 = vmatpush.bf16.msrb.mxu3 %v3542_v62 }
 0x930   :  { %2585 = vmatpush.bf16.msrb.mxu2 %v3550_v20 }
 0x972   :  { %v2152_v39 = vpop.xlane.xlu1 %2151 }
 0x973   :  { %v2159_v22 = vmul.f32 %v2152_v39, %v4235_v1 }
 0x975   :  { %v2165_v8 = vadd.f32 1e-05, %v2159_v22  ;;  %v3585_v22 = vld [vmem:[%s5195_s12 + $0x1] ss:$0 sm:$0xff] }
 0x977   :  { %3695 = vrsqrt.f32 %v2165_v8  ;;  %vm2213_vm5 = vweird.f32 %v2165_v8 }
 0x97a   :  { %v2154_v61 = vpop.xlane.xlu2 %2153 }
 0x97b   :  { %v2160_v41 = vmul.f32 %v2154_v61, %v4235_v1 }
 0x97d   :  { %v3696_v63 = vpop.eup %3695  ;;  %v2166_v36 = vadd.f32 1e-05, %v2160_v41 }
 0x97e   :  { %v2208_v0 = vmul.f32 %v3696_v63, %v2165_v8  ;;  %vm2214_vm4 = vweird.f32 %v3696_v63 }
 0x97f   :  { %3697 = vrsqrt.f32 %v2166_v36  ;;  %vm2215_vm6 = vmor %vm2213_vm5, %vm2214_vm4  ;;  %vm2223_vm0 = vweird.f32 %v2166_v36 }
 0x980   :  { %v2209_v15 = vmul.f32 %v3696_v63, %v2208_v0 }
 0x982   :  { %v2210_v42 = vmul.f32 0.5, %v2209_v15 }
 0x984   :  { %v2211_v43 = vsub.f32 1.5, %v2210_v42 }
 0x985   :  { %v3698_v2 = vpop.eup %3697 }
 0x986   :  { %v2212_v6 = vmul.f32 %v3696_v63, %v2211_v43  ;;  %v2218_v12 = vmul.f32 %v3698_v2, %v2166_v36  ;;  %vm2224_vm7 = vweird.f32 %v3698_v2 }
 0x987   :  { %vm2225_vm8 = vmor %vm2223_vm0, %vm2224_vm7 }
 0x988   :  { %v2219_v31 = vmul.f32 %v3698_v2, %v2218_v12  ;;  %v2216_v18 = vsel %vm2215_vm6, %v3696_v63, %v2212_v6 }
 0x989   :  { %v2231_v37 = vmul.f32 %v2216_v18, %v5040_v48 }
 0x98a   :  { %v2220_v44 = vmul.f32 0.5, %v2219_v31 }
 0x98b   :  { %v2240_v54 = vmul.f32 %v5052_v24, %v2231_v37 }
 0x98c   :  { %v2221_v49 = vsub.f32 1.5, %v2220_v44  ;;  %v2367_v50 = vpop.f32.mrf.mxu0  ;;  %v2391_v52 = vpop.f32.mrf.mxu1 }
 0x98d   :  { %v2368_v23 = vadd.f32 %v2367_v50, %v2274_v51  ;;  %v2392_v56 = vadd.f32 %v2391_v52, %v2275_v53  ;;  %v2249_v48 = vadd.f32 %v5063_v21, %v2240_v54 }
 0x98e   :  { %v2222_v34 = vmul.f32 %v3698_v2, %v2221_v49 }
 0x98f   :  { %v2406_v11 = vmax.f32 %v2368_v23, 0.0  ;;  %v2407_v47 = vmax.f32 %v2392_v56, 0.0 }
 0x990   :  { %v2226_v19 = vsel %vm2225_vm8, %v3698_v2, %v2222_v34 }
 0x991   :  { %v2232_v27 = vmul.f32 %v2226_v19, %v5056_v9 }
 0x993   :  { %v2241_v46 = vmul.f32 %v5052_v24, %v2232_v27 }
 0x994   :  { %v2369_v14 = vpop.f32.mrf.mxu0  ;;  %v2393_v59 = vpop.f32.mrf.mxu1 }
 0x995   :  { %v2370_v4 = vadd.f32 %v2369_v14, %v2274_v51  ;;  %v2394_v10 = vadd.f32 %v2393_v59, %v2275_v53  ;;  %v2250_v55 = vadd.f32 %v5063_v21, %v2241_v46 }
 0x997   :  { %v2408_v16 = vmax.f32 %v2370_v4, 0.0  ;;  %v2409_v40 = vmax.f32 %v2394_v10, 0.0  ;;  %v2253_v33 = vpack.c.bf16 %v2250_v55, %v2249_v48 }
 0x999   :  { %v2418_v9 = vpack.c.bf16 %v2408_v16, %v2406_v11  ;;  %v2419_v13 = vpack.c.bf16 %v2409_v40, %v2407_v47  ;;  %2376 = vmatmul.bf16.gmra.mxu0 %v2253_v33  ;;  %2400 = vmatmul.bf16.gmra.mxu1 %v2253_v33  ;;  %v3564_v11 = vld [vmem:[%s5198_s15 + $0x30] sm:$0xff]  ;;  %v3563_v47 = vld [vmem:[%s5198_s15 + $0x28] sm:$0xff]  ;;  %v3562_v33 = vld [vmem:[%s5198_s15 + $0x20] sm:$0xff] }
 0x99b   :  { %2566 = vmatmul.bf16.vlgmr.msrb.gmra.mxu3 %v2418_v9  ;;  %2586 = vmatmul.bf16.vlgmr.msrb.gmra.mxu2 %v2419_v13  ;;  %v3561_v13 = vld [vmem:[%s5198_s15 + $0x18] sm:$0xff] }
 0x99c   :  { %v2372_v24 = vpop.f32.mrf.mxu0  ;;  %v2396_v25 = vpop.f32.mrf.mxu1 }
 0x99d   :  { %v2373_v17 = vadd.f32 %v2372_v24, %v2274_v51  ;;  %v2397_v29 = vadd.f32 %v2396_v25, %v2275_v53  ;;  %v3560_v24 = vld [vmem:[%s5198_s15 + $0x10] sm:$0xff]  ;;  %v3559_v25 = vld [vmem:[%s5198_s15 + $0x8] sm:$0xff] }
 0x99f   :  { %v2410_v21 = vmax.f32 %v2373_v17, 0.0  ;;  %v2411_v3 = vmax.f32 %v2397_v29, 0.0  ;;  %v3558_v29 = vld [vmem:[%s5198_s15] sm:$0xff] }
 0x9a4   :  { %v2374_v30 = vpop.f32.mrf.mxu0  ;;  %v2398_v32 = vpop.f32.mrf.mxu1 }
 0x9a5   :  { %v2375_v57 = vadd.f32 %v2374_v30, %v2274_v51  ;;  %v2399_v5 = vadd.f32 %v2398_v32, %v2275_v53 }
 0x9a7   :  { %v2412_v58 = vmax.f32 %v2375_v57, 0.0  ;;  %v2413_v7 = vmax.f32 %v2399_v5, 0.0 }
 0x9a9   :  { %v2420_v38 = vpack.c.bf16 %v2412_v58, %v2410_v21  ;;  %v2421_v28 = vpack.c.bf16 %v2413_v7, %v2411_v3 }
 0x9ab   :  { %2570 = vmatmul.bf16.gmra.mxu3 %v2420_v38  ;;  %2590 = vmatmul.bf16.gmra.mxu2 %v2421_v28 }
 0xa16   :  { %v2377_v39 = vpop.f32.mrf.mxu0  ;;  %v2401_v60 = vpop.f32.mrf.mxu1 }
 0xa17   :  { %v2378_v8 = vadd.f32 %v2377_v39, %v2274_v51  ;;  %v2402_v20 = vadd.f32 %v2401_v60, %v2275_v53 }
 0xa19   :  { %v2414_v42 = vmax.f32 %v2378_v8, 0.0  ;;  %v2415_v43 = vmax.f32 %v2402_v20, 0.0 }
 0xa1e   :  { %v2379_v62 = vpop.f32.mrf.mxu0  ;;  %v2403_v61 = vpop.f32.mrf.mxu1 }
 0xa1f   :  { %v2380_v41 = vadd.f32 %v2379_v62, %v2274_v51  ;;  %v2404_v63 = vadd.f32 %v2403_v61, %v2275_v53  ;;  %v2567_v36 = vpop.f32.mrf.mxu3  ;;  %v2587_v0 = vpop.f32.mrf.mxu2 }
 0xa20   :  { %v2568_v15 = vadd.f32 %v3585_v22, %v2567_v36 }
 0xa21   :  { %v2416_v2 = vmax.f32 %v2380_v41, 0.0  ;;  %v2417_v6 = vmax.f32 %v2404_v63, 0.0  ;;  %v3587_v63 = vld [vmem:[%s5197_s14 + $0x1] ss:$0 sm:$0xff] }
 0xa22   :  { %v2588_v12 = vadd.f32 %v2587_v0, %v2568_v15 }
 0xa23   :  { %v2422_v31 = vpack.c.bf16 %v2416_v2, %v2414_v42  ;;  %v2423_v18 = vpack.c.bf16 %v2417_v6, %v2415_v43 }
 0xa24   :  { %v2598_v44 = vadd.f32 %v2588_v12, %v5069_v35  ;;  %v3588_v12 = vld [vmem:[%s5199_s16] ss:$0 sm:$0xff] }
 0xa25   :  { %2574 = vmatmul.bf16.gmra.mxu3 %v2422_v31  ;;  %2594 = vmatmul.bf16.gmra.mxu2 %v2423_v18 }
 0xa26   :  { %2604 = vadd.xlane.f32.xlu1 %v2598_v44 }
 0xa27   :  { %v2569_v45 = vpop.f32.mrf.mxu3  ;;  %v2589_v49 = vpop.f32.mrf.mxu2 }
 0xa2f   :  { %v2571_v50 = vpop.f32.mrf.mxu3  ;;  %v2591_v52 = vpop.f32.mrf.mxu2 }
 0xa37   :  { %v2572_v37 = vpop.f32.mrf.mxu3  ;;  %v2592_v51 = vpop.f32.mrf.mxu2 }
 0xa38   :  { %v2573_v34 = vadd.f32 %v3585_v22, %v2572_v37 }
 0xa3a   :  { %v2593_v53 = vadd.f32 %v2592_v51, %v2573_v34 }
 0xa3c   :  { %v2599_v19 = vadd.f32 %v2593_v53, %v5079_v26  ;;  %v3565_v26 = vld [vmem:[%s5198_s15 + $0x38] sm:$0xff] }
 0xa3d   :  { %2728 = vmatpush.bf16.msra.mxu0 %v3565_v26 }
 0xa3e   :  { %2606 = vadd.xlane.f32.xlu0 %v2599_v19 }
 0xa41   :  { %2729 = vmatpush.bf16.msra.mxu0 %v3564_v11 }
 0xa45   :  { %2730 = vmatpush.bf16.msra.mxu0 %v3563_v47 }
 0xa49   :  { %2731 = vmatpush.bf16.msra.mxu0 %v3562_v33 }
 0xa4d   :  { %2732 = vmatpush.bf16.msra.mxu0 %v3561_v13 }
 0xa51   :  { %2733 = vmatpush.bf16.msra.mxu0 %v3560_v24 }
 0xa55   :  { %2734 = vmatpush.bf16.msra.mxu0 %v3559_v25 }
 0xa59   :  { %2735 = vmatpush.bf16.msra.mxu0 %v3558_v29 }
 0xa99   :  { %v2605_v27 = vpop.xlane.xlu1 %2604 }
 0xa9a   :  { %v2608_v54 = vmul.f32 %v2605_v27, %v4235_v1 }
 0xa9c   :  { %v2610_v23 = vsub.f32 %v2598_v44, %v2608_v54 }
 0xa9e   :  { %v2612_v56 = vmul.f32 %v2610_v23, %v2610_v23 }
 0xaa0   :  { %2614 = vadd.xlane.f32.xlu0 %v2612_v56 }
 0xaa8   :  { %v2575_v35 = vpop.f32.mrf.mxu3  ;;  %v2595_v46 = vpop.f32.mrf.mxu2 }
 0xab0   :  { %v2576_v14 = vpop.f32.mrf.mxu3  ;;  %v2596_v59 = vpop.f32.mrf.mxu2 }
 0xab1   :  { %v2607_v4 = vpop.xlane.xlu0 %2606 }
 0xab2   :  { %v2609_v10 = vmul.f32 %v2607_v4, %v4235_v1 }
 0xab4   :  { %v2611_v48 = vsub.f32 %v2599_v19, %v2609_v10 }
 0xab6   :  { %v2613_v55 = vmul.f32 %v2611_v48, %v2611_v48 }
 0xab8   :  { %2616 = vadd.xlane.f32.xlu2 %v2613_v55 }
 0xb13   :  { %v2615_v16 = vpop.xlane.xlu0 %2614 }
 0xb14   :  { %v2618_v40 = vmul.f32 %v2615_v16, %v4235_v1 }
 0xb16   :  { %v2620_v9 = vadd.f32 1e-05, %v2618_v40 }
 0xb18   :  { %3699 = vrsqrt.f32 %v2620_v9  ;;  %vm2628_vm10 = vweird.f32 %v2620_v9 }
 0xb1e   :  { %v3700_v17 = vpop.eup %3699 }
 0xb1f   :  { %v2623_v30 = vmul.f32 %v3700_v17, %v2620_v9  ;;  %vm2629_vm9 = vweird.f32 %v3700_v17 }
 0xb20   :  { %vm2630_vm11 = vmor %vm2628_vm10, %vm2629_vm9 }
 0xb21   :  { %v2624_v5 = vmul.f32 %v3700_v17, %v2623_v30 }
 0xb23   :  { %v2625_v3 = vmul.f32 0.5, %v2624_v5 }
 0xb25   :  { %v2626_v58 = vsub.f32 1.5, %v2625_v3 }
 0xb27   :  { %v2627_v28 = vmul.f32 %v3700_v17, %v2626_v58 }
 0xb29   :  { %v2631_v22 = vsel %vm2630_vm11, %v3700_v17, %v2627_v28 }
 0xb2a   :  { %v2642_v62 = vmul.f32 %v2631_v22, %v2610_v23 }
 0xb2b   :  { %v2617_v32 = vpop.xlane.xlu2 %2616 }
 0xb2c   :  { %v2619_v57 = vmul.f32 %v2617_v32, %v4235_v1  ;;  %v3586_v1 = vld [vmem:[%s5196_s13 + $0x1] ss:$0 sm:$0xff]  ;;  %s3747_s13 = smov [#allocation2]  }
 0xb2d   :  { %v2647_v36 = vmul.f32 %v3586_v1, %v2642_v62  ;;  %s2747_s0 = sshll.u32 %s3747_s13, 4  ;;  %s2748_s0 = int_to_ptr.vmem [resolvable:$true] %s2747_s0 }
 0xb2e   :  { %v2621_v21 = vadd.f32 1e-05, %v2619_v57 }
 0xb2f   :  { %v2652_v42 = vadd.f32 %v3587_v63, %v2647_v36 }
 0xb30   :  { %3701 = vrsqrt.f32 %v2621_v21  ;;  %vm2638_vm13 = vweird.f32 %v2621_v21 }
 0xb36   :  { %v3702_v7 = vpop.eup %3701 }
 0xb37   :  { %v2633_v38 = vmul.f32 %v3702_v7, %v2621_v21  ;;  %vm2639_vm12 = vweird.f32 %v3702_v7 }
 0xb38   :  { %vm2640_vm14 = vmor %vm2638_vm13, %vm2639_vm12 }
 0xb39   :  { %v2634_v39 = vmul.f32 %v3702_v7, %v2633_v38 }
 0xb3b   :  { %v2635_v60 = vmul.f32 0.5, %v2634_v39 }
 0xb3d   :  { %v2636_v8 = vsub.f32 1.5, %v2635_v60 }
 0xb3f   :  { %v2637_v20 = vmul.f32 %v3702_v7, %v2636_v8 }
 0xb41   :  { %v2641_v61 = vsel %vm2640_vm14, %v3702_v7, %v2637_v20 }
 0xb42   :  { %v2643_v41 = vmul.f32 %v2641_v61, %v2611_v48 }
 0xb44   :  { %v2648_v0 = vmul.f32 %v3586_v1, %v2643_v41 }
 0xb46   :  { %v2653_v15 = vadd.f32 %v3587_v63, %v2648_v0 }
 0xb48   :  { %v2655_v43 = vrot.slane %v2653_v15, 7 }
 0xb4a   :  { %v2658_v2 = vsel %vm2657_vm15, %v2652_v42, %v2655_v43 }
 0xb4b   :  { %v2659_v6 = vpack.c.bf16 %v2658_v2, %v2658_v2 }
 0xb4d   :  { %2736 = vmatmul.bf16.vlgmr.msra.gmra.mxu0 %v2659_v6 }
 0xbca   :  { %v2737_v31 = vpop.f32.mrf.mxu0 }
 0xbcb   :  { %v2738_v18 = vadd.f32 %v3588_v12, %v2737_v31 }
 0xbcd   :  { %2741 = vst [vmem:[#allocation2] sm:$0x3] %v2738_v18 }
 0xbce   :  { %2752 = dma.vmem_to_hbm [thread:$0]  %s2748_s0, 32, %s2750_s10, [#allocation3]  }
 0xbd2   :  { %v2739_v44 = vpop.f32.mrf.mxu0 }
 0xbd3   :  { %3744 = dma.done.wait [#allocation3], 32  }
 0xbd4   :  { %3745 = vsyncadd [#allocation3], 4294967264 }
 0xbd5   :  { %2757 = vsyncpa [#allocation3], 1 }

</bundles_post_ra>
